<compile_context>
chip_gen: v6e
topology: v6e:2x2x1
jax: 0.10.0
libtpu: 0.0.40
codegen_flags: <defaults>
</compile_context>

<pallas_src>
import jax
import jax.numpy as jnp
import numpy as np
from jax.experimental import pallas as pl
from jax.experimental.pallas import tpu as pltpu

N_EMBD = 384          # number_of_embeddings (module constant)
HIDDEN = 4 * N_EMBD   # 1536
DROPOUT_P = 0.2       # identity at inference


# ----------------------------- Pallas kernel ---------------------------------
def ffn_kernel(x_ref, w1_ref, b1_ref, w2_ref, b2_ref, o_ref):
    x = x_ref[...]                                                  # (TM, C)
    h = jnp.dot(x, w1_ref[...],
                preferred_element_type=jnp.float32) + b1_ref[...]   # (TM, 4C)
    h = jnp.maximum(h, 0.0)                                         # ReLU
    y = jnp.dot(h, w2_ref[...],
                preferred_element_type=jnp.float32) + b2_ref[...]   # (TM, C)
    # Dropout(p=0.2) == identity in eval mode.
    o_ref[...] = y.astype(o_ref.dtype)


# ------------------------------ wrapper ---------------------------------------
def _round_up(a, b):
    return (a + b - 1) // b * b


def feed_forward(x, params, *, row_tile=512):
    """x: (..., C) float32 -> (..., C) float32 via the fused FFN kernel."""
    w1, b1, w2, b2 = params["w1"], params["b1"], params["w2"], params["b2"]
    C = x.shape[-1]
    H = w1.shape[1]
    orig_shape = x.shape

    # Fold every leading axis into rows: one slab, one pallas_call.
    x2 = x.reshape(-1, C)
    M = x2.shape[0]

    # Row tile: multiple of 8 (sublane), capped so huge inputs still pipeline.
    TM = _round_up(M, 8) if M <= row_tile else row_tile
    M_pad = _round_up(M, TM)
    if M_pad != M:
        x2 = jnp.pad(x2, ((0, M_pad - M), (0, 0)))

    grid = (M_pad // TM,)

    out = pl.pallas_call(
        ffn_kernel,
        out_shape=jax.ShapeDtypeStruct((M_pad, C), x.dtype),
        grid=grid,
        in_specs=[
            pl.BlockSpec((TM, C), lambda i: (i, 0)),     # activations (tiled)
            pl.BlockSpec((C, H), lambda i: (0, 0)),      # W1 (resident)
            pl.BlockSpec((1, H), lambda i: (0, 0)),      # b1
            pl.BlockSpec((H, C), lambda i: (0, 0)),      # W2 (resident)
            pl.BlockSpec((1, C), lambda i: (0, 0)),      # b2
        ],
        out_specs=pl.BlockSpec((TM, C), lambda i: (i, 0)),
        compiler_params=pltpu.CompilerParams(
            dimension_semantics=("parallel",)),          # rows are independent
    )(x2, w1, b1, w2, b2)

    return out[:M].reshape(orig_shape)


# ----------------------- deterministic parameter init -------------------------
def init_params(key, n_embd=N_EMBD):
    std = 0.02
    k1, k2, k3, k4 = jax.random.split(key, 4)
    C, H = n_embd, 4 * n_embd
    return {
        "w1": jax.random.normal(k1, (C, H), jnp.float32) * std,
        "b1": jax.random.normal(k2, (1, H), jnp.float32) * std,
        "w2": jax.random.normal(k3, (H, C), jnp.float32) * std,
        "b2": jax.random.normal(k4, (1, C), jnp.float32) * std,
    }


# ------------------------------ pure-JAX reference ----------------------------
def reference_forward(x, p):
    h = jnp.dot(x, p["w1"], precision=jax.lax.Precision.HIGHEST,
                preferred_element_type=jnp.float32) + p["b1"][0]
    h = jnp.maximum(h, 0.0)
    y = jnp.dot(h, p["w2"], precision=jax.lax.Precision.HIGHEST,
                preferred_element_type=jnp.float32) + p["b2"][0]
    return y  # Dropout is identity in eval mode.


# ----------------------------------- main --------------------------------------
if __name__ == "__main__":
    key = jax.random.PRNGKey(0)
    pkey, xkey = jax.random.split(key)
    params = init_params(pkey)

    B, T = 2, 8                       # small batch / sequence
    x = jax.random.normal(xkey, (B, T, N_EMBD), jnp.float32)

    y = jax.block_until_ready(feed_forward(x, params))
    ref = jax.block_until_ready(reference_forward(x, params))

    np.testing.assert_allclose(np.asarray(y), np.asarray(ref),
                               rtol=1e-4, atol=1e-4)
    assert y.shape == (B, T, N_EMBD)
    print("KERNEL_OK")
</pallas_src>

<mosaic_0001>
module attributes {stable_mosaic.version = 11 : i64} {
  func.func @ffn_kernel(%arg0: i32, %arg1: memref<16x384xf32, #tpu.memory_space<vmem>>, %arg2: memref<384x1536xf32, #tpu.memory_space<vmem>>, %arg3: memref<1x1536xf32, #tpu.memory_space<vmem>>, %arg4: memref<1536x384xf32, #tpu.memory_space<vmem>>, %arg5: memref<1x384xf32, #tpu.memory_space<vmem>>, %arg6: memref<16x384xf32, #tpu.memory_space<vmem>>) attributes {dimension_semantics = [#tpu.dimension_semantics<parallel>], iteration_bounds = array<i64: 1>, scalar_prefetch = 0 : i64, scratch_operands = 0 : i64, tpu.core_type = #tpu.core_type<tc>, window_params = [{transform_indices = @transform_0, window_bounds = array<i64: 16, 384>}, {pipeline_mode = #tpu.pipeline_mode<synchronous>, transform_indices = @transform_1, window_bounds = array<i64: 384, 1536>}, {pipeline_mode = #tpu.pipeline_mode<synchronous>, transform_indices = @transform_2, window_bounds = array<i64: 1, 1536>}, {pipeline_mode = #tpu.pipeline_mode<synchronous>, transform_indices = @transform_3, window_bounds = array<i64: 1536, 384>}, {pipeline_mode = #tpu.pipeline_mode<synchronous>, transform_indices = @transform_4, window_bounds = array<i64: 1, 384>}, {transform_indices = @transform_5, window_bounds = array<i64: 16, 384>}]} {
    %c0 = arith.constant 0 : index
    %c0_0 = arith.constant 0 : index
    %0 = vector.load %arg1[%c0, %c0_0] : memref<16x384xf32, #tpu.memory_space<vmem>>, vector<16x384xf32>
    %c0_1 = arith.constant 0 : index
    %c0_2 = arith.constant 0 : index
    %1 = vector.load %arg2[%c0_1, %c0_2] : memref<384x1536xf32, #tpu.memory_space<vmem>>, vector<384x1536xf32>
    %cst = arith.constant dense<0.000000e+00> : vector<16x1536xf32>
    %2 = tpu.matmul %0, %1, %cst {dimension_numbers = #tpu.dot_dimension_numbers<[1], [0], [0], [1], [0, 0, 1, 1], [], []>} : vector<16x384xf32>, vector<384x1536xf32>, vector<16x1536xf32> -> vector<16x1536xf32>
    %c0_3 = arith.constant 0 : index
    %c0_4 = arith.constant 0 : index
    %3 = vector.load %arg3[%c0_3, %c0_4] : memref<1x1536xf32, #tpu.memory_space<vmem>>, vector<1x1536xf32>
    %4 = vector.broadcast %3 : vector<1x1536xf32> to vector<16x1536xf32>
    %5 = arith.addf %2, %4 : vector<16x1536xf32>
    %cst_5 = arith.constant 0.000000e+00 : f32
    %6 = vector.broadcast %cst_5 : f32 to vector<16x1536xf32>
    %7 = arith.maximumf %5, %6 : vector<16x1536xf32>
    %c0_6 = arith.constant 0 : index
    %c0_7 = arith.constant 0 : index
    %8 = vector.load %arg4[%c0_6, %c0_7] : memref<1536x384xf32, #tpu.memory_space<vmem>>, vector<1536x384xf32>
    %cst_8 = arith.constant dense<0.000000e+00> : vector<16x384xf32>
    %9 = tpu.matmul %7, %8, %cst_8 {dimension_numbers = #tpu.dot_dimension_numbers<[1], [0], [0], [1], [0, 0, 1, 1], [], []>} : vector<16x1536xf32>, vector<1536x384xf32>, vector<16x384xf32> -> vector<16x384xf32>
    %c0_9 = arith.constant 0 : index
    %c0_10 = arith.constant 0 : index
    %10 = vector.load %arg5[%c0_9, %c0_10] : memref<1x384xf32, #tpu.memory_space<vmem>>, vector<1x384xf32>
    %11 = vector.broadcast %10 : vector<1x384xf32> to vector<16x384xf32>
    %12 = arith.addf %9, %11 : vector<16x384xf32>
    %c0_11 = arith.constant 0 : index
    %c0_12 = arith.constant 0 : index
    %13 = vector.load %arg6[%c0_11, %c0_12] : memref<16x384xf32, #tpu.memory_space<vmem>>, vector<16x384xf32>
    tpu.vector_store %arg6[%c0_11, %c0_12], %12 {strides = array<i32>} : memref<16x384xf32, #tpu.memory_space<vmem>>, vector<16x384xf32>,
    return
  }
  func.func @transform_0(%arg0: i32) -> (i32, i32) {
    %c0_i32 = arith.constant 0 : i32
    %c0_i32_0 = arith.constant 0 : i32
    return %arg0, %c0_i32 : i32, i32
  }
  func.func @transform_1(%arg0: i32) -> (i32, i32) {
    %c0_i32 = arith.constant 0 : i32
    %c0_i32_0 = arith.constant 0 : i32
    %c0_i32_1 = arith.constant 0 : i32
    return %c0_i32, %c0_i32_0 : i32, i32
  }
  func.func @transform_2(%arg0: i32) -> (i32, i32) {
    %c0_i32 = arith.constant 0 : i32
    %c0_i32_0 = arith.constant 0 : i32
    %c0_i32_1 = arith.constant 0 : i32
    return %c0_i32, %c0_i32_0 : i32, i32
  }
  func.func @transform_3(%arg0: i32) -> (i32, i32) {
    %c0_i32 = arith.constant 0 : i32
    %c0_i32_0 = arith.constant 0 : i32
    %c0_i32_1 = arith.constant 0 : i32
    return %c0_i32, %c0_i32_0 : i32, i32
  }
  func.func @transform_4(%arg0: i32) -> (i32, i32) {
    %c0_i32 = arith.constant 0 : i32
    %c0_i32_0 = arith.constant 0 : i32
    %c0_i32_1 = arith.constant 0 : i32
    return %c0_i32, %c0_i32_0 : i32, i32
  }
  func.func @transform_5(%arg0: i32) -> (i32, i32) {
    %c0_i32 = arith.constant 0 : i32
    %c0_i32_0 = arith.constant 0 : i32
    return %arg0, %c0_i32 : i32, i32
  }
}

</mosaic_0001>

<bundles_post_ra>
// kernel: tpu_custom_call.1
= control target key start
LH: loop header
LB: loop body
LE: loop exit
PB: predicated region body
PF: predicated region fallthrough
CT: control target
= control target key end

     0   :  { %10 = vsyncpa [#allocation3], 0  ;;  %s4022_s0 = inlined_call_operand.hbm [shape: f32[16,384], index: 0, kind: input, shape index: {}]   ;;  %s4023_s1 = inlined_call_operand.hbm [shape: f32[384,1536], index: 1, kind: input, shape index: {}]   ;;  %s4024_s2 = inlined_call_operand.hbm [shape: f32[1,1536], index: 2, kind: input, shape index: {}]   ;;  %s4025_s3 = inlined_call_operand.hbm [shape: f32[1536,384], index: 3, kind: input, shape index: {}]   ;;  %s4026_s4 = inlined_call_operand.hbm [shape: f32[1,384], index: 4, kind: input, shape index: {}]   ;;  %s4027_s5 = inlined_call_operand.hbm [shape: f32[16,384], index: 5, kind: output, shape index: {}]  }
   0x1   :  { %11 = vsyncpa [#allocation6], 0 }
   0x2   :  { %12 = vsyncpa [#allocation9], 0 }
   0x3   :  { %13 = vsyncpa [#allocation4], 0  ;;  %s3583_s18 = smov [#allocation5]  }
   0x4   :  { %s31_s19 = sshll.u32 %s3583_s18, 4  ;;  %s32_s19 = int_to_ptr.vmem [resolvable:$true] %s31_s19 }
   0x5   :  { %s3463_s20 = scalar_lea.vmem %s32_s19, 73728  ;;  %p3468_p1 = scmp.lt.s32.totalorder %s32_s19, %s32_s19 }
   0x6   :  { %p3464_p0 = scmp.ne.s32.totalorder %s32_s19, %s3463_s20  ;;  %p3469_p2 = scmp.lt.s32.totalorder %s3463_s20, %s3463_s20 }
   0x8   :  { %p3470_p3 = por %p3469_p2, %p3468_p1 }
   0xa   :  { %p3471_p4 = pnand %p3470_p3, %p3464_p0 }
   0xc   :  { %3474 = shalt.err (!%p3471_p4)
}
   0xd   :  { %s3584_s21 = smov 1536   ;;  %s3585_s22 = smov 96  }
   0xe   :  { %37 = dma.hbm_to_vmem [thread:$0]  %s4023_s1, 73728, %s32_s19, [#allocation6], %s3584_s21, %s3584_s21, %s3585_s22  }
   0xf   :  { %s3586_s25 = smov [#allocation8]   ;;  %s3587_s27 = smov [#allocation2]  }
  0x10   :  { %s53_s26 = sshll.u32 %s3586_s25, 4  ;;  %s19_s28 = sshll.u32 %s3587_s27, 4  ;;  %s54_s26 = int_to_ptr.vmem [resolvable:$true] %s53_s26  ;;  %s20_s28 = int_to_ptr.vmem [resolvable:$true] %s19_s28 }
  0x11   :  { %s3483_s29 = scalar_lea.vmem %s54_s26, 73728  ;;  %p3488_p6 = scmp.lt.s32.totalorder %s54_s26, %s54_s26 }
  0x12   :  { %p3484_p5 = scmp.ne.s32.totalorder %s54_s26, %s3483_s29  ;;  %p3489_p7 = scmp.lt.s32.totalorder %s3483_s29, %s3483_s29 }
  0x14   :  { %p3490_p8 = por %p3489_p7, %p3488_p6 }
  0x16   :  { %p3491_p9 = pnand %p3490_p8, %p3484_p5 }
  0x18   :  { %3494 = shalt.err (!%p3491_p9)
}
  0x19   :  { %s3588_s30 = smov 384   ;;  %s3589_s6 = smov 24  }
  0x1a   :  { %59 = dma.hbm_to_vmem [thread:$0]  %s4025_s3, 73728, %s54_s26, [#allocation9], %s3588_s30, %s3588_s30, %s3589_s6  }
  0x1b   :  { %s3503_s1 = scalar_lea.vmem %s20_s28, 768  ;;  %p3508_p11 = scmp.lt.s32.totalorder %s20_s28, %s20_s28 }
  0x1c   :  { %p3504_p10 = scmp.ne.s32.totalorder %s20_s28, %s3503_s1  ;;  %p3509_p12 = scmp.lt.s32.totalorder %s3503_s1, %s3503_s1 }
  0x1e   :  { %p3510_p13 = por %p3509_p12, %p3508_p11 }
  0x20   :  { %p3511_p0 = pnand %p3510_p13, %p3504_p10 }
  0x22   :  { %3514 = shalt.err (!%p3511_p0)
}
  0x23   :  { %25 = dma.hbm_to_vmem [thread:$0]  %s4022_s0, 768, %s20_s28, [#allocation3], %s3588_s30, %s3588_s30, %s3589_s6  }
  0x24   :  { %s3590_s11 = smov [#allocation7]   ;;  %s3591_s13 = smov [#allocation10]  }
  0x25   :  { %s44_s12 = sshll.u32 %s3590_s11, 4  ;;  %s66_s3 = sshll.u32 %s3591_s13, 4  ;;  %s45_s12 = int_to_ptr.vmem [resolvable:$true] %s44_s12  ;;  %s67_s3 = int_to_ptr.vmem [resolvable:$true] %s66_s3 }
  0x26   :  { %s3523_s14 = scalar_lea.vmem %s45_s12, 192  ;;  %p3528_p2 = scmp.lt.s32.totalorder %s45_s12, %s45_s12 }
  0x27   :  { %p3524_p1 = scmp.ne.s32.totalorder %s45_s12, %s3523_s14  ;;  %p3529_p3 = scmp.lt.s32.totalorder %s3523_s14, %s3523_s14 }
  0x29   :  { %p3530_p4 = por %p3529_p3, %p3528_p2 }
  0x2b   :  { %p3531_p5 = pnand %p3530_p4, %p3524_p1 }
  0x2d   :  { %3534 = shalt.err (!%p3531_p5)
}
  0x2e   :  { %47 = dma.hbm_to_vmem [thread:$0]  %s4024_s2, 192, %s45_s12, [#allocation6]  }
  0x2f   :  { %s3543_s17 = scalar_lea.vmem %s67_s3, 48  ;;  %s3547_s0 = scalar_lea.vmem %s67_s3, 64 }
  0x30   :  { %p3544_p6 = scmp.ne.s32.totalorder %s67_s3, %s3543_s17  ;;  %p3548_p7 = scmp.lt.s32.totalorder %s67_s3, %s67_s3 }
  0x31   :  { %p3549_p8 = scmp.lt.s32.totalorder %s3547_s0, %s3543_s17 }
  0x33   :  { %p3550_p9 = por %p3549_p8, %p3548_p7 }
  0x35   :  { %p3551_p10 = pnand %p3550_p9, %p3544_p6 }
  0x37   :  { %3554 = shalt.err (!%p3551_p10)
}
  0x38   :  { %69 = dma.hbm_to_vmem [thread:$0]  %s4026_s4, 48, %s67_s3, [#allocation9]  }
  0x39   :  { %3575 = dma.done.wait [#allocation3], 768  }
  0x3a   :  { %3576 = vsyncadd [#allocation3], 4294966528 }
  0x3b   :  { %3577 = dma.done.wait [#allocation6], 73920  }
  0x3c   :  { %3578 = vsyncadd [#allocation6], 4294893376 }
  0x3d   :  { %3579 = dma.done.wait [#allocation9], 73776  }
  0x3e   :  { %3580 = vsyncadd [#allocation9], 4294893520  ;;  %v3592_v0 = vmov 0.0   ;;  %v272_v1 = vld [vmem:[#allocation5 + $0x5a8] sm:$0xff]  ;;  %v271_v3 = vld [vmem:[#allocation5 + $0x5a0] sm:$0xff]  ;;  %s3593_s2 = smov [#allocation11]  }
  0x3f   :  { %872 = vmatprep.mubr.f32.mxu1 %v3592_v0  ;;  %v656_v2 = vld [vmem:[#allocation5 + $0x11a8] sm:$0xff]  ;;  %731 = vmatprep.subr.mxu0 %v272_v1  ;;  %v655_v4 = vld [vmem:[#allocation5 + $0x11a0] sm:$0xff]  ;;  %s3195_s4 = sshll.u32 %s3593_s2, 4  ;;  %s3196_s4 = int_to_ptr.vmem [resolvable:$true] %s3195_s4 }
  0x40   :  { %808 = vmatprep.subr.mxu1 %v656_v2  ;;  %v260_v5 = vld [vmem:[#allocation5 + $0x548] sm:$0xff]  ;;  %732 = vmatpush1.msra.mxu0 %v271_v3  ;;  %v259_v7 = vld [vmem:[#allocation5 + $0x540] sm:$0xff]  ;;  %s3555_s20 = scalar_lea.vmem %s3196_s4, 768  ;;  %p3560_p12 = scmp.lt.s32.totalorder %s3196_s4, %s3196_s4 }
  0x41   :  { %v644_v6 = vld [vmem:[#allocation5 + $0x1148] sm:$0xff]  ;;  %809 = vmatpush1.msra.mxu1 %v655_v4  ;;  %v643_v8 = vld [vmem:[#allocation5 + $0x1140] sm:$0xff]  ;;  %733 = vmatprep.subr.mxu0 %v260_v5  ;;  %v274_v4 = vld [vmem:[#allocation5 + $0x5b8] sm:$0xff]  ;;  %p3556_p11 = scmp.ne.s32.totalorder %s3196_s4, %s3555_s20  ;;  %p3561_p13 = scmp.lt.s32.totalorder %s3555_s20, %s3555_s20 }
  0x42   :  { %v248_v9 = vld [vmem:[#allocation5 + $0x4e8] sm:$0xff]  ;;  %810 = vmatprep.subr.mxu1 %v644_v6  ;;  %v247_v11 = vld [vmem:[#allocation5 + $0x4e0] sm:$0xff]  ;;  %734 = vmatpush1.msra.mxu0 %v259_v7  ;;  %v273_v6 = vld [vmem:[#allocation5 + $0x5b0] sm:$0xff] }
  0x43   :  { %v632_v10 = vld [vmem:[#allocation5 + $0x10e8] sm:$0xff]  ;;  %v631_v12 = vld [vmem:[#allocation5 + $0x10e0] sm:$0xff]  ;;  %811 = vmatpush1.msra.mxu1 %v643_v8  ;;  %735 = vmatprep.subr.mxu0 %v248_v9  ;;  %v262_v8 = vld [vmem:[#allocation5 + $0x558] sm:$0xff]  ;;  %p3562_p0 = por %p3561_p13, %p3560_p12 }
  0x44   :  { %v236_v13 = vld [vmem:[#allocation5 + $0x488] sm:$0xff]  ;;  %812 = vmatprep.subr.mxu1 %v632_v10  ;;  %v235_v15 = vld [vmem:[#allocation5 + $0x480] sm:$0xff]  ;;  %736 = vmatpush1.msra.mxu0 %v247_v11  ;;  %v261_v10 = vld [vmem:[#allocation5 + $0x550] sm:$0xff] }
  0x45   :  { %v620_v14 = vld [vmem:[#allocation5 + $0x1088] sm:$0xff]  ;;  %v619_v16 = vld [vmem:[#allocation5 + $0x1080] sm:$0xff]  ;;  %813 = vmatpush1.msra.mxu1 %v631_v12  ;;  %737 = vmatprep.subr.mxu0 %v236_v13  ;;  %v250_v12 = vld [vmem:[#allocation5 + $0x4f8] sm:$0xff]  ;;  %p3563_p1 = pnand %p3562_p0, %p3556_p11 }
  0x46   :  { %v224_v17 = vld [vmem:[#allocation5 + $0x428] sm:$0xff]  ;;  %814 = vmatprep.subr.mxu1 %v620_v14  ;;  %v223_v19 = vld [vmem:[#allocation5 + $0x420] sm:$0xff]  ;;  %738 = vmatpush1.msra.mxu0 %v235_v15  ;;  %v249_v14 = vld [vmem:[#allocation5 + $0x4f0] sm:$0xff] }
  0x47   :  { %v608_v18 = vld [vmem:[#allocation5 + $0x1028] sm:$0xff]  ;;  %v607_v20 = vld [vmem:[#allocation5 + $0x1020] sm:$0xff]  ;;  %815 = vmatpush1.msra.mxu1 %v619_v16  ;;  %739 = vmatprep.subr.mxu0 %v224_v17  ;;  %v238_v16 = vld [vmem:[#allocation5 + $0x498] sm:$0xff] }
  0x48   :  { %v212_v21 = vld [vmem:[#allocation5 + $0x3c8] sm:$0xff]  ;;  %816 = vmatprep.subr.mxu1 %v608_v18  ;;  %v211_v23 = vld [vmem:[#allocation5 + $0x3c0] sm:$0xff]  ;;  %740 = vmatpush1.msra.mxu0 %v223_v19  ;;  %v237_v18 = vld [vmem:[#allocation5 + $0x490] sm:$0xff] }
  0x49   :  { %v596_v22 = vld [vmem:[#allocation5 + $0xfc8] sm:$0xff]  ;;  %v595_v24 = vld [vmem:[#allocation5 + $0xfc0] sm:$0xff]  ;;  %817 = vmatpush1.msra.mxu1 %v607_v20  ;;  %741 = vmatprep.subr.mxu0 %v212_v21  ;;  %v226_v20 = vld [vmem:[#allocation5 + $0x438] sm:$0xff] }
  0x4a   :  { %v200_v25 = vld [vmem:[#allocation5 + $0x368] sm:$0xff]  ;;  %818 = vmatprep.subr.mxu1 %v596_v22  ;;  %v199_v27 = vld [vmem:[#allocation5 + $0x360] sm:$0xff]  ;;  %742 = vmatpush1.msra.mxu0 %v211_v23  ;;  %v225_v22 = vld [vmem:[#allocation5 + $0x430] sm:$0xff] }
  0x4b   :  { %v584_v26 = vld [vmem:[#allocation5 + $0xf68] sm:$0xff]  ;;  %v583_v28 = vld [vmem:[#allocation5 + $0xf60] sm:$0xff]  ;;  %819 = vmatpush1.msra.mxu1 %v595_v24  ;;  %743 = vmatprep.subr.mxu0 %v200_v25  ;;  %v214_v24 = vld [vmem:[#allocation5 + $0x3d8] sm:$0xff] }
  0x4c   :  { %v188_v29 = vld [vmem:[#allocation5 + $0x308] sm:$0xff]  ;;  %820 = vmatprep.subr.mxu1 %v584_v26  ;;  %v187_v31 = vld [vmem:[#allocation5 + $0x300] sm:$0xff]  ;;  %744 = vmatpush1.msra.mxu0 %v199_v27  ;;  %v213_v26 = vld [vmem:[#allocation5 + $0x3d0] sm:$0xff] }
  0x4d   :  { %v572_v30 = vld [vmem:[#allocation5 + $0xf08] sm:$0xff]  ;;  %v571_v32 = vld [vmem:[#allocation5 + $0xf00] sm:$0xff]  ;;  %821 = vmatpush1.msra.mxu1 %v583_v28  ;;  %745 = vmatprep.subr.mxu0 %v188_v29  ;;  %v202_v28 = vld [vmem:[#allocation5 + $0x378] sm:$0xff] }
  0x4e   :  { %v176_v33 = vld [vmem:[#allocation5 + $0x2a8] sm:$0xff]  ;;  %822 = vmatprep.subr.mxu1 %v572_v30  ;;  %v175_v35 = vld [vmem:[#allocation5 + $0x2a0] sm:$0xff]  ;;  %746 = vmatpush1.msra.mxu0 %v187_v31  ;;  %v201_v30 = vld [vmem:[#allocation5 + $0x370] sm:$0xff] }
  0x4f   :  { %v560_v34 = vld [vmem:[#allocation5 + $0xea8] sm:$0xff]  ;;  %v559_v36 = vld [vmem:[#allocation5 + $0xea0] sm:$0xff]  ;;  %823 = vmatpush1.msra.mxu1 %v571_v32  ;;  %747 = vmatprep.subr.mxu0 %v176_v33  ;;  %v190_v32 = vld [vmem:[#allocation5 + $0x318] sm:$0xff] }
  0x50   :  { %v164_v37 = vld [vmem:[#allocation5 + $0x248] sm:$0xff]  ;;  %824 = vmatprep.subr.mxu1 %v560_v34  ;;  %v163_v39 = vld [vmem:[#allocation5 + $0x240] sm:$0xff]  ;;  %748 = vmatpush1.msra.mxu0 %v175_v35  ;;  %v189_v34 = vld [vmem:[#allocation5 + $0x310] sm:$0xff] }
  0x51   :  { %v548_v38 = vld [vmem:[#allocation5 + $0xe48] sm:$0xff]  ;;  %v547_v40 = vld [vmem:[#allocation5 + $0xe40] sm:$0xff]  ;;  %825 = vmatpush1.msra.mxu1 %v559_v36  ;;  %749 = vmatprep.subr.mxu0 %v164_v37  ;;  %v178_v36 = vld [vmem:[#allocation5 + $0x2b8] sm:$0xff] }
  0x52   :  { %v152_v41 = vld [vmem:[#allocation5 + $0x1e8] sm:$0xff]  ;;  %826 = vmatprep.subr.mxu1 %v548_v38  ;;  %v151_v43 = vld [vmem:[#allocation5 + $0x1e0] sm:$0xff]  ;;  %750 = vmatpush1.msra.mxu0 %v163_v39  ;;  %v177_v38 = vld [vmem:[#allocation5 + $0x2b0] sm:$0xff] }
  0x53   :  { %v536_v42 = vld [vmem:[#allocation5 + $0xde8] sm:$0xff]  ;;  %v535_v44 = vld [vmem:[#allocation5 + $0xde0] sm:$0xff]  ;;  %827 = vmatpush1.msra.mxu1 %v547_v40  ;;  %751 = vmatprep.subr.mxu0 %v152_v41  ;;  %v166_v40 = vld [vmem:[#allocation5 + $0x258] sm:$0xff] }
  0x54   :  { %v140_v45 = vld [vmem:[#allocation5 + $0x188] sm:$0xff]  ;;  %828 = vmatprep.subr.mxu1 %v536_v42  ;;  %v139_v47 = vld [vmem:[#allocation5 + $0x180] sm:$0xff]  ;;  %752 = vmatpush1.msra.mxu0 %v151_v43  ;;  %v165_v42 = vld [vmem:[#allocation5 + $0x250] sm:$0xff] }
  0x55   :  { %v524_v46 = vld [vmem:[#allocation5 + $0xd88] sm:$0xff]  ;;  %v523_v48 = vld [vmem:[#allocation5 + $0xd80] sm:$0xff]  ;;  %829 = vmatpush1.msra.mxu1 %v535_v44  ;;  %753 = vmatprep.subr.mxu0 %v140_v45  ;;  %v154_v44 = vld [vmem:[#allocation5 + $0x1f8] sm:$0xff] }
  0x56   :  { %v128_v49 = vld [vmem:[#allocation5 + $0x128] sm:$0xff]  ;;  %830 = vmatprep.subr.mxu1 %v524_v46  ;;  %v127_v51 = vld [vmem:[#allocation5 + $0x120] sm:$0xff]  ;;  %754 = vmatpush1.msra.mxu0 %v139_v47  ;;  %v153_v46 = vld [vmem:[#allocation5 + $0x1f0] sm:$0xff] }
  0x57   :  { %v512_v50 = vld [vmem:[#allocation5 + $0xd28] sm:$0xff]  ;;  %v511_v52 = vld [vmem:[#allocation5 + $0xd20] sm:$0xff]  ;;  %831 = vmatpush1.msra.mxu1 %v523_v48  ;;  %755 = vmatprep.subr.mxu0 %v128_v49  ;;  %v142_v48 = vld [vmem:[#allocation5 + $0x198] sm:$0xff] }
  0x58   :  { %v116_v53 = vld [vmem:[#allocation5 + $0xc8] sm:$0xff]  ;;  %832 = vmatprep.subr.mxu1 %v512_v50  ;;  %v115_v55 = vld [vmem:[#allocation5 + $0xc0] sm:$0xff]  ;;  %756 = vmatpush1.msra.mxu0 %v127_v51  ;;  %v141_v50 = vld [vmem:[#allocation5 + $0x190] sm:$0xff] }
  0x59   :  { %v500_v54 = vld [vmem:[#allocation5 + $0xcc8] sm:$0xff]  ;;  %v499_v56 = vld [vmem:[#allocation5 + $0xcc0] sm:$0xff]  ;;  %833 = vmatpush1.msra.mxu1 %v511_v52  ;;  %757 = vmatprep.subr.mxu0 %v116_v53  ;;  %v130_v52 = vld [vmem:[#allocation5 + $0x138] sm:$0xff] }
  0x5a   :  { %v104_v57 = vld [vmem:[#allocation5 + $0x68] sm:$0xff]  ;;  %834 = vmatprep.subr.mxu1 %v500_v54  ;;  %v103_v59 = vld [vmem:[#allocation5 + $0x60] sm:$0xff]  ;;  %758 = vmatpush1.msra.mxu0 %v115_v55  ;;  %v129_v54 = vld [vmem:[#allocation5 + $0x130] sm:$0xff] }
  0x5b   :  { %v488_v58 = vld [vmem:[#allocation5 + $0xc68] sm:$0xff]  ;;  %v487_v60 = vld [vmem:[#allocation5 + $0xc60] sm:$0xff]  ;;  %835 = vmatpush1.msra.mxu1 %v499_v56  ;;  %759 = vmatprep.subr.mxu0 %v104_v57  ;;  %v118_v56 = vld [vmem:[#allocation5 + $0xd8] sm:$0xff] }
  0x5c   :  { %v92_v61 = vld [vmem:[#allocation5 + $0x8] sm:$0xff]  ;;  %836 = vmatprep.subr.mxu1 %v488_v58  ;;  %v91_v63 = vld [vmem:[#allocation5] sm:$0xff]  ;;  %760 = vmatpush1.msra.mxu0 %v103_v59  ;;  %v117_v58 = vld [vmem:[#allocation5 + $0xd0] sm:$0xff] }
  0x5d   :  { %v476_v62 = vld [vmem:[#allocation5 + $0xc08] sm:$0xff]  ;;  %v475_v1 = vld [vmem:[#allocation5 + $0xc00] sm:$0xff]  ;;  %837 = vmatpush1.msra.mxu1 %v487_v60  ;;  %761 = vmatprep.subr.mxu0 %v92_v61  ;;  %v106_v60 = vld [vmem:[#allocation5 + $0x78] sm:$0xff] }
  0x5e   :  { %v464_v2 = vld [vmem:[#allocation5 + $0xba8] sm:$0xff]  ;;  %v3646_v3 = vld [vmem:[#allocation2 + $0x10] sm:$0xff]  ;;  %838 = vmatprep.subr.mxu1 %v476_v62  ;;  %762 = vmatpush1.msra.mxu0 %v91_v63  ;;  %v105_v62 = vld [vmem:[#allocation5 + $0x70] sm:$0xff] }
  0x5f   :  { %v463_v5 = vld [vmem:[#allocation5 + $0xba0] sm:$0xff]  ;;  %839 = vmatpush1.msra.mxu1 %v475_v1  ;;  %v452_v7 = vld [vmem:[#allocation5 + $0xb48] sm:$0xff]  ;;  %763 = vmatprep.subr.mxu0 %v464_v2  ;;  %v94_v1 = vld [vmem:[#allocation5 + $0x18] sm:$0xff] }
  0x60   :  { %873 = vmatmul.mubr.f32.vlgmr.msra.gmra.mxu1 %v3646_v3  ;;  %v451_v9 = vld [vmem:[#allocation5 + $0xb40] sm:$0xff]  ;;  %885 = vmatprep.subr.mxu1 %v274_v4  ;;  %v440_v11 = vld [vmem:[#allocation5 + $0xae8] sm:$0xff]  ;;  %v3649_v4 = vld [vmem:[#allocation2 + $0x8] sm:$0xff] }
  0x61   :  { %764 = vmatpush2.msra.mxu0 %v463_v5  ;;  %886 = vmatpush1.msra.mxu1 %v273_v6  ;;  %v439_v13 = vld [vmem:[#allocation5 + $0xae0] sm:$0xff]  ;;  %v428_v15 = vld [vmem:[#allocation5 + $0xa88] sm:$0xff]  ;;  %v93_v5 = vld [vmem:[#allocation5 + $0x10] sm:$0xff] }
  0x62   :  { %765 = vmatprep.subr.mxu0 %v452_v7  ;;  %887 = vmatprep.subr.mxu1 %v262_v8  ;;  %v427_v17 = vld [vmem:[#allocation5 + $0xa80] sm:$0xff]  ;;  %v416_v19 = vld [vmem:[#allocation5 + $0xa28] sm:$0xff]  ;;  %v3651_v6 = vld [vmem:[#allocation2] sm:$0xff] }
  0x63   :  { %766 = vmatpush2.msra.mxu0 %v451_v9  ;;  %888 = vmatpush1.msra.mxu1 %v261_v10  ;;  %v415_v21 = vld [vmem:[#allocation5 + $0xa20] sm:$0xff]  ;;  %v404_v23 = vld [vmem:[#allocation5 + $0x9c8] sm:$0xff]  ;;  %v466_v7 = vld [vmem:[#allocation5 + $0xbb8] sm:$0xff] }
  0x64   :  { %767 = vmatprep.subr.mxu0 %v440_v11  ;;  %889 = vmatprep.subr.mxu1 %v250_v12  ;;  %v403_v25 = vld [vmem:[#allocation5 + $0x9c0] sm:$0xff]  ;;  %v392_v27 = vld [vmem:[#allocation5 + $0x968] sm:$0xff]  ;;  %v658_v8 = vld [vmem:[#allocation5 + $0x11b8] sm:$0xff] }
  0x65   :  { %768 = vmatpush2.msra.mxu0 %v439_v13  ;;  %890 = vmatpush1.msra.mxu1 %v249_v14  ;;  %v391_v29 = vld [vmem:[#allocation5 + $0x960] sm:$0xff]  ;;  %v380_v31 = vld [vmem:[#allocation5 + $0x908] sm:$0xff]  ;;  %v465_v9 = vld [vmem:[#allocation5 + $0xbb0] sm:$0xff] }
  0x66   :  { %769 = vmatprep.subr.mxu0 %v428_v15  ;;  %891 = vmatprep.subr.mxu1 %v238_v16  ;;  %v379_v33 = vld [vmem:[#allocation5 + $0x900] sm:$0xff]  ;;  %v368_v35 = vld [vmem:[#allocation5 + $0x8a8] sm:$0xff]  ;;  %v657_v10 = vld [vmem:[#allocation5 + $0x11b0] sm:$0xff] }
  0x67   :  { %770 = vmatpush2.msra.mxu0 %v427_v17  ;;  %892 = vmatpush1.msra.mxu1 %v237_v18  ;;  %v367_v37 = vld [vmem:[#allocation5 + $0x8a0] sm:$0xff]  ;;  %v356_v39 = vld [vmem:[#allocation5 + $0x848] sm:$0xff]  ;;  %v454_v11 = vld [vmem:[#allocation5 + $0xb58] sm:$0xff] }
  0x68   :  { %771 = vmatprep.subr.mxu0 %v416_v19  ;;  %893 = vmatprep.subr.mxu1 %v226_v20  ;;  %v355_v41 = vld [vmem:[#allocation5 + $0x840] sm:$0xff]  ;;  %v344_v43 = vld [vmem:[#allocation5 + $0x7e8] sm:$0xff]  ;;  %v646_v12 = vld [vmem:[#allocation5 + $0x1158] sm:$0xff] }
  0x69   :  { %772 = vmatpush2.msra.mxu0 %v415_v21  ;;  %894 = vmatpush1.msra.mxu1 %v225_v22  ;;  %v343_v45 = vld [vmem:[#allocation5 + $0x7e0] sm:$0xff]  ;;  %v332_v47 = vld [vmem:[#allocation5 + $0x788] sm:$0xff]  ;;  %v453_v13 = vld [vmem:[#allocation5 + $0xb50] sm:$0xff] }
  0x6a   :  { %773 = vmatprep.subr.mxu0 %v404_v23  ;;  %895 = vmatprep.subr.mxu1 %v214_v24  ;;  %v331_v49 = vld [vmem:[#allocation5 + $0x780] sm:$0xff]  ;;  %v320_v51 = vld [vmem:[#allocation5 + $0x728] sm:$0xff]  ;;  %v645_v14 = vld [vmem:[#allocation5 + $0x1150] sm:$0xff] }
  0x6b   :  { %774 = vmatpush2.msra.mxu0 %v403_v25  ;;  %896 = vmatpush1.msra.mxu1 %v213_v26  ;;  %v319_v53 = vld [vmem:[#allocation5 + $0x720] sm:$0xff]  ;;  %v308_v55 = vld [vmem:[#allocation5 + $0x6c8] sm:$0xff]  ;;  %v442_v15 = vld [vmem:[#allocation5 + $0xaf8] sm:$0xff] }
  0x6c   :  { %775 = vmatprep.subr.mxu0 %v392_v27  ;;  %897 = vmatprep.subr.mxu1 %v202_v28  ;;  %v307_v57 = vld [vmem:[#allocation5 + $0x6c0] sm:$0xff]  ;;  %v296_v59 = vld [vmem:[#allocation5 + $0x668] sm:$0xff]  ;;  %v634_v16 = vld [vmem:[#allocation5 + $0x10f8] sm:$0xff] }
  0x6d   :  { %776 = vmatpush2.msra.mxu0 %v391_v29  ;;  %898 = vmatpush1.msra.mxu1 %v201_v30  ;;  %v295_v61 = vld [vmem:[#allocation5 + $0x660] sm:$0xff]  ;;  %v284_v63 = vld [vmem:[#allocation5 + $0x608] sm:$0xff]  ;;  %v441_v17 = vld [vmem:[#allocation5 + $0xaf0] sm:$0xff] }
  0x6e   :  { %777 = vmatprep.subr.mxu0 %v380_v31  ;;  %899 = vmatprep.subr.mxu1 %v190_v32  ;;  %v283_v2 = vld [vmem:[#allocation5 + $0x600] sm:$0xff]  ;;  %v633_v18 = vld [vmem:[#allocation5 + $0x10f0] sm:$0xff]  ;;  %v430_v19 = vld [vmem:[#allocation5 + $0xa98] sm:$0xff] }
  0x6f   :  { %778 = vmatpush2.msra.mxu0 %v379_v33  ;;  %900 = vmatpush1.msra.mxu1 %v189_v34  ;;  %v622_v20 = vld [vmem:[#allocation5 + $0x1098] sm:$0xff]  ;;  %v429_v21 = vld [vmem:[#allocation5 + $0xa90] sm:$0xff] }
  0x70   :  { %779 = vmatprep.subr.mxu0 %v368_v35  ;;  %901 = vmatprep.subr.mxu1 %v178_v36  ;;  %v621_v22 = vld [vmem:[#allocation5 + $0x1090] sm:$0xff]  ;;  %v418_v23 = vld [vmem:[#allocation5 + $0xa38] sm:$0xff] }
  0x71   :  { %780 = vmatpush2.msra.mxu0 %v367_v37  ;;  %902 = vmatpush1.msra.mxu1 %v177_v38  ;;  %v610_v24 = vld [vmem:[#allocation5 + $0x1038] sm:$0xff]  ;;  %v417_v25 = vld [vmem:[#allocation5 + $0xa30] sm:$0xff] }
  0x72   :  { %781 = vmatprep.subr.mxu0 %v356_v39  ;;  %903 = vmatprep.subr.mxu1 %v166_v40  ;;  %v609_v26 = vld [vmem:[#allocation5 + $0x1030] sm:$0xff]  ;;  %v406_v27 = vld [vmem:[#allocation5 + $0x9d8] sm:$0xff] }
  0x73   :  { %782 = vmatpush2.msra.mxu0 %v355_v41  ;;  %904 = vmatpush1.msra.mxu1 %v165_v42  ;;  %v598_v28 = vld [vmem:[#allocation5 + $0xfd8] sm:$0xff]  ;;  %v405_v29 = vld [vmem:[#allocation5 + $0x9d0] sm:$0xff] }
  0x74   :  { %783 = vmatprep.subr.mxu0 %v344_v43  ;;  %905 = vmatprep.subr.mxu1 %v154_v44  ;;  %v597_v30 = vld [vmem:[#allocation5 + $0xfd0] sm:$0xff]  ;;  %v394_v31 = vld [vmem:[#allocation5 + $0x978] sm:$0xff] }
  0x75   :  { %784 = vmatpush2.msra.mxu0 %v343_v45  ;;  %906 = vmatpush1.msra.mxu1 %v153_v46  ;;  %v586_v32 = vld [vmem:[#allocation5 + $0xf78] sm:$0xff]  ;;  %v393_v33 = vld [vmem:[#allocation5 + $0x970] sm:$0xff] }
  0x76   :  { %785 = vmatprep.subr.mxu0 %v332_v47  ;;  %907 = vmatprep.subr.mxu1 %v142_v48  ;;  %v585_v34 = vld [vmem:[#allocation5 + $0xf70] sm:$0xff]  ;;  %v382_v35 = vld [vmem:[#allocation5 + $0x918] sm:$0xff] }
  0x77   :  { %786 = vmatpush2.msra.mxu0 %v331_v49  ;;  %908 = vmatpush1.msra.mxu1 %v141_v50  ;;  %v574_v36 = vld [vmem:[#allocation5 + $0xf18] sm:$0xff]  ;;  %v381_v37 = vld [vmem:[#allocation5 + $0x910] sm:$0xff] }
  0x78   :  { %787 = vmatprep.subr.mxu0 %v320_v51  ;;  %909 = vmatprep.subr.mxu1 %v130_v52  ;;  %v573_v38 = vld [vmem:[#allocation5 + $0xf10] sm:$0xff]  ;;  %v370_v39 = vld [vmem:[#allocation5 + $0x8b8] sm:$0xff] }
  0x79   :  { %788 = vmatpush2.msra.mxu0 %v319_v53  ;;  %910 = vmatpush1.msra.mxu1 %v129_v54  ;;  %v562_v40 = vld [vmem:[#allocation5 + $0xeb8] sm:$0xff]  ;;  %v369_v41 = vld [vmem:[#allocation5 + $0x8b0] sm:$0xff] }
  0x7a   :  { %789 = vmatprep.subr.mxu0 %v308_v55  ;;  %911 = vmatprep.subr.mxu1 %v118_v56  ;;  %v561_v42 = vld [vmem:[#allocation5 + $0xeb0] sm:$0xff]  ;;  %v358_v43 = vld [vmem:[#allocation5 + $0x858] sm:$0xff] }
  0x7b   :  { %790 = vmatpush2.msra.mxu0 %v307_v57  ;;  %912 = vmatpush1.msra.mxu1 %v117_v58  ;;  %v550_v44 = vld [vmem:[#allocation5 + $0xe58] sm:$0xff]  ;;  %v357_v45 = vld [vmem:[#allocation5 + $0x850] sm:$0xff]  ;;  %v3657_v58 = vld [vmem:[#allocation2 + $0x18] sm:$0xff] }
  0x7c   :  { %791 = vmatprep.subr.mxu0 %v296_v59  ;;  %913 = vmatprep.subr.mxu1 %v106_v60  ;;  %v549_v46 = vld [vmem:[#allocation5 + $0xe50] sm:$0xff]  ;;  %v346_v47 = vld [vmem:[#allocation5 + $0x7f8] sm:$0xff] }
  0x7d   :  { %792 = vmatpush2.msra.mxu0 %v295_v61  ;;  %914 = vmatpush1.msra.mxu1 %v105_v62  ;;  %v538_v48 = vld [vmem:[#allocation5 + $0xdf8] sm:$0xff]  ;;  %v345_v49 = vld [vmem:[#allocation5 + $0x7f0] sm:$0xff] }
  0x7e   :  { %793 = vmatprep.subr.mxu0 %v284_v63  ;;  %915 = vmatprep.subr.mxu1 %v94_v1  ;;  %v537_v50 = vld [vmem:[#allocation5 + $0xdf0] sm:$0xff]  ;;  %v334_v51 = vld [vmem:[#allocation5 + $0x798] sm:$0xff] }
  0x7f   :  { %794 = vmatpush2.msra.mxu0 %v283_v2  ;;  %795 = vmatprep.mubr.f32.mxu0 %v3649_v4  ;;  %v526_v52 = vld [vmem:[#allocation5 + $0xd98] sm:$0xff]  ;;  %v333_v53 = vld [vmem:[#allocation5 + $0x790] sm:$0xff] }
  0x80   :  { %916 = vmatpush1.msra.mxu1 %v93_v5  ;;  %796 = vmatmul.mubr.f32.vlgmr.msra.gmra.mxu0 %v3651_v6  ;;  %v525_v54 = vld [vmem:[#allocation5 + $0xd90] sm:$0xff]  ;;  %v322_v56 = vld [vmem:[#allocation5 + $0x738] sm:$0xff] }
  0x81   :  { %917 = vmatprep.subr.mxu1 %v466_v7  ;;  %962 = vmatprep.subr.mxu0 %v658_v8  ;;  %v3655_v55 = vld [vmem:[#allocation2 + $0x20] sm:$0xff]  ;;  %v514_v57 = vld [vmem:[#allocation5 + $0xd38] sm:$0xff] }
  0x82   :  { %918 = vmatpush2.msra.mxu1 %v465_v9  ;;  %963 = vmatpush1.msra.mxu0 %v657_v10  ;;  %v321_v59 = vld [vmem:[#allocation5 + $0x730] sm:$0xff]  ;;  %v310_v61 = vld [vmem:[#allocation5 + $0x6d8] sm:$0xff] }
  0x83   :  { %919 = vmatprep.subr.mxu1 %v454_v11  ;;  %964 = vmatprep.subr.mxu0 %v646_v12  ;;  %v513_v60 = vld [vmem:[#allocation5 + $0xd30] sm:$0xff]  ;;  %v502_v62 = vld [vmem:[#allocation5 + $0xcd8] sm:$0xff] }
  0x84   :  { %920 = vmatpush2.msra.mxu1 %v453_v13  ;;  %965 = vmatpush1.msra.mxu0 %v645_v14  ;;  %v3661_v63 = vld [vmem:[#allocation2 + $0x28] sm:$0xff]  ;;  %v501_v1 = vld [vmem:[#allocation5 + $0xcd0] sm:$0xff]  ;;  %v276_v14 = vld [vmem:[#allocation5 + $0x5c8] sm:$0xff] }
  0x85   :  { %921 = vmatprep.subr.mxu1 %v442_v15  ;;  %966 = vmatprep.subr.mxu0 %v634_v16  ;;  %v309_v2 = vld [vmem:[#allocation5 + $0x6d0] sm:$0xff]  ;;  %v490_v5 = vld [vmem:[#allocation5 + $0xc78] sm:$0xff]  ;;  %v660_v15 = vld [vmem:[#allocation5 + $0x11c8] sm:$0xff] }
  0x86   :  { %922 = vmatpush2.msra.mxu1 %v441_v17  ;;  %967 = vmatpush1.msra.mxu0 %v633_v18  ;;  %v298_v7 = vld [vmem:[#allocation5 + $0x678] sm:$0xff]  ;;  %v489_v8 = vld [vmem:[#allocation5 + $0xc70] sm:$0xff]  ;;  %v659_v16 = vld [vmem:[#allocation5 + $0x11c0] sm:$0xff] }
  0x87   :  { %923 = vmatprep.subr.mxu1 %v430_v19  ;;  %968 = vmatprep.subr.mxu0 %v622_v20  ;;  %v297_v9 = vld [vmem:[#allocation5 + $0x670] sm:$0xff]  ;;  %v478_v10 = vld [vmem:[#allocation5 + $0xc18] sm:$0xff]  ;;  %v275_v17 = vld [vmem:[#allocation5 + $0x5c0] sm:$0xff] }
  0x88   :  { %924 = vmatpush2.msra.mxu1 %v429_v21  ;;  %969 = vmatpush1.msra.mxu0 %v621_v22  ;;  %v286_v11 = vld [vmem:[#allocation5 + $0x618] sm:$0xff]  ;;  %v285_v12 = vld [vmem:[#allocation5 + $0x610] sm:$0xff]  ;;  %v648_v18 = vld [vmem:[#allocation5 + $0x1168] sm:$0xff] }
  0x89   :  { %925 = vmatprep.subr.mxu1 %v418_v23  ;;  %970 = vmatprep.subr.mxu0 %v610_v24  ;;  %v477_v13 = vld [vmem:[#allocation5 + $0xc10] sm:$0xff]  ;;  %v264_v19 = vld [vmem:[#allocation5 + $0x568] sm:$0xff]  ;;  %v647_v20 = vld [vmem:[#allocation5 + $0x1160] sm:$0xff] }
  0x8a   :  { %926 = vmatpush2.msra.mxu1 %v417_v25  ;;  %971 = vmatpush1.msra.mxu0 %v609_v26  ;;  %v263_v21 = vld [vmem:[#allocation5 + $0x560] sm:$0xff]  ;;  %v636_v22 = vld [vmem:[#allocation5 + $0x1108] sm:$0xff] }
  0x8b   :  { %927 = vmatprep.subr.mxu1 %v406_v27  ;;  %972 = vmatprep.subr.mxu0 %v598_v28  ;;  %v252_v23 = vld [vmem:[#allocation5 + $0x508] sm:$0xff]  ;;  %v635_v24 = vld [vmem:[#allocation5 + $0x1100] sm:$0xff] }
  0x8c   :  { %928 = vmatpush2.msra.mxu1 %v405_v29  ;;  %973 = vmatpush1.msra.mxu0 %v597_v30  ;;  %v251_v25 = vld [vmem:[#allocation5 + $0x500] sm:$0xff]  ;;  %v624_v26 = vld [vmem:[#allocation5 + $0x10a8] sm:$0xff] }
  0x8d   :  { %929 = vmatprep.subr.mxu1 %v394_v31  ;;  %974 = vmatprep.subr.mxu0 %v586_v32  ;;  %v240_v27 = vld [vmem:[#allocation5 + $0x4a8] sm:$0xff]  ;;  %v623_v28 = vld [vmem:[#allocation5 + $0x10a0] sm:$0xff] }
  0x8e   :  { %930 = vmatpush2.msra.mxu1 %v393_v33  ;;  %975 = vmatpush1.msra.mxu0 %v585_v34  ;;  %v239_v29 = vld [vmem:[#allocation5 + $0x4a0] sm:$0xff]  ;;  %v612_v30 = vld [vmem:[#allocation5 + $0x1048] sm:$0xff] }
  0x8f   :  { %931 = vmatprep.subr.mxu1 %v382_v35  ;;  %976 = vmatprep.subr.mxu0 %v574_v36  ;;  %v228_v31 = vld [vmem:[#allocation5 + $0x448] sm:$0xff]  ;;  %v611_v32 = vld [vmem:[#allocation5 + $0x1040] sm:$0xff] }
  0x90   :  { %932 = vmatpush2.msra.mxu1 %v381_v37  ;;  %977 = vmatpush1.msra.mxu0 %v573_v38  ;;  %v227_v33 = vld [vmem:[#allocation5 + $0x440] sm:$0xff]  ;;  %v600_v34 = vld [vmem:[#allocation5 + $0xfe8] sm:$0xff] }
  0x91   :  { %933 = vmatprep.subr.mxu1 %v370_v39  ;;  %978 = vmatprep.subr.mxu0 %v562_v40  ;;  %v216_v35 = vld [vmem:[#allocation5 + $0x3e8] sm:$0xff]  ;;  %v599_v36 = vld [vmem:[#allocation5 + $0xfe0] sm:$0xff] }
  0x92   :  { %934 = vmatpush2.msra.mxu1 %v369_v41  ;;  %979 = vmatpush1.msra.mxu0 %v561_v42  ;;  %v215_v37 = vld [vmem:[#allocation5 + $0x3e0] sm:$0xff]  ;;  %v588_v38 = vld [vmem:[#allocation5 + $0xf88] sm:$0xff] }
  0x93   :  { %935 = vmatprep.subr.mxu1 %v358_v43  ;;  %980 = vmatprep.subr.mxu0 %v550_v44  ;;  %v204_v39 = vld [vmem:[#allocation5 + $0x388] sm:$0xff]  ;;  %v587_v40 = vld [vmem:[#allocation5 + $0xf80] sm:$0xff] }
  0x94   :  { %936 = vmatpush2.msra.mxu1 %v357_v45  ;;  %981 = vmatpush1.msra.mxu0 %v549_v46  ;;  %v203_v41 = vld [vmem:[#allocation5 + $0x380] sm:$0xff]  ;;  %v576_v42 = vld [vmem:[#allocation5 + $0xf28] sm:$0xff] }
  0x95   :  { %937 = vmatprep.subr.mxu1 %v346_v47  ;;  %982 = vmatprep.subr.mxu0 %v538_v48  ;;  %v192_v43 = vld [vmem:[#allocation5 + $0x328] sm:$0xff]  ;;  %v575_v44 = vld [vmem:[#allocation5 + $0xf20] sm:$0xff] }
  0x96   :  { %938 = vmatpush2.msra.mxu1 %v345_v49  ;;  %983 = vmatpush1.msra.mxu0 %v537_v50  ;;  %v191_v45 = vld [vmem:[#allocation5 + $0x320] sm:$0xff]  ;;  %v564_v46 = vld [vmem:[#allocation5 + $0xec8] sm:$0xff] }
  0x97   :  { %939 = vmatprep.subr.mxu1 %v334_v51  ;;  %984 = vmatprep.subr.mxu0 %v526_v52  ;;  %v180_v47 = vld [vmem:[#allocation5 + $0x2c8] sm:$0xff]  ;;  %v563_v48 = vld [vmem:[#allocation5 + $0xec0] sm:$0xff] }
  0x98   :  { %940 = vmatpush2.msra.mxu1 %v333_v53  ;;  %985 = vmatpush1.msra.mxu0 %v525_v54  ;;  %v179_v49 = vld [vmem:[#allocation5 + $0x2c0] sm:$0xff]  ;;  %v552_v50 = vld [vmem:[#allocation5 + $0xe68] sm:$0xff] }
  0x99   :  { %801 = vmatprep.mubr.f32.mxu0 %v3655_v55  ;;  %941 = vmatprep.subr.mxu1 %v322_v56  ;;  %v168_v51 = vld [vmem:[#allocation5 + $0x268] sm:$0xff]  ;;  %v551_v52 = vld [vmem:[#allocation5 + $0xe60] sm:$0xff] }
  0x9a   :  { %986 = vmatprep.subr.mxu0 %v514_v57  ;;  %802 = vmatmul.mubr.f32.gmra.mxu0 %v3657_v58  ;;  %v167_v53 = vld [vmem:[#allocation5 + $0x260] sm:$0xff]  ;;  %v540_v54 = vld [vmem:[#allocation5 + $0xe08] sm:$0xff] }
  0x9b   :  { %942 = vmatpush2.msra.mxu1 %v321_v59  ;;  %987 = vmatpush1.msra.mxu0 %v513_v60  ;;  %v156_v56 = vld [vmem:[#allocation5 + $0x208] sm:$0xff]  ;;  %v539_v57 = vld [vmem:[#allocation5 + $0xe00] sm:$0xff] }
  0x9c   :  { %878 = vmatprep.mubr.f32.mxu1 %v3592_v0  ;;  %943 = vmatprep.subr.mxu1 %v310_v61  ;;  %v155_v59 = vld [vmem:[#allocation5 + $0x200] sm:$0xff]  ;;  %v528_v60 = vld [vmem:[#allocation5 + $0xda8] sm:$0xff] }
  0x9d   :  { %988 = vmatprep.subr.mxu0 %v502_v62  ;;  %879 = vmatmul.mubr.f32.gmra.mxu1 %v3661_v63  ;;  %v144_v61 = vld [vmem:[#allocation5 + $0x1a8] sm:$0xff]  ;;  %v527_v62 = vld [vmem:[#allocation5 + $0xda0] sm:$0xff] }
  0x9e   :  { %989 = vmatpush1.msra.mxu0 %v501_v1  ;;  %944 = vmatpush2.msra.mxu1 %v309_v2  ;;  %v143_v1 = vld [vmem:[#allocation5 + $0x1a0] sm:$0xff]  ;;  %v516_v2 = vld [vmem:[#allocation5 + $0xd48] sm:$0xff] }
  0x9f   :  { %990 = vmatprep.subr.mxu0 %v490_v5  ;;  %945 = vmatprep.subr.mxu1 %v298_v7  ;;  %v132_v5 = vld [vmem:[#allocation5 + $0x148] sm:$0xff]  ;;  %v515_v7 = vld [vmem:[#allocation5 + $0xd40] sm:$0xff] }
  0xa0   :  { %991 = vmatpush1.msra.mxu0 %v489_v8  ;;  %946 = vmatpush2.msra.mxu1 %v297_v9  ;;  %v131_v8 = vld [vmem:[#allocation5 + $0x140] sm:$0xff]  ;;  %v120_v9 = vld [vmem:[#allocation5 + $0xe8] sm:$0xff] }
  0xa1   :  { %992 = vmatprep.subr.mxu0 %v478_v10  ;;  %947 = vmatprep.subr.mxu1 %v286_v11  ;;  %v504_v10 = vld [vmem:[#allocation5 + $0xce8] sm:$0xff]  ;;  %v119_v11 = vld [vmem:[#allocation5 + $0xe0] sm:$0xff] }
  0xa2   :  { %949 = vmatprep.mubr.f32.mxu1 %v3649_v4  ;;  %948 = vmatpush2.msra.mxu1 %v285_v12  ;;  %v503_v12 = vld [vmem:[#allocation5 + $0xce0] sm:$0xff] }
  0xa3   :  { %993 = vmatpush1.msra.mxu0 %v477_v13  ;;  %950 = vmatmul.mubr.f32.vlgmr.msra.gmra.mxu1 %v3651_v6  ;;  %v108_v13 = vld [vmem:[#allocation5 + $0x88] sm:$0xff] }
  0xa4   :  { %1026 = vmatprep.mubr.f32.mxu0 %v3592_v0  ;;  %1039 = vmatprep.subr.mxu0 %v276_v14  ;;  %v492_v14 = vld [vmem:[#allocation5 + $0xc88] sm:$0xff] }
  0xa5   :  { %1116 = vmatprep.subr.mxu1 %v660_v15  ;;  %1027 = vmatmul.mubr.f32.vlgmr.msra.gmra.mxu0 %v3646_v3  ;;  %v491_v15 = vld [vmem:[#allocation5 + $0xc80] sm:$0xff] }
  0xa6   :  { %1117 = vmatpush1.msra.mxu1 %v659_v16  ;;  %1040 = vmatpush1.msra.mxu0 %v275_v17  ;;  %v107_v16 = vld [vmem:[#allocation5 + $0x80] sm:$0xff]  ;;  %v480_v17 = vld [vmem:[#allocation5 + $0xc28] sm:$0xff] }
  0xa7   :  { %1118 = vmatprep.subr.mxu1 %v648_v18  ;;  %1041 = vmatprep.subr.mxu0 %v264_v19  ;;  %v96_v18 = vld [vmem:[#allocation5 + $0x28] sm:$0xff]  ;;  %v479_v19 = vld [vmem:[#allocation5 + $0xc20] sm:$0xff] }
  0xa8   :  { %1119 = vmatpush1.msra.mxu1 %v647_v20  ;;  %1042 = vmatpush1.msra.mxu0 %v263_v21  ;;  %v95_v20 = vld [vmem:[#allocation5 + $0x20] sm:$0xff]  ;;  %v468_v21 = vld [vmem:[#allocation5 + $0xbc8] sm:$0xff] }
  0xa9   :  { %1120 = vmatprep.subr.mxu1 %v636_v22  ;;  %1043 = vmatprep.subr.mxu0 %v252_v23  ;;  %v278_v22 = vld [vmem:[#allocation5 + $0x5d8] sm:$0xff]  ;;  %v467_v23 = vld [vmem:[#allocation5 + $0xbc0] sm:$0xff] }
  0xaa   :  { %1121 = vmatpush1.msra.mxu1 %v635_v24  ;;  %1044 = vmatpush1.msra.mxu0 %v251_v25  ;;  %v277_v24 = vld [vmem:[#allocation5 + $0x5d0] sm:$0xff]  ;;  %v456_v25 = vld [vmem:[#allocation5 + $0xb68] sm:$0xff] }
  0xab   :  { %1122 = vmatprep.subr.mxu1 %v624_v26  ;;  %1045 = vmatprep.subr.mxu0 %v240_v27  ;;  %v266_v26 = vld [vmem:[#allocation5 + $0x578] sm:$0xff]  ;;  %v455_v27 = vld [vmem:[#allocation5 + $0xb60] sm:$0xff] }
  0xac   :  { %1123 = vmatpush1.msra.mxu1 %v623_v28  ;;  %1046 = vmatpush1.msra.mxu0 %v239_v29  ;;  %v265_v28 = vld [vmem:[#allocation5 + $0x570] sm:$0xff]  ;;  %v444_v29 = vld [vmem:[#allocation5 + $0xb08] sm:$0xff] }
  0xad   :  { %1124 = vmatprep.subr.mxu1 %v612_v30  ;;  %1047 = vmatprep.subr.mxu0 %v228_v31  ;;  %v254_v30 = vld [vmem:[#allocation5 + $0x518] sm:$0xff]  ;;  %v443_v31 = vld [vmem:[#allocation5 + $0xb00] sm:$0xff] }
  0xae   :  { %1125 = vmatpush1.msra.mxu1 %v611_v32  ;;  %1048 = vmatpush1.msra.mxu0 %v227_v33  ;;  %v253_v32 = vld [vmem:[#allocation5 + $0x510] sm:$0xff]  ;;  %v432_v33 = vld [vmem:[#allocation5 + $0xaa8] sm:$0xff] }
  0xaf   :  { %1126 = vmatprep.subr.mxu1 %v600_v34  ;;  %1049 = vmatprep.subr.mxu0 %v216_v35  ;;  %v242_v34 = vld [vmem:[#allocation5 + $0x4b8] sm:$0xff]  ;;  %v431_v35 = vld [vmem:[#allocation5 + $0xaa0] sm:$0xff] }
  0xb0   :  { %1127 = vmatpush1.msra.mxu1 %v599_v36  ;;  %1050 = vmatpush1.msra.mxu0 %v215_v37  ;;  %v420_v36 = vld [vmem:[#allocation5 + $0xa48] sm:$0xff]  ;;  %v230_v37 = vld [vmem:[#allocation5 + $0x458] sm:$0xff] }
  0xb1   :  { %1128 = vmatprep.subr.mxu1 %v588_v38  ;;  %1051 = vmatprep.subr.mxu0 %v204_v39  ;;  %v419_v38 = vld [vmem:[#allocation5 + $0xa40] sm:$0xff]  ;;  %v229_v39 = vld [vmem:[#allocation5 + $0x450] sm:$0xff] }
  0xb2   :  { %1129 = vmatpush1.msra.mxu1 %v587_v40  ;;  %1052 = vmatpush1.msra.mxu0 %v203_v41  ;;  %v408_v40 = vld [vmem:[#allocation5 + $0x9e8] sm:$0xff]  ;;  %v218_v41 = vld [vmem:[#allocation5 + $0x3f8] sm:$0xff] }
  0xb3   :  { %1130 = vmatprep.subr.mxu1 %v576_v42  ;;  %1053 = vmatprep.subr.mxu0 %v192_v43  ;;  %v407_v42 = vld [vmem:[#allocation5 + $0x9e0] sm:$0xff]  ;;  %v217_v43 = vld [vmem:[#allocation5 + $0x3f0] sm:$0xff] }
  0xb4   :  { %1131 = vmatpush1.msra.mxu1 %v575_v44  ;;  %1054 = vmatpush1.msra.mxu0 %v191_v45  ;;  %v396_v44 = vld [vmem:[#allocation5 + $0x988] sm:$0xff]  ;;  %v206_v45 = vld [vmem:[#allocation5 + $0x398] sm:$0xff] }
  0xb5   :  { %1132 = vmatprep.subr.mxu1 %v564_v46  ;;  %1055 = vmatprep.subr.mxu0 %v180_v47  ;;  %v395_v46 = vld [vmem:[#allocation5 + $0x980] sm:$0xff]  ;;  %v205_v47 = vld [vmem:[#allocation5 + $0x390] sm:$0xff] }
  0xb6   :  { %1133 = vmatpush1.msra.mxu1 %v563_v48  ;;  %1056 = vmatpush1.msra.mxu0 %v179_v49  ;;  %v384_v48 = vld [vmem:[#allocation5 + $0x928] sm:$0xff]  ;;  %v194_v49 = vld [vmem:[#allocation5 + $0x338] sm:$0xff] }
  0xb7   :  { %1134 = vmatprep.subr.mxu1 %v552_v50  ;;  %1057 = vmatprep.subr.mxu0 %v168_v51  ;;  %v383_v50 = vld [vmem:[#allocation5 + $0x920] sm:$0xff]  ;;  %v193_v51 = vld [vmem:[#allocation5 + $0x330] sm:$0xff] }
  0xb8   :  { %1135 = vmatpush1.msra.mxu1 %v551_v52  ;;  %1058 = vmatpush1.msra.mxu0 %v167_v53  ;;  %v372_v52 = vld [vmem:[#allocation5 + $0x8c8] sm:$0xff]  ;;  %v182_v53 = vld [vmem:[#allocation5 + $0x2d8] sm:$0xff] }
  0xb9   :  { %1136 = vmatprep.subr.mxu1 %v540_v54  ;;  %1059 = vmatprep.subr.mxu0 %v156_v56  ;;  %v371_v54 = vld [vmem:[#allocation5 + $0x8c0] sm:$0xff]  ;;  %v181_v56 = vld [vmem:[#allocation5 + $0x2d0] sm:$0xff] }
  0xba   :  { %1137 = vmatpush1.msra.mxu1 %v539_v57  ;;  %1060 = vmatpush1.msra.mxu0 %v155_v59  ;;  %v360_v57 = vld [vmem:[#allocation5 + $0x868] sm:$0xff]  ;;  %v170_v59 = vld [vmem:[#allocation5 + $0x278] sm:$0xff] }
  0xbb   :  { %1138 = vmatprep.subr.mxu1 %v528_v60  ;;  %1061 = vmatprep.subr.mxu0 %v144_v61  ;;  %v359_v60 = vld [vmem:[#allocation5 + $0x860] sm:$0xff]  ;;  %v169_v61 = vld [vmem:[#allocation5 + $0x270] sm:$0xff] }
  0xbc   :  { %1139 = vmatpush1.msra.mxu1 %v527_v62  ;;  %1062 = vmatpush1.msra.mxu0 %v143_v1  ;;  %v348_v62 = vld [vmem:[#allocation5 + $0x808] sm:$0xff]  ;;  %v158_v1 = vld [vmem:[#allocation5 + $0x218] sm:$0xff] }
  0xbd   :  { %1140 = vmatprep.subr.mxu1 %v516_v2  ;;  %1063 = vmatprep.subr.mxu0 %v132_v5  ;;  %v347_v2 = vld [vmem:[#allocation5 + $0x800] sm:$0xff]  ;;  %v157_v5 = vld [vmem:[#allocation5 + $0x210] sm:$0xff] }
  0xbe   :  { %1141 = vmatpush1.msra.mxu1 %v515_v7  ;;  %1064 = vmatpush1.msra.mxu0 %v131_v8  ;;  %v336_v7 = vld [vmem:[#allocation5 + $0x7a8] sm:$0xff]  ;;  %v146_v8 = vld [vmem:[#allocation5 + $0x1b8] sm:$0xff] }
  0xbf   :  { %955 = vmatprep.mubr.f32.mxu1 %v3655_v55  ;;  %1065 = vmatprep.subr.mxu0 %v120_v9  ;;  %v335_v9 = vld [vmem:[#allocation5 + $0x7a0] sm:$0xff] }
  0xc0   :  { %1142 = vmatprep.subr.mxu1 %v504_v10  ;;  %956 = vmatmul.mubr.f32.gmra.mxu1 %v3657_v58  ;;  %v145_v10 = vld [vmem:[#allocation5 + $0x1b0] sm:$0xff] }
  0xc1   :  { %1066 = vmatpush1.msra.mxu0 %v119_v11  ;;  %1143 = vmatpush1.msra.mxu1 %v503_v12  ;;  %v324_v11 = vld [vmem:[#allocation5 + $0x748] sm:$0xff]  ;;  %v134_v12 = vld [vmem:[#allocation5 + $0x158] sm:$0xff] }
  0xc2   :  { %1032 = vmatprep.mubr.f32.mxu0 %v3592_v0  ;;  %1067 = vmatprep.subr.mxu0 %v108_v13  ;;  %v323_v13 = vld [vmem:[#allocation5 + $0x740] sm:$0xff] }
  0xc3   :  { %1144 = vmatprep.subr.mxu1 %v492_v14  ;;  %1033 = vmatmul.mubr.f32.gmra.mxu0 %v3661_v63  ;;  %v133_v14 = vld [vmem:[#allocation5 + $0x150] sm:$0xff] }
  0xc4   :  { %1145 = vmatpush1.msra.mxu1 %v491_v15  ;;  %1068 = vmatpush1.msra.mxu0 %v107_v16  ;;  %v312_v15 = vld [vmem:[#allocation5 + $0x6e8] sm:$0xff]  ;;  %v122_v16 = vld [vmem:[#allocation5 + $0xf8] sm:$0xff] }
  0xc5   :  { %1146 = vmatprep.subr.mxu1 %v480_v17  ;;  %1069 = vmatprep.subr.mxu0 %v96_v18  ;;  %v311_v17 = vld [vmem:[#allocation5 + $0x6e0] sm:$0xff]  ;;  %v121_v18 = vld [vmem:[#allocation5 + $0xf0] sm:$0xff] }
  0xc6   :  { %1147 = vmatpush1.msra.mxu1 %v479_v19  ;;  %1070 = vmatpush1.msra.mxu0 %v95_v20  ;;  %v300_v19 = vld [vmem:[#allocation5 + $0x688] sm:$0xff]  ;;  %v110_v20 = vld [vmem:[#allocation5 + $0x98] sm:$0xff] }
  0xc7   :  { %1180 = vmatprep.mubr.f32.mxu1 %v3592_v0  ;;  %1071 = vmatprep.subr.mxu0 %v468_v21  ;;  %v299_v21 = vld [vmem:[#allocation5 + $0x680] sm:$0xff] }
  0xc8   :  { %1181 = vmatmul.mubr.f32.vlgmr.msra.gmra.mxu1 %v3646_v3  ;;  %1193 = vmatprep.subr.mxu1 %v278_v22  ;;  %v241_v3 = vld [vmem:[#allocation5 + $0x4b0] sm:$0xff] }
  0xc9   :  { %1072 = vmatpush2.msra.mxu0 %v467_v23  ;;  %1194 = vmatpush1.msra.mxu1 %v277_v24  ;;  %v109_v22 = vld [vmem:[#allocation5 + $0x90] sm:$0xff]  ;;  %v288_v23 = vld [vmem:[#allocation5 + $0x628] sm:$0xff]  ;;  %v98_v24 = vld [vmem:[#allocation5 + $0x38] sm:$0xff] }
  0xca   :  { %1073 = vmatprep.subr.mxu0 %v456_v25  ;;  %1195 = vmatprep.subr.mxu1 %v266_v26  ;;  %v287_v25 = vld [vmem:[#allocation5 + $0x620] sm:$0xff]  ;;  %v97_v26 = vld [vmem:[#allocation5 + $0x30] sm:$0xff] }
  0xcb   :  { %1074 = vmatpush2.msra.mxu0 %v455_v27  ;;  %1196 = vmatpush1.msra.mxu1 %v265_v28  ;;  %v470_v27 = vld [vmem:[#allocation5 + $0xbd8] sm:$0xff] }
  0xcc   :  { %1075 = vmatprep.subr.mxu0 %v444_v29  ;;  %1197 = vmatprep.subr.mxu1 %v254_v30  ;;  %v662_v28 = vld [vmem:[#allocation5 + $0x11d8] sm:$0xff]  ;;  %v469_v29 = vld [vmem:[#allocation5 + $0xbd0] sm:$0xff] }
  0xcd   :  { %1076 = vmatpush2.msra.mxu0 %v443_v31  ;;  %1198 = vmatpush1.msra.mxu1 %v253_v32  ;;  %v661_v30 = vld [vmem:[#allocation5 + $0x11d0] sm:$0xff]  ;;  %v458_v31 = vld [vmem:[#allocation5 + $0xb78] sm:$0xff] }
  0xce   :  { %1077 = vmatprep.subr.mxu0 %v432_v33  ;;  %1199 = vmatprep.subr.mxu1 %v242_v34  ;;  %v650_v32 = vld [vmem:[#allocation5 + $0x1178] sm:$0xff]  ;;  %v457_v33 = vld [vmem:[#allocation5 + $0xb70] sm:$0xff] }
  0xcf   :  { %1078 = vmatpush2.msra.mxu0 %v431_v35  ;;  %1200 = vmatpush1.msra.mxu1 %v241_v3  ;;  %v649_v34 = vld [vmem:[#allocation5 + $0x1170] sm:$0xff]  ;;  %v446_v35 = vld [vmem:[#allocation5 + $0xb18] sm:$0xff] }
  0xd0   :  { %1079 = vmatprep.subr.mxu0 %v420_v36  ;;  %1201 = vmatprep.subr.mxu1 %v230_v37  ;;  %v638_v3 = vld [vmem:[#allocation5 + $0x1118] sm:$0xff]  ;;  %v445_v36 = vld [vmem:[#allocation5 + $0xb10] sm:$0xff] }
  0xd1   :  { %1080 = vmatpush2.msra.mxu0 %v419_v38  ;;  %1202 = vmatpush1.msra.mxu1 %v229_v39  ;;  %v637_v37 = vld [vmem:[#allocation5 + $0x1110] sm:$0xff]  ;;  %v626_v38 = vld [vmem:[#allocation5 + $0x10b8] sm:$0xff] }
  0xd2   :  { %1081 = vmatprep.subr.mxu0 %v408_v40  ;;  %1203 = vmatprep.subr.mxu1 %v218_v41  ;;  %v433_v39 = vld [vmem:[#allocation5 + $0xab0] sm:$0xff]  ;;  %v422_v40 = vld [vmem:[#allocation5 + $0xa58] sm:$0xff] }
  0xd3   :  { %1082 = vmatpush2.msra.mxu0 %v407_v42  ;;  %1204 = vmatpush1.msra.mxu1 %v217_v43  ;;  %v614_v41 = vld [vmem:[#allocation5 + $0x1058] sm:$0xff]  ;;  %v421_v42 = vld [vmem:[#allocation5 + $0xa50] sm:$0xff] }
  0xd4   :  { %1083 = vmatprep.subr.mxu0 %v396_v44  ;;  %1205 = vmatprep.subr.mxu1 %v206_v45  ;;  %v613_v43 = vld [vmem:[#allocation5 + $0x1050] sm:$0xff]  ;;  %v410_v44 = vld [vmem:[#allocation5 + $0x9f8] sm:$0xff] }
  0xd5   :  { %1084 = vmatpush2.msra.mxu0 %v395_v46  ;;  %1206 = vmatpush1.msra.mxu1 %v205_v47  ;;  %v602_v45 = vld [vmem:[#allocation5 + $0xff8] sm:$0xff]  ;;  %v409_v46 = vld [vmem:[#allocation5 + $0x9f0] sm:$0xff] }
  0xd6   :  { %1085 = vmatprep.subr.mxu0 %v384_v48  ;;  %1207 = vmatprep.subr.mxu1 %v194_v49  ;;  %v601_v47 = vld [vmem:[#allocation5 + $0xff0] sm:$0xff]  ;;  %v398_v48 = vld [vmem:[#allocation5 + $0x998] sm:$0xff] }
  0xd7   :  { %1086 = vmatpush2.msra.mxu0 %v383_v50  ;;  %1208 = vmatpush1.msra.mxu1 %v193_v51  ;;  %v590_v49 = vld [vmem:[#allocation5 + $0xf98] sm:$0xff]  ;;  %v397_v50 = vld [vmem:[#allocation5 + $0x990] sm:$0xff] }
  0xd8   :  { %1087 = vmatprep.subr.mxu0 %v372_v52  ;;  %1209 = vmatprep.subr.mxu1 %v182_v53  ;;  %v589_v51 = vld [vmem:[#allocation5 + $0xf90] sm:$0xff]  ;;  %v386_v52 = vld [vmem:[#allocation5 + $0x938] sm:$0xff] }
  0xd9   :  { %1088 = vmatpush2.msra.mxu0 %v371_v54  ;;  %1210 = vmatpush1.msra.mxu1 %v181_v56  ;;  %v578_v53 = vld [vmem:[#allocation5 + $0xf38] sm:$0xff]  ;;  %v385_v54 = vld [vmem:[#allocation5 + $0x930] sm:$0xff] }
  0xda   :  { %1089 = vmatprep.subr.mxu0 %v360_v57  ;;  %1211 = vmatprep.subr.mxu1 %v170_v59  ;;  %v577_v56 = vld [vmem:[#allocation5 + $0xf30] sm:$0xff]  ;;  %v374_v57 = vld [vmem:[#allocation5 + $0x8d8] sm:$0xff] }
  0xdb   :  { %1090 = vmatpush2.msra.mxu0 %v359_v60  ;;  %1212 = vmatpush1.msra.mxu1 %v169_v61  ;;  %v566_v59 = vld [vmem:[#allocation5 + $0xed8] sm:$0xff]  ;;  %v373_v60 = vld [vmem:[#allocation5 + $0x8d0] sm:$0xff] }
  0xdc   :  { %1091 = vmatprep.subr.mxu0 %v348_v62  ;;  %1213 = vmatprep.subr.mxu1 %v158_v1  ;;  %v565_v61 = vld [vmem:[#allocation5 + $0xed0] sm:$0xff]  ;;  %v362_v62 = vld [vmem:[#allocation5 + $0x878] sm:$0xff] }
  0xdd   :  { %1092 = vmatpush2.msra.mxu0 %v347_v2  ;;  %1214 = vmatpush1.msra.mxu1 %v157_v5  ;;  %v554_v1 = vld [vmem:[#allocation5 + $0xe78] sm:$0xff]  ;;  %v361_v2 = vld [vmem:[#allocation5 + $0x870] sm:$0xff] }
  0xde   :  { %1093 = vmatprep.subr.mxu0 %v336_v7  ;;  %1215 = vmatprep.subr.mxu1 %v146_v8  ;;  %v553_v5 = vld [vmem:[#allocation5 + $0xe70] sm:$0xff]  ;;  %v350_v7 = vld [vmem:[#allocation5 + $0x818] sm:$0xff] }
  0xdf   :  { %1094 = vmatpush2.msra.mxu0 %v335_v9  ;;  %1216 = vmatpush1.msra.mxu1 %v145_v10  ;;  %v542_v8 = vld [vmem:[#allocation5 + $0xe18] sm:$0xff]  ;;  %v349_v9 = vld [vmem:[#allocation5 + $0x810] sm:$0xff] }
  0xe0   :  { %1095 = vmatprep.subr.mxu0 %v324_v11  ;;  %1217 = vmatprep.subr.mxu1 %v134_v12  ;;  %v541_v10 = vld [vmem:[#allocation5 + $0xe10] sm:$0xff]  ;;  %v338_v11 = vld [vmem:[#allocation5 + $0x7b8] sm:$0xff] }
  0xe1   :  { %1096 = vmatpush2.msra.mxu0 %v323_v13  ;;  %1218 = vmatpush1.msra.mxu1 %v133_v14  ;;  %v530_v12 = vld [vmem:[#allocation5 + $0xdb8] sm:$0xff]  ;;  %v337_v13 = vld [vmem:[#allocation5 + $0x7b0] sm:$0xff] }
  0xe2   :  { %1097 = vmatprep.subr.mxu0 %v312_v15  ;;  %1219 = vmatprep.subr.mxu1 %v122_v16  ;;  %v529_v14 = vld [vmem:[#allocation5 + $0xdb0] sm:$0xff]  ;;  %v326_v15 = vld [vmem:[#allocation5 + $0x758] sm:$0xff] }
  0xe3   :  { %1098 = vmatpush2.msra.mxu0 %v311_v17  ;;  %1220 = vmatpush1.msra.mxu1 %v121_v18  ;;  %v518_v16 = vld [vmem:[#allocation5 + $0xd58] sm:$0xff]  ;;  %v325_v17 = vld [vmem:[#allocation5 + $0x750] sm:$0xff] }
  0xe4   :  { %1099 = vmatprep.subr.mxu0 %v300_v19  ;;  %1221 = vmatprep.subr.mxu1 %v110_v20  ;;  %v517_v18 = vld [vmem:[#allocation5 + $0xd50] sm:$0xff]  ;;  %v314_v19 = vld [vmem:[#allocation5 + $0x6f8] sm:$0xff] }
  0xe5   :  { %1100 = vmatpush2.msra.mxu0 %v299_v21  ;;  %1222 = vmatpush1.msra.mxu1 %v109_v22  ;;  %v506_v20 = vld [vmem:[#allocation5 + $0xcf8] sm:$0xff]  ;;  %v505_v21 = vld [vmem:[#allocation5 + $0xcf0] sm:$0xff] }
  0xe6   :  { %1101 = vmatprep.subr.mxu0 %v288_v23  ;;  %1223 = vmatprep.subr.mxu1 %v98_v24  ;;  %v313_v22 = vld [vmem:[#allocation5 + $0x6f0] sm:$0xff]  ;;  %v494_v23 = vld [vmem:[#allocation5 + $0xc98] sm:$0xff] }
  0xe7   :  { %1102 = vmatpush2.msra.mxu0 %v287_v25  ;;  %1103 = vmatprep.mubr.f32.mxu0 %v3649_v4  ;;  %v434_v4 = vld [vmem:[#allocation5 + $0xab8] sm:$0xff]  ;;  %v493_v25 = vld [vmem:[#allocation5 + $0xc90] sm:$0xff] }
  0xe8   :  { %1224 = vmatpush1.msra.mxu1 %v97_v26  ;;  %1104 = vmatmul.mubr.f32.vlgmr.msra.gmra.mxu0 %v3651_v6  ;;  %v625_v6 = vld [vmem:[#allocation5 + $0x10b0] sm:$0xff]  ;;  %v302_v24 = vld [vmem:[#allocation5 + $0x698] sm:$0xff] }
  0xe9   :  { %1225 = vmatprep.subr.mxu1 %v470_v27  ;;  %1270 = vmatprep.subr.mxu0 %v662_v28  ;;  %v482_v26 = vld [vmem:[#allocation5 + $0xc38] sm:$0xff]  ;;  %v481_v28 = vld [vmem:[#allocation5 + $0xc30] sm:$0xff] }
  0xea   :  { %1226 = vmatpush2.msra.mxu1 %v469_v29  ;;  %1271 = vmatpush1.msra.mxu0 %v661_v30  ;;  %v290_v27 = vld [vmem:[#allocation5 + $0x638] sm:$0xff]  ;;  %v280_v30 = vld [vmem:[#allocation5 + $0x5e8] sm:$0xff] }
  0xeb   :  { %1227 = vmatprep.subr.mxu1 %v458_v31  ;;  %1272 = vmatprep.subr.mxu0 %v650_v32  ;;  %v3681_v29 = vld [vmem:[#allocation2 + $0x8] sm:$0xff]  ;;  %v664_v31 = vld [vmem:[#allocation5 + $0x11e8] sm:$0xff]  ;;  %v3684_v32 = vld [vmem:[#allocation2] sm:$0xff] }
  0xec   :  { %1228 = vmatpush2.msra.mxu1 %v457_v33  ;;  %1273 = vmatpush1.msra.mxu0 %v649_v34  ;;  %v279_v33 = vld [vmem:[#allocation5 + $0x5e0] sm:$0xff]  ;;  %v652_v34 = vld [vmem:[#allocation5 + $0x1188] sm:$0xff] }
  0xed   :  { %1229 = vmatprep.subr.mxu1 %v446_v35  ;;  %1274 = vmatprep.subr.mxu0 %v638_v3  ;;  %v268_v35 = vld [vmem:[#allocation5 + $0x588] sm:$0xff]  ;;  %v651_v3 = vld [vmem:[#allocation5 + $0x1180] sm:$0xff] }
  0xee   :  { %1230 = vmatpush2.msra.mxu1 %v445_v36  ;;  %1275 = vmatpush1.msra.mxu0 %v637_v37  ;;  %v3688_v36 = vld [vmem:[#allocation2 + $0x10] sm:$0xff] }
  0xef   :  { %1231 = vmatprep.subr.mxu1 %v434_v4  ;;  %1276 = vmatprep.subr.mxu0 %v626_v38  ;;  %v267_v37 = vld [vmem:[#allocation5 + $0x580] sm:$0xff]  ;;  %v640_v4 = vld [vmem:[#allocation5 + $0x1128] sm:$0xff] }
  0xf0   :  { %1232 = vmatpush2.msra.mxu1 %v433_v39  ;;  %1277 = vmatpush1.msra.mxu0 %v625_v6  ;;  %v256_v38 = vld [vmem:[#allocation5 + $0x528] sm:$0xff]  ;;  %v639_v39 = vld [vmem:[#allocation5 + $0x1120] sm:$0xff] }
  0xf1   :  { %1233 = vmatprep.subr.mxu1 %v422_v40  ;;  %1278 = vmatprep.subr.mxu0 %v614_v41  ;;  %v255_v6 = vld [vmem:[#allocation5 + $0x520] sm:$0xff]  ;;  %v628_v40 = vld [vmem:[#allocation5 + $0x10c8] sm:$0xff] }
  0xf2   :  { %1234 = vmatpush2.msra.mxu1 %v421_v42  ;;  %1279 = vmatpush1.msra.mxu0 %v613_v43  ;;  %v244_v41 = vld [vmem:[#allocation5 + $0x4c8] sm:$0xff]  ;;  %v627_v42 = vld [vmem:[#allocation5 + $0x10c0] sm:$0xff] }
  0xf3   :  { %1235 = vmatprep.subr.mxu1 %v410_v44  ;;  %1280 = vmatprep.subr.mxu0 %v602_v45  ;;  %v243_v43 = vld [vmem:[#allocation5 + $0x4c0] sm:$0xff]  ;;  %v616_v44 = vld [vmem:[#allocation5 + $0x1068] sm:$0xff] }
  0xf4   :  { %1236 = vmatpush2.msra.mxu1 %v409_v46  ;;  %1281 = vmatpush1.msra.mxu0 %v601_v47  ;;  %v232_v45 = vld [vmem:[#allocation5 + $0x468] sm:$0xff]  ;;  %v615_v46 = vld [vmem:[#allocation5 + $0x1060] sm:$0xff] }
  0xf5   :  { %1237 = vmatprep.subr.mxu1 %v398_v48  ;;  %1282 = vmatprep.subr.mxu0 %v590_v49  ;;  %v231_v47 = vld [vmem:[#allocation5 + $0x460] sm:$0xff]  ;;  %v604_v48 = vld [vmem:[#allocation5 + $0x1008] sm:$0xff] }
  0xf6   :  { %1238 = vmatpush2.msra.mxu1 %v397_v50  ;;  %1283 = vmatpush1.msra.mxu0 %v589_v51  ;;  %v220_v49 = vld [vmem:[#allocation5 + $0x408] sm:$0xff]  ;;  %v603_v50 = vld [vmem:[#allocation5 + $0x1000] sm:$0xff] }
  0xf7   :  { %1239 = vmatprep.subr.mxu1 %v386_v52  ;;  %1284 = vmatprep.subr.mxu0 %v578_v53  ;;  %v219_v51 = vld [vmem:[#allocation5 + $0x400] sm:$0xff]  ;;  %v592_v52 = vld [vmem:[#allocation5 + $0xfa8] sm:$0xff] }
  0xf8   :  { %1240 = vmatpush2.msra.mxu1 %v385_v54  ;;  %1285 = vmatpush1.msra.mxu0 %v577_v56  ;;  %v208_v53 = vld [vmem:[#allocation5 + $0x3a8] sm:$0xff]  ;;  %v591_v54 = vld [vmem:[#allocation5 + $0xfa0] sm:$0xff] }
  0xf9   :  { %1241 = vmatprep.subr.mxu1 %v374_v57  ;;  %1286 = vmatprep.subr.mxu0 %v566_v59  ;;  %v207_v56 = vld [vmem:[#allocation5 + $0x3a0] sm:$0xff]  ;;  %v580_v57 = vld [vmem:[#allocation5 + $0xf48] sm:$0xff] }
  0xfa   :  { %1242 = vmatpush2.msra.mxu1 %v373_v60  ;;  %1287 = vmatpush1.msra.mxu0 %v565_v61  ;;  %v196_v59 = vld [vmem:[#allocation5 + $0x348] sm:$0xff]  ;;  %v579_v60 = vld [vmem:[#allocation5 + $0xf40] sm:$0xff] }
  0xfb   :  { %1243 = vmatprep.subr.mxu1 %v362_v62  ;;  %1288 = vmatprep.subr.mxu0 %v554_v1  ;;  %v195_v61 = vld [vmem:[#allocation5 + $0x340] sm:$0xff]  ;;  %v568_v62 = vld [vmem:[#allocation5 + $0xee8] sm:$0xff] }
  0xfc   :  { %1244 = vmatpush2.msra.mxu1 %v361_v2  ;;  %1289 = vmatpush1.msra.mxu0 %v553_v5  ;;  %v184_v1 = vld [vmem:[#allocation5 + $0x2e8] sm:$0xff]  ;;  %v567_v2 = vld [vmem:[#allocation5 + $0xee0] sm:$0xff] }
  0xfd   :  { %1245 = vmatprep.subr.mxu1 %v350_v7  ;;  %1290 = vmatprep.subr.mxu0 %v542_v8  ;;  %v183_v5 = vld [vmem:[#allocation5 + $0x2e0] sm:$0xff]  ;;  %v556_v7 = vld [vmem:[#allocation5 + $0xe88] sm:$0xff] }
  0xfe   :  { %1246 = vmatpush2.msra.mxu1 %v349_v9  ;;  %1291 = vmatpush1.msra.mxu0 %v541_v10  ;;  %v172_v8 = vld [vmem:[#allocation5 + $0x288] sm:$0xff]  ;;  %v555_v9 = vld [vmem:[#allocation5 + $0xe80] sm:$0xff] }
  0xff   :  { %1247 = vmatprep.subr.mxu1 %v338_v11  ;;  %1292 = vmatprep.subr.mxu0 %v530_v12  ;;  %v171_v10 = vld [vmem:[#allocation5 + $0x280] sm:$0xff]  ;;  %v544_v11 = vld [vmem:[#allocation5 + $0xe28] sm:$0xff] }
 0x100   :  { %1248 = vmatpush2.msra.mxu1 %v337_v13  ;;  %1293 = vmatpush1.msra.mxu0 %v529_v14  ;;  %v160_v12 = vld [vmem:[#allocation5 + $0x228] sm:$0xff]  ;;  %v543_v13 = vld [vmem:[#allocation5 + $0xe20] sm:$0xff] }
 0x101   :  { %1109 = vmatprep.mubr.f32.mxu0 %v3655_v55  ;;  %1249 = vmatprep.subr.mxu1 %v326_v15  ;;  %v301_v55 = vld [vmem:[#allocation5 + $0x690] sm:$0xff]  ;;  %v159_v14 = vld [vmem:[#allocation5 + $0x220] sm:$0xff]  ;;  %v532_v15 = vld [vmem:[#allocation5 + $0xdc8] sm:$0xff] }
 0x102   :  { %1294 = vmatprep.subr.mxu0 %v518_v16  ;;  %1110 = vmatmul.mubr.f32.gmra.mxu0 %v3657_v58  ;;  %v289_v58 = vld [vmem:[#allocation5 + $0x630] sm:$0xff]  ;;  %v148_v16 = vld [vmem:[#allocation5 + $0x1c8] sm:$0xff] }
 0x103   :  { %1250 = vmatpush2.msra.mxu1 %v325_v17  ;;  %1295 = vmatpush1.msra.mxu0 %v517_v18  ;;  %v531_v17 = vld [vmem:[#allocation5 + $0xdc0] sm:$0xff] }
 0x104   :  { %1186 = vmatprep.mubr.f32.mxu1 %v3592_v0  ;;  %1251 = vmatprep.subr.mxu1 %v314_v19  ;;  %v147_v18 = vld [vmem:[#allocation5 + $0x1c0] sm:$0xff]  ;;  %v520_v19 = vld [vmem:[#allocation5 + $0xd68] sm:$0xff] }
 0x105   :  { %1296 = vmatprep.subr.mxu0 %v506_v20  ;;  %1187 = vmatmul.mubr.f32.gmra.mxu1 %v3661_v63  ;;  %v663_v63 = vld [vmem:[#allocation5 + $0x11e0] sm:$0xff]  ;;  %v136_v20 = vld [vmem:[#allocation5 + $0x168] sm:$0xff] }
 0x106   :  { %1297 = vmatpush1.msra.mxu0 %v505_v21  ;;  %1252 = vmatpush2.msra.mxu1 %v313_v22  ;;  %v135_v21 = vld [vmem:[#allocation5 + $0x160] sm:$0xff] }
 0x107   :  { %1298 = vmatprep.subr.mxu0 %v494_v23  ;;  %1253 = vmatprep.subr.mxu1 %v302_v24  ;;  %v519_v22 = vld [vmem:[#allocation5 + $0xd60] sm:$0xff]  ;;  %v124_v23 = vld [vmem:[#allocation5 + $0x108] sm:$0xff]  ;;  %v3691_v24 = vld [vmem:[#allocation2 + $0x20] sm:$0xff] }
 0x108   :  { %1299 = vmatpush1.msra.mxu0 %v493_v25  ;;  %1254 = vmatpush2.msra.mxu1 %v301_v55  ;;  %v508_v25 = vld [vmem:[#allocation5 + $0xd08] sm:$0xff]  ;;  %v123_v55 = vld [vmem:[#allocation5 + $0x100] sm:$0xff] }
 0x109   :  { %1300 = vmatprep.subr.mxu0 %v482_v26  ;;  %1255 = vmatprep.subr.mxu1 %v290_v27  ;;  %v507_v26 = vld [vmem:[#allocation5 + $0xd00] sm:$0xff]  ;;  %v3694_v27 = vld [vmem:[#allocation2 + $0x18] sm:$0xff] }
 0x10a   :  { %1257 = vmatprep.mubr.f32.mxu1 %v3681_v29  ;;  %1256 = vmatpush2.msra.mxu1 %v289_v58  ;;  %v112_v58 = vld [vmem:[#allocation5 + $0xa8] sm:$0xff] }
 0x10b   :  { %1301 = vmatpush1.msra.mxu0 %v481_v28  ;;  %1258 = vmatmul.mubr.f32.vlgmr.msra.gmra.mxu1 %v3684_v32  ;;  %v496_v28 = vld [vmem:[#allocation5 + $0xca8] sm:$0xff] }
 0x10c   :  { %1334 = vmatprep.mubr.f32.mxu0 %v3592_v0  ;;  %1347 = vmatprep.subr.mxu0 %v280_v30  ;;  %v111_v30 = vld [vmem:[#allocation5 + $0xa0] sm:$0xff] }
 0x10d   :  { %1424 = vmatprep.subr.mxu1 %v664_v31  ;;  %1335 = vmatmul.mubr.f32.vlgmr.msra.gmra.mxu0 %v3688_v36  ;;  %v495_v31 = vld [vmem:[#allocation5 + $0xca0] sm:$0xff] }
 0x10e   :  { %1425 = vmatpush1.msra.mxu1 %v663_v63  ;;  %1348 = vmatpush1.msra.mxu0 %v279_v33  ;;  %v100_v63 = vld [vmem:[#allocation5 + $0x48] sm:$0xff]  ;;  %v3698_v33 = vld [vmem:[#allocation2 + $0x28] sm:$0xff] }
 0x10f   :  { %1426 = vmatprep.subr.mxu1 %v652_v34  ;;  %1349 = vmatprep.subr.mxu0 %v268_v35  ;;  %v484_v34 = vld [vmem:[#allocation5 + $0xc48] sm:$0xff]  ;;  %v99_v35 = vld [vmem:[#allocation5 + $0x40] sm:$0xff] }
 0x110   :  { %1427 = vmatpush1.msra.mxu1 %v651_v3  ;;  %1350 = vmatpush1.msra.mxu0 %v267_v37  ;;  %v483_v3 = vld [vmem:[#allocation5 + $0xc40] sm:$0xff]  ;;  %v472_v37 = vld [vmem:[#allocation5 + $0xbe8] sm:$0xff] }
 0x111   :  { %1428 = vmatprep.subr.mxu1 %v640_v4  ;;  %1351 = vmatprep.subr.mxu0 %v256_v38  ;;  %v282_v4 = vld [vmem:[#allocation5 + $0x5f8] sm:$0xff]  ;;  %v471_v38 = vld [vmem:[#allocation5 + $0xbe0] sm:$0xff] }
 0x112   :  { %1429 = vmatpush1.msra.mxu1 %v639_v39  ;;  %1352 = vmatpush1.msra.mxu0 %v255_v6  ;;  %v281_v39 = vld [vmem:[#allocation5 + $0x5f0] sm:$0xff]  ;;  %v460_v6 = vld [vmem:[#allocation5 + $0xb88] sm:$0xff] }
 0x113   :  { %1430 = vmatprep.subr.mxu1 %v628_v40  ;;  %1353 = vmatprep.subr.mxu0 %v244_v41  ;;  %v270_v40 = vld [vmem:[#allocation5 + $0x598] sm:$0xff]  ;;  %v459_v41 = vld [vmem:[#allocation5 + $0xb80] sm:$0xff] }
 0x114   :  { %1431 = vmatpush1.msra.mxu1 %v627_v42  ;;  %1354 = vmatpush1.msra.mxu0 %v243_v43  ;;  %v269_v42 = vld [vmem:[#allocation5 + $0x590] sm:$0xff]  ;;  %v448_v43 = vld [vmem:[#allocation5 + $0xb28] sm:$0xff] }
 0x115   :  { %1432 = vmatprep.subr.mxu1 %v616_v44  ;;  %1355 = vmatprep.subr.mxu0 %v232_v45  ;;  %v258_v44 = vld [vmem:[#allocation5 + $0x538] sm:$0xff]  ;;  %v447_v45 = vld [vmem:[#allocation5 + $0xb20] sm:$0xff] }
 0x116   :  { %1433 = vmatpush1.msra.mxu1 %v615_v46  ;;  %1356 = vmatpush1.msra.mxu0 %v231_v47  ;;  %v257_v46 = vld [vmem:[#allocation5 + $0x530] sm:$0xff]  ;;  %v436_v47 = vld [vmem:[#allocation5 + $0xac8] sm:$0xff] }
 0x117   :  { %1434 = vmatprep.subr.mxu1 %v604_v48  ;;  %1357 = vmatprep.subr.mxu0 %v220_v49  ;;  %v246_v48 = vld [vmem:[#allocation5 + $0x4d8] sm:$0xff]  ;;  %v435_v49 = vld [vmem:[#allocation5 + $0xac0] sm:$0xff] }
 0x118   :  { %1435 = vmatpush1.msra.mxu1 %v603_v50  ;;  %1358 = vmatpush1.msra.mxu0 %v219_v51  ;;  %v245_v50 = vld [vmem:[#allocation5 + $0x4d0] sm:$0xff]  ;;  %v424_v51 = vld [vmem:[#allocation5 + $0xa68] sm:$0xff] }
 0x119   :  { %1436 = vmatprep.subr.mxu1 %v592_v52  ;;  %1359 = vmatprep.subr.mxu0 %v208_v53  ;;  %v234_v52 = vld [vmem:[#allocation5 + $0x478] sm:$0xff]  ;;  %v423_v53 = vld [vmem:[#allocation5 + $0xa60] sm:$0xff] }
 0x11a   :  { %1437 = vmatpush1.msra.mxu1 %v591_v54  ;;  %1360 = vmatpush1.msra.mxu0 %v207_v56  ;;  %v233_v54 = vld [vmem:[#allocation5 + $0x470] sm:$0xff]  ;;  %v412_v56 = vld [vmem:[#allocation5 + $0xa08] sm:$0xff] }
 0x11b   :  { %1438 = vmatprep.subr.mxu1 %v580_v57  ;;  %1361 = vmatprep.subr.mxu0 %v196_v59  ;;  %v222_v57 = vld [vmem:[#allocation5 + $0x418] sm:$0xff]  ;;  %v411_v59 = vld [vmem:[#allocation5 + $0xa00] sm:$0xff] }
 0x11c   :  { %1439 = vmatpush1.msra.mxu1 %v579_v60  ;;  %1362 = vmatpush1.msra.mxu0 %v195_v61  ;;  %v221_v60 = vld [vmem:[#allocation5 + $0x410] sm:$0xff]  ;;  %v400_v61 = vld [vmem:[#allocation5 + $0x9a8] sm:$0xff] }
 0x11d   :  { %1440 = vmatprep.subr.mxu1 %v568_v62  ;;  %1363 = vmatprep.subr.mxu0 %v184_v1  ;;  %v210_v62 = vld [vmem:[#allocation5 + $0x3b8] sm:$0xff]  ;;  %v399_v1 = vld [vmem:[#allocation5 + $0x9a0] sm:$0xff] }
 0x11e   :  { %1441 = vmatpush1.msra.mxu1 %v567_v2  ;;  %1364 = vmatpush1.msra.mxu0 %v183_v5  ;;  %v209_v2 = vld [vmem:[#allocation5 + $0x3b0] sm:$0xff]  ;;  %v388_v5 = vld [vmem:[#allocation5 + $0x948] sm:$0xff] }
 0x11f   :  { %1442 = vmatprep.subr.mxu1 %v556_v7  ;;  %1365 = vmatprep.subr.mxu0 %v172_v8  ;;  %v198_v7 = vld [vmem:[#allocation5 + $0x358] sm:$0xff]  ;;  %v387_v8 = vld [vmem:[#allocation5 + $0x940] sm:$0xff] }
 0x120   :  { %1443 = vmatpush1.msra.mxu1 %v555_v9  ;;  %1366 = vmatpush1.msra.mxu0 %v171_v10  ;;  %v197_v9 = vld [vmem:[#allocation5 + $0x350] sm:$0xff]  ;;  %v376_v10 = vld [vmem:[#allocation5 + $0x8e8] sm:$0xff] }
 0x121   :  { %1444 = vmatprep.subr.mxu1 %v544_v11  ;;  %1367 = vmatprep.subr.mxu0 %v160_v12  ;;  %v186_v11 = vld [vmem:[#allocation5 + $0x2f8] sm:$0xff]  ;;  %v375_v12 = vld [vmem:[#allocation5 + $0x8e0] sm:$0xff] }
 0x122   :  { %1445 = vmatpush1.msra.mxu1 %v543_v13  ;;  %1368 = vmatpush1.msra.mxu0 %v159_v14  ;;  %v185_v13 = vld [vmem:[#allocation5 + $0x2f0] sm:$0xff]  ;;  %v364_v14 = vld [vmem:[#allocation5 + $0x888] sm:$0xff] }
 0x123   :  { %1446 = vmatprep.subr.mxu1 %v532_v15  ;;  %1369 = vmatprep.subr.mxu0 %v148_v16  ;;  %v174_v15 = vld [vmem:[#allocation5 + $0x298] sm:$0xff]  ;;  %v363_v16 = vld [vmem:[#allocation5 + $0x880] sm:$0xff] }
 0x124   :  { %1447 = vmatpush1.msra.mxu1 %v531_v17  ;;  %1370 = vmatpush1.msra.mxu0 %v147_v18  ;;  %v173_v17 = vld [vmem:[#allocation5 + $0x290] sm:$0xff]  ;;  %v352_v18 = vld [vmem:[#allocation5 + $0x828] sm:$0xff] }
 0x125   :  { %1448 = vmatprep.subr.mxu1 %v520_v19  ;;  %1371 = vmatprep.subr.mxu0 %v136_v20  ;;  %v162_v19 = vld [vmem:[#allocation5 + $0x238] sm:$0xff]  ;;  %v351_v20 = vld [vmem:[#allocation5 + $0x820] sm:$0xff] }
 0x126   :  { %1263 = vmatprep.mubr.f32.mxu1 %v3691_v24  ;;  %1372 = vmatpush1.msra.mxu0 %v135_v21  ;;  %v161_v21 = vld [vmem:[#allocation5 + $0x230] sm:$0xff] }
 0x127   :  { %1449 = vmatpush1.msra.mxu1 %v519_v22  ;;  %1373 = vmatprep.subr.mxu0 %v124_v23  ;;  %v340_v22 = vld [vmem:[#allocation5 + $0x7c8] sm:$0xff]  ;;  %v150_v23 = vld [vmem:[#allocation5 + $0x1d8] sm:$0xff] }
 0x128   :  { %1264 = vmatmul.mubr.f32.gmra.mxu1 %v3694_v27  ;;  %1450 = vmatprep.subr.mxu1 %v508_v25  ;;  %v339_v25 = vld [vmem:[#allocation5 + $0x7c0] sm:$0xff] }
 0x129   :  { %1340 = vmatprep.mubr.f32.mxu0 %v3592_v0  ;;  %1374 = vmatpush1.msra.mxu0 %v123_v55  ;;  %v149_v55 = vld [vmem:[#allocation5 + $0x1d0] sm:$0xff] }
 0x12a   :  { %1451 = vmatpush1.msra.mxu1 %v507_v26  ;;  %1341 = vmatmul.mubr.f32.gmra.mxu0 %v3698_v33  ;;  %v328_v26 = vld [vmem:[#allocation5 + $0x768] sm:$0xff] }
 0x12b   :  { %1375 = vmatprep.subr.mxu0 %v112_v58  ;;  %1452 = vmatprep.subr.mxu1 %v496_v28  ;;  %v138_v58 = vld [vmem:[#allocation5 + $0x178] sm:$0xff]  ;;  %v327_v28 = vld [vmem:[#allocation5 + $0x760] sm:$0xff] }
 0x12c   :  { %1376 = vmatpush1.msra.mxu0 %v111_v30  ;;  %1453 = vmatpush1.msra.mxu1 %v495_v31  ;;  %v137_v30 = vld [vmem:[#allocation5 + $0x170] sm:$0xff]  ;;  %v316_v31 = vld [vmem:[#allocation5 + $0x708] sm:$0xff] }
 0x12d   :  { %1377 = vmatprep.subr.mxu0 %v100_v63  ;;  %1454 = vmatprep.subr.mxu1 %v484_v34  ;;  %v126_v63 = vld [vmem:[#allocation5 + $0x118] sm:$0xff]  ;;  %v315_v34 = vld [vmem:[#allocation5 + $0x700] sm:$0xff] }
 0x12e   :  { %1378 = vmatpush1.msra.mxu0 %v99_v35  ;;  %1455 = vmatpush1.msra.mxu1 %v483_v3  ;;  %v125_v35 = vld [vmem:[#allocation5 + $0x110] sm:$0xff]  ;;  %v304_v3 = vld [vmem:[#allocation5 + $0x6a8] sm:$0xff] }
 0x12f   :  { %1488 = vmatprep.mubr.f32.mxu1 %v3592_v0  ;;  %1379 = vmatprep.subr.mxu0 %v472_v37  ;;  %v114_v37 = vld [vmem:[#allocation5 + $0xb8] sm:$0xff] }
 0x130   :  { %1489 = vmatmul.mubr.f32.vlgmr.msra.gmra.mxu1 %v3688_v36  ;;  %1501 = vmatprep.subr.mxu1 %v282_v4  ;;  %v303_v4 = vld [vmem:[#allocation5 + $0x6a0] sm:$0xff] }
 0x131   :  { %1380 = vmatpush2.msra.mxu0 %v471_v38  ;;  %1502 = vmatpush1.msra.mxu1 %v281_v39  ;;  %v113_v38 = vld [vmem:[#allocation5 + $0xb0] sm:$0xff]  ;;  %v292_v39 = vld [vmem:[#allocation5 + $0x648] sm:$0xff] }
 0x132   :  { %1381 = vmatprep.subr.mxu0 %v460_v6  ;;  %1503 = vmatprep.subr.mxu1 %v270_v40  ;;  %v102_v6 = vld [vmem:[#allocation5 + $0x58] sm:$0xff]  ;;  %v291_v40 = vld [vmem:[#allocation5 + $0x640] sm:$0xff] }
 0x133   :  { %1382 = vmatpush2.msra.mxu0 %v459_v41  ;;  %1504 = vmatpush1.msra.mxu1 %v269_v42  ;;  %v101_v41 = vld [vmem:[#allocation5 + $0x50] sm:$0xff]  ;;  %v671_v42 = vlaneseq }
 0x134   :  { %1383 = vmatprep.subr.mxu0 %v448_v43  ;;  %1505 = vmatprep.subr.mxu1 %v258_v44  ;;  %v474_v43 = vld [vmem:[#allocation5 + $0xbf8] sm:$0xff] }
 0x135   :  { %1384 = vmatpush2.msra.mxu0 %v447_v45  ;;  %1506 = vmatpush1.msra.mxu1 %v257_v46  ;;  %v666_v44 = vld [vmem:[#allocation5 + $0x11f8] sm:$0xff]  ;;  %v473_v45 = vld [vmem:[#allocation5 + $0xbf0] sm:$0xff] }
 0x136   :  { %1385 = vmatprep.subr.mxu0 %v436_v47  ;;  %1507 = vmatprep.subr.mxu1 %v246_v48  ;;  %v665_v46 = vld [vmem:[#allocation5 + $0x11f0] sm:$0xff]  ;;  %v462_v47 = vld [vmem:[#allocation5 + $0xb98] sm:$0xff] }
 0x137   :  { %1386 = vmatpush2.msra.mxu0 %v435_v49  ;;  %1508 = vmatpush1.msra.mxu1 %v245_v50  ;;  %v654_v48 = vld [vmem:[#allocation5 + $0x1198] sm:$0xff]  ;;  %v461_v49 = vld [vmem:[#allocation5 + $0xb90] sm:$0xff]  ;;  %v3705_v50 = vshrl.u32 %v671_v42, 7 }
 0x138   :  { %1387 = vmatprep.subr.mxu0 %v424_v51  ;;  %1509 = vmatprep.subr.mxu1 %v234_v52  ;;  %v653_v51 = vld [vmem:[#allocation5 + $0x1190] sm:$0xff]  ;;  %v450_v52 = vld [vmem:[#allocation5 + $0xb38] sm:$0xff] }
 0x139   :  { %1388 = vmatpush2.msra.mxu0 %v423_v53  ;;  %1510 = vmatpush1.msra.mxu1 %v233_v54  ;;  %v642_v53 = vld [vmem:[#allocation5 + $0x1138] sm:$0xff]  ;;  %v449_v54 = vld [vmem:[#allocation5 + $0xb30] sm:$0xff] }
 0x13a   :  { %1389 = vmatprep.subr.mxu0 %v412_v56  ;;  %1511 = vmatprep.subr.mxu1 %v222_v57  ;;  %v641_v56 = vld [vmem:[#allocation5 + $0x1130] sm:$0xff]  ;;  %v438_v57 = vld [vmem:[#allocation5 + $0xad8] sm:$0xff] }
 0x13b   :  { %1390 = vmatpush2.msra.mxu0 %v411_v59  ;;  %1512 = vmatpush1.msra.mxu1 %v221_v60  ;;  %v630_v60 = vld [vmem:[#allocation5 + $0x10d8] sm:$0xff] }
 0x13c   :  { %1391 = vmatprep.subr.mxu0 %v400_v61  ;;  %1513 = vmatprep.subr.mxu1 %v210_v62  ;;  %v437_v61 = vld [vmem:[#allocation5 + $0xad0] sm:$0xff]  ;;  %v3710_v62 = vsub.s32 0, %v3705_v50  ;;  %v342_v42 = vld [vmem:[#allocation5 + $0x7d8] sm:$0xff] }
 0x13d   :  { %1392 = vmatpush2.msra.mxu0 %v399_v1  ;;  %1514 = vmatpush1.msra.mxu1 %v209_v2  ;;  %v629_v1 = vld [vmem:[#allocation5 + $0x10d0] sm:$0xff]  ;;  %v426_v2 = vld [vmem:[#allocation5 + $0xa78] sm:$0xff] }
 0x13e   :  { %1393 = vmatprep.subr.mxu0 %v388_v5  ;;  %1515 = vmatprep.subr.mxu1 %v198_v7  ;;  %v3712_v5 = vld [vmem:[#allocation7] sm:$0xff]  ;;  %v618_v7 = vld [vmem:[#allocation5 + $0x1078] sm:$0xff] }
 0x13f   :  { %1394 = vmatpush2.msra.mxu0 %v387_v8  ;;  %1516 = vmatpush1.msra.mxu1 %v197_v9  ;;  %v425_v8 = vld [vmem:[#allocation5 + $0xa70] sm:$0xff]  ;;  %v3714_v9 = vpop.f32.mrf.mxu1 }
 0x140   :  { %1395 = vmatprep.subr.mxu0 %v376_v10  ;;  %1517 = vmatprep.subr.mxu1 %v186_v11  ;;  %v3707_v59 = vpop.f32.mrf.mxu0  ;;  %v617_v10 = vld [vmem:[#allocation5 + $0x1070] sm:$0xff]  ;;  %v414_v11 = vld [vmem:[#allocation5 + $0xa18] sm:$0xff] }
 0x141   :  { %1396 = vmatpush2.msra.mxu0 %v375_v12  ;;  %1518 = vmatpush1.msra.mxu1 %v185_v13  ;;  %v606_v13 = vld [vmem:[#allocation5 + $0x1018] sm:$0xff] }
 0x142   :  { %1397 = vmatprep.subr.mxu0 %v364_v14  ;;  %1519 = vmatprep.subr.mxu1 %v174_v15  ;;  %v3716_v12 = vpop.f32.mrf.mxu0  ;;  %v413_v14 = vld [vmem:[#allocation5 + $0xa10] sm:$0xff]  ;;  %v3720_v15 = vrot.slane %v3712_v5, %v3710_v62 }
 0x143   :  { %1398 = vmatpush2.msra.mxu0 %v363_v16  ;;  %1520 = vmatpush1.msra.mxu1 %v173_v17  ;;  %v605_v16 = vld [vmem:[#allocation5 + $0x1010] sm:$0xff]  ;;  %v402_v17 = vld [vmem:[#allocation5 + $0x9b8] sm:$0xff] }
 0x144   :  { %1399 = vmatprep.subr.mxu0 %v352_v18  ;;  %1521 = vmatprep.subr.mxu1 %v162_v19  ;;  %v594_v18 = vld [vmem:[#allocation5 + $0xfb8] sm:$0xff]  ;;  %v401_v19 = vld [vmem:[#allocation5 + $0x9b0] sm:$0xff] }
 0x145   :  { %1400 = vmatpush2.msra.mxu0 %v351_v20  ;;  %1522 = vmatpush1.msra.mxu1 %v161_v21  ;;  %v3722_v21 = vpop.f32.mrf.mxu1 }
 0x146   :  { %1401 = vmatprep.subr.mxu0 %v340_v22  ;;  %1523 = vmatprep.subr.mxu1 %v150_v23  ;;  %v593_v22 = vld [vmem:[#allocation5 + $0xfb0] sm:$0xff]  ;;  %v390_v23 = vld [vmem:[#allocation5 + $0x958] sm:$0xff] }
 0x147   :  { %1402 = vmatpush2.msra.mxu0 %v339_v25  ;;  %1524 = vmatpush1.msra.mxu1 %v149_v55  ;;  %v582_v55 = vld [vmem:[#allocation5 + $0xf58] sm:$0xff] }
 0x148   :  { %1403 = vmatprep.subr.mxu0 %v328_v26  ;;  %1525 = vmatprep.subr.mxu1 %v138_v58  ;;  %v389_v26 = vld [vmem:[#allocation5 + $0x950] sm:$0xff] }
 0x149   :  { %1404 = vmatpush2.msra.mxu0 %v327_v28  ;;  %1526 = vmatpush1.msra.mxu1 %v137_v30  ;;  %v581_v58 = vld [vmem:[#allocation5 + $0xf50] sm:$0xff]  ;;  %v378_v28 = vld [vmem:[#allocation5 + $0x8f8] sm:$0xff] }
 0x14a   :  { %1405 = vmatprep.subr.mxu0 %v316_v31  ;;  %1527 = vmatprep.subr.mxu1 %v126_v63  ;;  %v570_v31 = vld [vmem:[#allocation5 + $0xef8] sm:$0xff]  ;;  %v377_v63 = vld [vmem:[#allocation5 + $0x8f0] sm:$0xff] }
 0x14b   :  { %1406 = vmatpush2.msra.mxu0 %v315_v34  ;;  %1528 = vmatpush1.msra.mxu1 %v125_v35  ;;  %v569_v35 = vld [vmem:[#allocation5 + $0xef0] sm:$0xff] }
 0x14c   :  { %1407 = vmatprep.subr.mxu0 %v304_v3  ;;  %1529 = vmatprep.subr.mxu1 %v114_v37  ;;  %v366_v3 = vld [vmem:[#allocation5 + $0x898] sm:$0xff] }
 0x14d   :  { %1408 = vmatpush2.msra.mxu0 %v303_v4  ;;  %1530 = vmatpush1.msra.mxu1 %v113_v38  ;;  %v558_v37 = vld [vmem:[#allocation5 + $0xe98] sm:$0xff]  ;;  %v365_v4 = vld [vmem:[#allocation5 + $0x890] sm:$0xff] }
 0x14e   :  { %1409 = vmatprep.subr.mxu0 %v292_v39  ;;  %1531 = vmatprep.subr.mxu1 %v102_v6  ;;  %v557_v38 = vld [vmem:[#allocation5 + $0xe90] sm:$0xff]  ;;  %v354_v39 = vld [vmem:[#allocation5 + $0x838] sm:$0xff] }
 0x14f   :  { %1410 = vmatpush2.msra.mxu0 %v291_v40  ;;  %1411 = vmatprep.mubr.f32.mxu0 %v3681_v29  ;;  %v546_v6 = vld [vmem:[#allocation5 + $0xe38] sm:$0xff]  ;;  %v353_v40 = vld [vmem:[#allocation5 + $0x830] sm:$0xff] }
 0x150   :  { %1532 = vmatpush1.msra.mxu1 %v101_v41  ;;  %1412 = vmatmul.mubr.f32.vlgmr.msra.gmra.mxu0 %v3684_v32  ;;  %v545_v41 = vld [vmem:[#allocation5 + $0xe30] sm:$0xff] }
 0x151   :  { %1533 = vmatprep.subr.mxu1 %v474_v43  ;;  %1578 = vmatprep.subr.mxu0 %v666_v44  ;;  %v534_v43 = vld [vmem:[#allocation5 + $0xdd8] sm:$0xff]  ;;  %v341_v44 = vld [vmem:[#allocation5 + $0x7d0] sm:$0xff] }
 0x152   :  { %1534 = vmatpush2.msra.mxu1 %v473_v45  ;;  %1579 = vmatpush1.msra.mxu0 %v665_v46  ;;  %v533_v45 = vld [vmem:[#allocation5 + $0xdd0] sm:$0xff]  ;;  %v330_v46 = vld [vmem:[#allocation5 + $0x778] sm:$0xff] }
 0x153   :  { %1535 = vmatprep.subr.mxu1 %v462_v47  ;;  %1580 = vmatprep.subr.mxu0 %v654_v48  ;;  %v522_v47 = vld [vmem:[#allocation5 + $0xd78] sm:$0xff]  ;;  %v329_v48 = vld [vmem:[#allocation5 + $0x770] sm:$0xff] }
 0x154   :  { %1536 = vmatpush2.msra.mxu1 %v461_v49  ;;  %1581 = vmatpush1.msra.mxu0 %v653_v51  ;;  %v521_v49 = vld [vmem:[#allocation5 + $0xd70] sm:$0xff]  ;;  %v318_v51 = vld [vmem:[#allocation5 + $0x718] sm:$0xff] }
 0x155   :  { %1537 = vmatprep.subr.mxu1 %v450_v52  ;;  %1582 = vmatprep.subr.mxu0 %v642_v53  ;;  %v3730_v52 = vsub.s32 1, %v3705_v50  ;;  %v510_v53 = vld [vmem:[#allocation5 + $0xd18] sm:$0xff] }
 0x156   :  { %1538 = vmatpush2.msra.mxu1 %v449_v54  ;;  %1583 = vmatpush1.msra.mxu0 %v641_v56  ;;  %v317_v54 = vld [vmem:[#allocation5 + $0x710] sm:$0xff] }
 0x157   :  { %1539 = vmatprep.subr.mxu1 %v438_v57  ;;  %1584 = vmatprep.subr.mxu0 %v630_v60  ;;  %v509_v57 = vld [vmem:[#allocation5 + $0xd10] sm:$0xff]  ;;  %v306_v60 = vld [vmem:[#allocation5 + $0x6b8] sm:$0xff] }
 0x158   :  { %1540 = vmatpush2.msra.mxu1 %v437_v61  ;;  %1585 = vmatpush1.msra.mxu0 %v629_v1  ;;  %v498_v61 = vld [vmem:[#allocation5 + $0xcb8] sm:$0xff]  ;;  %v305_v1 = vld [vmem:[#allocation5 + $0x6b0] sm:$0xff] }
 0x159   :  { %1541 = vmatprep.subr.mxu1 %v426_v2  ;;  %1586 = vmatprep.subr.mxu0 %v618_v7  ;;  %v497_v2 = vld [vmem:[#allocation5 + $0xcb0] sm:$0xff]  ;;  %v294_v7 = vld [vmem:[#allocation5 + $0x658] sm:$0xff] }
 0x15a   :  { %1542 = vmatpush2.msra.mxu1 %v425_v8  ;;  %1587 = vmatpush1.msra.mxu0 %v617_v10  ;;  %v803_v20 = vpop.f32.mrf.mxu0  ;;  %v685_v8 = vsub.s32 3, %v3705_v50  ;;  %v3739_v10 = vrot.slane %v3712_v5, %v3730_v52 }
 0x15b   :  { %1543 = vmatprep.subr.mxu1 %v414_v11  ;;  %1588 = vmatprep.subr.mxu0 %v606_v13  ;;  %v804_v25 = vadd.f32 %v803_v20, %v3720_v15  ;;  %v486_v11 = vld [vmem:[#allocation5 + $0xc58] sm:$0xff]  ;;  %v293_v13 = vld [vmem:[#allocation5 + $0x650] sm:$0xff] }
 0x15c   :  { %1544 = vmatpush2.msra.mxu1 %v413_v14  ;;  %1589 = vmatpush1.msra.mxu0 %v605_v16  ;;  %v485_v16 = vld [vmem:[#allocation5 + $0xc50] sm:$0xff]  ;;  %v800_v20 = vadd.f32 %v3716_v12, %v3739_v10  ;;  %v1721_v12 = vld [vmem:[#allocation8 + $0x150] sm:$0xff] }
 0x15d   :  { %1545 = vmatprep.subr.mxu1 %v402_v17  ;;  %1590 = vmatprep.subr.mxu0 %v594_v18  ;;  %v880_v30 = vpop.f32.mrf.mxu1  ;;  %v3743_v17 = vpop.f32.mrf.mxu0  ;;  %v1725_v18 = vld [vmem:[#allocation8 + $0x170] sm:$0xff] }
 0x15e   :  { %1546 = vmatpush2.msra.mxu1 %v401_v19  ;;  %1591 = vmatpush1.msra.mxu0 %v593_v22  ;;  %v3725_v34 = vadd.f32 %v880_v30, %v804_v25  ;;  %v3748_v19 = vrot.slane %v3712_v5, %v685_v8  ;;  %v1821_v22 = vld [vmem:[#allocation8 + $0x470] sm:$0xff]  ;;  %v1724_v25 = vld [vmem:[#allocation8 + $0x168] sm:$0xff]  ;;  %v3760_v30 = vadd.f32 %v3722_v21, %v800_v20  ;;  %v1814_v21 = vld [vmem:[#allocation8 + $0x438] sm:$0xff] }
 0x15f   :  { %1547 = vmatprep.subr.mxu1 %v390_v23  ;;  %1592 = vmatprep.subr.mxu0 %v582_v55  ;;  %v3733_v56 = vpop.f32.mrf.mxu1  ;;  %v1694_v20 = vld [vmem:[#allocation8 + $0x78] sm:$0xff] }
 0x160   :  { %1548 = vmatpush2.msra.mxu1 %v389_v26  ;;  %1593 = vmatpush1.msra.mxu0 %v581_v58  ;;  %v1820_v26 = vld [vmem:[#allocation8 + $0x468] sm:$0xff]  ;;  %v1722_v58 = vld [vmem:[#allocation8 + $0x158] sm:$0xff] }
 0x161   :  { %1549 = vmatprep.subr.mxu1 %v378_v28  ;;  %1594 = vmatprep.subr.mxu0 %v570_v31  ;;  %v1818_v28 = vld [vmem:[#allocation8 + $0x458] sm:$0xff] }
 0x162   :  { %1550 = vmatpush2.msra.mxu1 %v377_v63  ;;  %1595 = vmatpush1.msra.mxu0 %v569_v35  ;;  %v1817_v63 = vld [vmem:[#allocation8 + $0x450] sm:$0xff]  ;;  %v1718_v35 = vld [vmem:[#allocation8 + $0x138] sm:$0xff] }
 0x163   :  { %1551 = vmatprep.subr.mxu1 %v366_v3  ;;  %1596 = vmatprep.subr.mxu0 %v558_v37  ;;  %v3741_v14 = vpop.f32.mrf.mxu1  ;;  %v1656_v37 = vmax.f32 %v3760_v30, 0.0  ;;  %v1822_v30 = vld [vmem:[#allocation8 + $0x478] sm:$0xff] }
 0x164   :  { %1552 = vmatpush2.msra.mxu1 %v365_v4  ;;  %1597 = vmatpush1.msra.mxu0 %v557_v38  ;;  %v1716_v4 = vld [vmem:[#allocation8 + $0x128] sm:$0xff] }
 0x165   :  { %1553 = vmatprep.subr.mxu1 %v354_v39  ;;  %1598 = vmatprep.subr.mxu0 %v546_v6  ;;  %v3753_v23 = vpop.f32.mrf.mxu0  ;;  %v953_v55 = vpop.f32.mrf.mxu1  ;;  %v1812_v38 = vld [vmem:[#allocation8 + $0x428] sm:$0xff]  ;;  %v1713_v39 = vld [vmem:[#allocation8 + $0x110] sm:$0xff] }
 0x166   :  { %1554 = vmatpush2.msra.mxu1 %v353_v40  ;;  %1599 = vmatpush1.msra.mxu0 %v545_v41  ;;  %v1809_v6 = vld [vmem:[#allocation8 + $0x410] sm:$0xff]  ;;  %v1712_v40 = vld [vmem:[#allocation8 + $0x108] sm:$0xff] }
 0x167   :  { %1555 = vmatprep.subr.mxu1 %v342_v42  ;;  %1600 = vmatprep.subr.mxu0 %v534_v43  ;;  %v1030_v31 = vpop.f32.mrf.mxu0  ;;  %v1808_v41 = vld [vmem:[#allocation8 + $0x408] sm:$0xff]  ;;  %v1806_v42 = vld [vmem:[#allocation8 + $0x3f8] sm:$0xff]  ;;  %v1709_v43 = vld [vmem:[#allocation8 + $0xf0] sm:$0xff] }
 0x168   :  { %1417 = vmatprep.mubr.f32.mxu0 %v3691_v24  ;;  %1556 = vmatpush2.msra.mxu1 %v341_v44  ;;  %v1805_v44 = vld [vmem:[#allocation8 + $0x3f0] sm:$0xff] }
 0x169   :  { %1601 = vmatpush1.msra.mxu0 %v533_v45  ;;  %1557 = vmatprep.subr.mxu1 %v330_v46  ;;  %v1707_v45 = vld [vmem:[#allocation8 + $0xe0] sm:$0xff] }
 0x16a   :  { %1418 = vmatmul.mubr.f32.gmra.mxu0 %v3694_v27  ;;  %1602 = vmatprep.subr.mxu0 %v522_v47  ;;  %v1803_v46 = vld [vmem:[#allocation8 + $0x3e0] sm:$0xff]  ;;  %v1706_v47 = vld [vmem:[#allocation8 + $0xd8] sm:$0xff] }
 0x16b   :  { %1494 = vmatprep.mubr.f32.mxu1 %v3592_v0  ;;  %1558 = vmatpush2.msra.mxu1 %v329_v48  ;;  %v1802_v48 = vld [vmem:[#allocation8 + $0x3d8] sm:$0xff] }
 0x16c   :  { %1603 = vmatpush1.msra.mxu0 %v521_v49  ;;  %1495 = vmatmul.mubr.f32.gmra.mxu1 %v3698_v33  ;;  %v1704_v49 = vld [vmem:[#allocation8 + $0xc8] sm:$0xff] }
 0x16d   :  { %1559 = vmatprep.subr.mxu1 %v318_v51  ;;  %1604 = vmatprep.subr.mxu0 %v510_v53  ;;  %v1800_v51 = vld [vmem:[#allocation8 + $0x3c8] sm:$0xff]  ;;  %v1703_v53 = vld [vmem:[#allocation8 + $0xc0] sm:$0xff] }
 0x16e   :  { %1560 = vmatpush2.msra.mxu1 %v317_v54  ;;  %1605 = vmatpush1.msra.mxu0 %v509_v57  ;;  %v1799_v54 = vld [vmem:[#allocation8 + $0x3c0] sm:$0xff]  ;;  %v1701_v57 = vld [vmem:[#allocation8 + $0xb0] sm:$0xff] }
 0x16f   :  { %1561 = vmatprep.subr.mxu1 %v306_v60  ;;  %1606 = vmatprep.subr.mxu0 %v498_v61  ;;  %v1797_v60 = vld [vmem:[#allocation8 + $0x3b0] sm:$0xff]  ;;  %v1700_v61 = vld [vmem:[#allocation8 + $0xa8] sm:$0xff] }
 0x170   :  { %1562 = vmatpush2.msra.mxu1 %v305_v1  ;;  %1607 = vmatpush1.msra.mxu0 %v497_v2  ;;  %v1796_v1 = vld [vmem:[#allocation8 + $0x3a8] sm:$0xff]  ;;  %v1698_v2 = vld [vmem:[#allocation8 + $0x98] sm:$0xff] }
 0x171   :  { %1563 = vmatprep.subr.mxu1 %v294_v7  ;;  %1608 = vmatprep.subr.mxu0 %v486_v11  ;;  %v1794_v7 = vld [vmem:[#allocation8 + $0x398] sm:$0xff]  ;;  %v1697_v11 = vld [vmem:[#allocation8 + $0x90] sm:$0xff] }
 0x172   :  { %1564 = vmatpush2.msra.mxu1 %v293_v13  ;;  %1565 = vmatprep.mubr.f32.mxu1 %v3681_v29  ;;  %v954_v29 = vadd.f32 %v953_v55, %v3748_v19  ;;  %v1793_v13 = vld [vmem:[#allocation8 + $0x390] sm:$0xff]  ;;  %v1788_v55 = vld [vmem:[#allocation8 + $0x368] sm:$0xff] }
 0x173   :  { %1609 = vmatpush1.msra.mxu0 %v485_v16  ;;  %1642 = vmatprep.mubr.f32.mxu0 %v3592_v0  ;;  %v1695_v16 = vld [vmem:[#allocation8 + $0x80] sm:$0xff] }
 0x174   :  { %1566 = vmatmul.mubr.f32.vlgmr.msra.gmra.mxu1 %v3684_v32  ;;  %1643 = vmatmul.mubr.f32.vlgmr.msra.gmra.mxu0 %v3688_v36  ;;  %v1719_v32 = vld [vmem:[#allocation8 + $0x140] sm:$0xff]  ;;  %v3764_v3 = vadd.f32 %v1030_v31, %v954_v29  ;;  %v1785_v29 = vld [vmem:[#allocation8 + $0x350] sm:$0xff]  ;;  %v1784_v31 = vld [vmem:[#allocation8 + $0x348] sm:$0xff] }
 0x175   :  { %2272 = vmatprep.subr.mxu0 %v1725_v18  ;;  %2349 = vmatprep.subr.mxu1 %v1821_v22  ;;  %v1815_v36 = vld [vmem:[#allocation8 + $0x440] sm:$0xff]  ;;  %v1790_v22 = vld [vmem:[#allocation8 + $0x378] sm:$0xff] }
 0x176   :  { %2273 = vmatpush1.msra.mxu0 %v1724_v25  ;;  %2350 = vmatpush1.msra.mxu1 %v1820_v26  ;;  %v1791_v18 = vld [vmem:[#allocation8 + $0x380] sm:$0xff]  ;;  %v1692_v25 = vld [vmem:[#allocation8 + $0x68] sm:$0xff] }
 0x177   :  { %2274 = vmatprep.subr.mxu0 %v1722_v58  ;;  %2351 = vmatprep.subr.mxu1 %v1818_v28  ;;  %v1691_v26 = vld [vmem:[#allocation8 + $0x60] sm:$0xff]  ;;  %v1689_v28 = vld [vmem:[#allocation8 + $0x50] sm:$0xff] }
 0x178   :  { %1571 = vmatprep.mubr.f32.mxu1 %v3691_v24  ;;  %1648 = vmatprep.mubr.f32.mxu0 %v3592_v0  ;;  %v1715_v24 = vld [vmem:[#allocation8 + $0x120] sm:$0xff] }
 0x179   :  { %2275 = vmatpush1.msra.mxu0 %v1721_v12  ;;  %2352 = vmatpush1.msra.mxu1 %v1817_v63  ;;  %v1811_v0 = vld [vmem:[#allocation8 + $0x420] sm:$0xff]  ;;  %v1688_v12 = vld [vmem:[#allocation8 + $0x48] sm:$0xff]  ;;  %v1686_v63 = vld [vmem:[#allocation8 + $0x38] sm:$0xff] }
 0x17a   :  { %1649 = vmatmul.mubr.f32.gmra.mxu0 %v3698_v33  ;;  %1572 = vmatmul.mubr.f32.gmra.mxu1 %v3694_v27  ;;  %v1658_v33 = vmax.f32 %v3764_v3, 0.0  ;;  %v1710_v27 = vld [vmem:[#allocation8 + $0xf8] sm:$0xff]  ;;  %v1787_v58 = vld [vmem:[#allocation8 + $0x360] sm:$0xff]  ;;  %v1693_v3 = vld [vmem:[#allocation8 + $0x70] sm:$0xff] }
 0x17b   :  { %2276 = vmatprep.subr.mxu0 %v1719_v32  ;;  %2353 = vmatprep.subr.mxu1 %v1815_v36  ;;  %v1782_v32 = vld [vmem:[#allocation8 + $0x338] sm:$0xff]  ;;  %v1685_v36 = vld [vmem:[#allocation8 + $0x30] sm:$0xff] }
 0x17c   :  { %2277 = vmatpush1.msra.mxu0 %v1718_v35  ;;  %2336 = vmatprep.mubr.f32.mxu0 %v1656_v37  ;;  %v1781_v35 = vld [vmem:[#allocation8 + $0x330] sm:$0xff] }
 0x17d   :  { %2354 = vmatpush1.msra.mxu1 %v1814_v21  ;;  %2278 = vmatprep.subr.mxu0 %v1716_v4  ;;  %v1683_v21 = vld [vmem:[#allocation8 + $0x20] sm:$0xff] }
 0x17e   :  { %2355 = vmatprep.subr.mxu1 %v1812_v38  ;;  %2279 = vmatpush1.msra.mxu0 %v1715_v24  ;;  %v1779_v4 = vld [vmem:[#allocation8 + $0x320] sm:$0xff]  ;;  %v1682_v38 = vld [vmem:[#allocation8 + $0x18] sm:$0xff] }
 0x17f   :  { %2356 = vmatpush1.msra.mxu1 %v1811_v0  ;;  %2280 = vmatprep.subr.mxu0 %v1713_v39  ;;  %v1778_v24 = vld [vmem:[#allocation8 + $0x318] sm:$0xff]  ;;  %v1680_v0 = vld [vmem:[#allocation8 + $0x8] sm:$0xff] }
 0x180   :  { %2357 = vmatprep.subr.mxu1 %v1809_v6  ;;  %2281 = vmatpush1.msra.mxu0 %v1712_v40  ;;  %v1776_v39 = vld [vmem:[#allocation8 + $0x308] sm:$0xff]  ;;  %v1679_v6 = vld [vmem:[#allocation8] sm:$0xff] }
 0x181   :  { %2358 = vmatpush1.msra.mxu1 %v1808_v41  ;;  %2413 = vmatprep.mubr.f32.mxu1 %v1658_v33  ;;  %v1775_v40 = vld [vmem:[#allocation8 + $0x300] sm:$0xff]  ;;  %v1773_v41 = vld [vmem:[#allocation8 + $0x2f0] sm:$0xff] }
 0x182   :  { %2282 = vmatprep.subr.mxu0 %v1710_v27  ;;  %2359 = vmatprep.subr.mxu1 %v1806_v42  ;;  %v1869_v27 = vld [vmem:[#allocation8 + $0x5f0] sm:$0xff]  ;;  %v1772_v42 = vld [vmem:[#allocation8 + $0x2e8] sm:$0xff] }
 0x183   :  { %2283 = vmatpush1.msra.mxu0 %v1709_v43  ;;  %2360 = vmatpush1.msra.mxu1 %v1805_v44  ;;  %v1868_v43 = vld [vmem:[#allocation8 + $0x5e8] sm:$0xff]  ;;  %v1770_v44 = vld [vmem:[#allocation8 + $0x2d8] sm:$0xff] }
 0x184   :  { %2284 = vmatprep.subr.mxu0 %v1707_v45  ;;  %2361 = vmatprep.subr.mxu1 %v1803_v46  ;;  %v1866_v45 = vld [vmem:[#allocation8 + $0x5d8] sm:$0xff]  ;;  %v1769_v46 = vld [vmem:[#allocation8 + $0x2d0] sm:$0xff] }
 0x185   :  { %2285 = vmatpush1.msra.mxu0 %v1706_v47  ;;  %2362 = vmatpush1.msra.mxu1 %v1802_v48  ;;  %v1865_v47 = vld [vmem:[#allocation8 + $0x5d0] sm:$0xff]  ;;  %v1767_v48 = vld [vmem:[#allocation8 + $0x2c0] sm:$0xff] }
 0x186   :  { %2286 = vmatprep.subr.mxu0 %v1704_v49  ;;  %2363 = vmatprep.subr.mxu1 %v1800_v51  ;;  %v1863_v49 = vld [vmem:[#allocation8 + $0x5c0] sm:$0xff]  ;;  %v1766_v51 = vld [vmem:[#allocation8 + $0x2b8] sm:$0xff] }
 0x187   :  { %2287 = vmatpush1.msra.mxu0 %v1703_v53  ;;  %2364 = vmatpush1.msra.mxu1 %v1799_v54  ;;  %v1862_v53 = vld [vmem:[#allocation8 + $0x5b8] sm:$0xff]  ;;  %v1764_v54 = vld [vmem:[#allocation8 + $0x2a8] sm:$0xff] }
 0x188   :  { %2288 = vmatprep.subr.mxu0 %v1701_v57  ;;  %2365 = vmatprep.subr.mxu1 %v1797_v60  ;;  %v1860_v57 = vld [vmem:[#allocation8 + $0x5a8] sm:$0xff]  ;;  %v1763_v60 = vld [vmem:[#allocation8 + $0x2a0] sm:$0xff] }
 0x189   :  { %2289 = vmatpush1.msra.mxu0 %v1700_v61  ;;  %2366 = vmatpush1.msra.mxu1 %v1796_v1  ;;  %v1859_v61 = vld [vmem:[#allocation8 + $0x5a0] sm:$0xff]  ;;  %v1761_v1 = vld [vmem:[#allocation8 + $0x290] sm:$0xff] }
 0x18a   :  { %2290 = vmatprep.subr.mxu0 %v1698_v2  ;;  %2367 = vmatprep.subr.mxu1 %v1794_v7  ;;  %v1857_v2 = vld [vmem:[#allocation8 + $0x590] sm:$0xff]  ;;  %v1760_v7 = vld [vmem:[#allocation8 + $0x288] sm:$0xff] }
 0x18b   :  { %2291 = vmatpush1.msra.mxu0 %v1697_v11  ;;  %2368 = vmatpush1.msra.mxu1 %v1793_v13  ;;  %v1856_v11 = vld [vmem:[#allocation8 + $0x588] sm:$0xff]  ;;  %v1758_v13 = vld [vmem:[#allocation8 + $0x278] sm:$0xff] }
 0x18c   :  { %2292 = vmatprep.subr.mxu0 %v1695_v16  ;;  %2369 = vmatprep.subr.mxu1 %v1791_v18  ;;  %v1854_v16 = vld [vmem:[#allocation8 + $0x578] sm:$0xff]  ;;  %v1757_v18 = vld [vmem:[#allocation8 + $0x270] sm:$0xff] }
 0x18d   :  { %2293 = vmatpush1.msra.mxu0 %v1694_v20  ;;  %2370 = vmatpush1.msra.mxu1 %v1790_v22  ;;  %v1853_v20 = vld [vmem:[#allocation8 + $0x570] sm:$0xff]  ;;  %v1755_v22 = vld [vmem:[#allocation8 + $0x260] sm:$0xff] }
 0x18e   :  { %2294 = vmatprep.subr.mxu0 %v1692_v25  ;;  %2371 = vmatprep.subr.mxu1 %v1788_v55  ;;  %v1851_v25 = vld [vmem:[#allocation8 + $0x560] sm:$0xff]  ;;  %v1754_v55 = vld [vmem:[#allocation8 + $0x258] sm:$0xff] }
 0x18f   :  { %2295 = vmatpush1.msra.mxu0 %v1691_v26  ;;  %2372 = vmatpush1.msra.mxu1 %v1787_v58  ;;  %v1850_v26 = vld [vmem:[#allocation8 + $0x558] sm:$0xff]  ;;  %v1752_v58 = vld [vmem:[#allocation8 + $0x248] sm:$0xff] }
 0x190   :  { %2296 = vmatprep.subr.mxu0 %v1689_v28  ;;  %2373 = vmatprep.subr.mxu1 %v1785_v29  ;;  %v1848_v28 = vld [vmem:[#allocation8 + $0x548] sm:$0xff]  ;;  %v1751_v29 = vld [vmem:[#allocation8 + $0x240] sm:$0xff] }
 0x191   :  { %2297 = vmatpush1.msra.mxu0 %v1688_v12  ;;  %2374 = vmatpush1.msra.mxu1 %v1784_v31  ;;  %v1847_v12 = vld [vmem:[#allocation8 + $0x540] sm:$0xff]  ;;  %v1749_v31 = vld [vmem:[#allocation8 + $0x230] sm:$0xff] }
 0x192   :  { %2298 = vmatprep.subr.mxu0 %v1686_v63  ;;  %2375 = vmatprep.subr.mxu1 %v1782_v32  ;;  %v1845_v63 = vld [vmem:[#allocation8 + $0x530] sm:$0xff]  ;;  %v1748_v32 = vld [vmem:[#allocation8 + $0x228] sm:$0xff] }
 0x193   :  { %2299 = vmatpush1.msra.mxu0 %v1685_v36  ;;  %2376 = vmatpush1.msra.mxu1 %v1781_v35  ;;  %v3775_v36 = vsub.s32 2, %v3705_v50  ;;  %v1844_v35 = vld [vmem:[#allocation8 + $0x528] sm:$0xff] }
 0x194   :  { %2300 = vmatprep.subr.mxu0 %v1683_v21  ;;  %2377 = vmatprep.subr.mxu1 %v1779_v4  ;;  %v1746_v21 = vld [vmem:[#allocation8 + $0x218] sm:$0xff] }
 0x195   :  { %2301 = vmatpush1.msra.mxu0 %v1682_v38  ;;  %2378 = vmatpush1.msra.mxu1 %v1778_v24  ;;  %v1842_v4 = vld [vmem:[#allocation8 + $0x518] sm:$0xff]  ;;  %v1745_v38 = vld [vmem:[#allocation8 + $0x210] sm:$0xff] }
 0x196   :  { %2302 = vmatprep.subr.mxu0 %v1680_v0  ;;  %2379 = vmatprep.subr.mxu1 %v1776_v39  ;;  %v1841_v24 = vld [vmem:[#allocation8 + $0x510] sm:$0xff]  ;;  %v1743_v0 = vld [vmem:[#allocation8 + $0x200] sm:$0xff]  ;;  %v957_v39 = vpop.f32.mrf.mxu1 }
 0x197   :  { %2303 = vmatpush1.msra.mxu0 %v1679_v6  ;;  %2380 = vmatpush1.msra.mxu1 %v1775_v40  ;;  %v1839_v6 = vld [vmem:[#allocation8 + $0x500] sm:$0xff]  ;;  %v1742_v40 = vld [vmem:[#allocation8 + $0x1f8] sm:$0xff] }
 0x198   :  { %2304 = vmatprep.subr.mxu0 %v1773_v41  ;;  %2381 = vmatprep.subr.mxu1 %v1869_v27  ;;  %v682_v41 = vrot.slane %v3712_v5, %v3775_v36  ;;  %v1838_v27 = vld [vmem:[#allocation8 + $0x4f8] sm:$0xff] }
 0x199   :  { %2305 = vmatpush2.msra.mxu0 %v1772_v42  ;;  %2382 = vmatpush2.msra.mxu1 %v1868_v43  ;;  %v1740_v42 = vld [vmem:[#allocation8 + $0x1e8] sm:$0xff]  ;;  %v3779_v43 = vpop.f32.mrf.mxu0 }
 0x19a   :  { %2306 = vmatprep.subr.mxu0 %v1770_v44  ;;  %2383 = vmatprep.subr.mxu1 %v1866_v45  ;;  %v1836_v44 = vld [vmem:[#allocation8 + $0x4e8] sm:$0xff]  ;;  %v1739_v45 = vld [vmem:[#allocation8 + $0x1e0] sm:$0xff] }
 0x19b   :  { %2307 = vmatpush2.msra.mxu0 %v1769_v46  ;;  %2384 = vmatpush2.msra.mxu1 %v1865_v47  ;;  %v1835_v46 = vld [vmem:[#allocation8 + $0x4e0] sm:$0xff]  ;;  %v1737_v47 = vld [vmem:[#allocation8 + $0x1d0] sm:$0xff] }
 0x19c   :  { %2308 = vmatprep.subr.mxu0 %v1767_v48  ;;  %2385 = vmatprep.subr.mxu1 %v1863_v49  ;;  %v798_v48 = vadd.f32 %v3707_v59, %v3720_v15  ;;  %v959_v49 = vpop.f32.mrf.mxu1  ;;  %v1829_v15 = vld [vmem:[#allocation8 + $0x4b0] sm:$0xff] }
 0x19d   :  { %2309 = vmatpush2.msra.mxu0 %v1766_v51  ;;  %2386 = vmatpush2.msra.mxu1 %v1862_v53  ;;  %v1833_v51 = vld [vmem:[#allocation8 + $0x4d0] sm:$0xff]  ;;  %v1736_v53 = vld [vmem:[#allocation8 + $0x1c8] sm:$0xff]  ;;  %v960_v59 = vadd.f32 %v959_v49, %v3748_v19  ;;  %v1826_v19 = vld [vmem:[#allocation8 + $0x498] sm:$0xff] }
 0x19e   :  { %2310 = vmatprep.subr.mxu0 %v1764_v54  ;;  %2387 = vmatprep.subr.mxu1 %v1860_v57  ;;  %v952_v54 = vadd.f32 %v3741_v14, %v682_v41  ;;  %v1832_v57 = vld [vmem:[#allocation8 + $0x4c8] sm:$0xff]  ;;  %v693_v14 = vsub.s32 5, %v3705_v50  ;;  %v1907_v49 = vld [vmem:[#allocation8 + $0x720] sm:$0xff] }
 0x19f   :  { %2311 = vmatpush2.msra.mxu0 %v1763_v60  ;;  %2388 = vmatpush2.msra.mxu1 %v1859_v61  ;;  %v1734_v60 = vld [vmem:[#allocation8 + $0x1b8] sm:$0xff]  ;;  %v806_v61 = vadd.f32 %v3743_v17, %v3739_v10 }
 0x1a0   :  { %2312 = vmatprep.subr.mxu0 %v1761_v1  ;;  %2389 = vmatprep.subr.mxu1 %v1857_v2  ;;  %v1036_v1 = vpop.f32.mrf.mxu0  ;;  %v1830_v2 = vld [vmem:[#allocation8 + $0x4b8] sm:$0xff] }
 0x1a1   :  { %2313 = vmatpush2.msra.mxu0 %v1760_v7  ;;  %2390 = vmatpush2.msra.mxu1 %v1856_v11  ;;  %v1733_v7 = vld [vmem:[#allocation8 + $0x1b0] sm:$0xff]  ;;  %v1731_v11 = vld [vmem:[#allocation8 + $0x1a0] sm:$0xff]  ;;  %v1730_v10 = vld [vmem:[#allocation8 + $0x198] sm:$0xff] }
 0x1a2   :  { %2314 = vmatprep.subr.mxu0 %v1758_v13  ;;  %2391 = vmatprep.subr.mxu1 %v1854_v16  ;;  %v3789_v13 = vadd.f32 %v3714_v9, %v798_v48  ;;  %v1827_v16 = vld [vmem:[#allocation8 + $0x4a0] sm:$0xff]  ;;  %v1824_v9 = vld [vmem:[#allocation8 + $0x488] sm:$0xff] }
 0x1a3   :  { %2315 = vmatpush2.msra.mxu0 %v1757_v18  ;;  %2392 = vmatpush2.msra.mxu1 %v1853_v20  ;;  %v3794_v18 = vadd.f32 %v3753_v23, %v952_v54  ;;  %v1728_v20 = vld [vmem:[#allocation8 + $0x188] sm:$0xff]  ;;  %v3802_v23 = vrot.slane %v3712_v5, %v693_v14  ;;  %v1898_v14 = vld [vmem:[#allocation8 + $0x6d8] sm:$0xff] }
 0x1a4   :  { %2316 = vmatprep.subr.mxu0 %v1755_v22  ;;  %2393 = vmatprep.subr.mxu1 %v1851_v25  ;;  %v3797_v22 = vadd.f32 %v3733_v56, %v806_v61  ;;  %v1727_v25 = vld [vmem:[#allocation8 + $0x180] sm:$0xff]  ;;  %v1916_v5 = vld [vmem:[#allocation8 + $0x768] sm:$0xff] }
 0x1a5   :  { %2317 = vmatpush2.msra.mxu0 %v1754_v55  ;;  %2394 = vmatpush2.msra.mxu1 %v1850_v26  ;;  %v958_v55 = vadd.f32 %v957_v39, %v682_v41  ;;  %v3799_v26 = vadd.f32 %v1036_v1, %v960_v59  ;;  %v1913_v39 = vld [vmem:[#allocation8 + $0x750] sm:$0xff]  ;;  %v2004_v48 = vld [vmem:[#allocation8 + $0xa28] sm:$0xff]  ;;  %v1902_v1 = vld [vmem:[#allocation8 + $0x6f8] sm:$0xff] }
 0x1a6   :  { %2318 = vmatprep.subr.mxu0 %v1752_v58  ;;  %2395 = vmatprep.subr.mxu1 %v1848_v28  ;;  %v1823_v58 = vld [vmem:[#allocation8 + $0x480] sm:$0xff]  ;;  %v1655_v28 = vmax.f32 %v3789_v13, 0.0  ;;  %v2000_v61 = vld [vmem:[#allocation8 + $0xa08] sm:$0xff]  ;;  %v1997_v59 = vld [vmem:[#allocation8 + $0x9f0] sm:$0xff] }
 0x1a7   :  { %2319 = vmatpush2.msra.mxu0 %v1751_v29  ;;  %2396 = vmatpush2.msra.mxu1 %v1847_v12  ;;  %v1917_v29 = vld [vmem:[#allocation8 + $0x770] sm:$0xff]  ;;  %v1657_v12 = vmax.f32 %v3794_v18, 0.0  ;;  %v1912_v13 = vld [vmem:[#allocation8 + $0x748] sm:$0xff] }
 0x1a8   :  { %2320 = vmatprep.subr.mxu0 %v1749_v31  ;;  %2397 = vmatprep.subr.mxu1 %v1845_v63  ;;  %v3791_v17 = vpop.f32.mrf.mxu0  ;;  %v2013_v31 = vld [vmem:[#allocation8 + $0xa70] sm:$0xff]  ;;  %v1668_v63 = vmax.f32 %v3797_v22, 0.0  ;;  %v2008_v18 = vld [vmem:[#allocation8 + $0xa48] sm:$0xff] }
 0x1a9   :  { %2321 = vmatpush2.msra.mxu0 %v1748_v32  ;;  %2398 = vmatpush2.msra.mxu1 %v1844_v35  ;;  %v3807_v32 = vpop.f32.mrf.mxu1  ;;  %v3812_v35 = vadd.f32 %v3779_v43, %v958_v55  ;;  %v1989_v55 = vld [vmem:[#allocation8 + $0x9b0] sm:$0xff] }
 0x1aa   :  { %2322 = vmatprep.subr.mxu0 %v1746_v21  ;;  %2399 = vmatprep.subr.mxu1 %v1842_v4  ;;  %v1107_v56 = vpop.f32.mrf.mxu0  ;;  %v1670_v21 = vmax.f32 %v3799_v26, 0.0  ;;  %v2012_v4 = vld [vmem:[#allocation8 + $0xa68] sm:$0xff]  ;;  %v1825_v22 = vld [vmem:[#allocation8 + $0x490] sm:$0xff]  ;;  %v1942_v26 = vld [vmem:[#allocation8 + $0x838] sm:$0xff] }
 0x1ab   :  { %2323 = vmatpush2.msra.mxu0 %v1745_v38  ;;  %2400 = vmatpush2.msra.mxu1 %v1841_v24  ;;  %v1108_v38 = vadd.f32 %v1107_v56, %v3802_v23  ;;  %v1914_v24 = vld [vmem:[#allocation8 + $0x758] sm:$0xff]  ;;  %v1184_v41 = vpop.f32.mrf.mxu1 }
 0x1ac   :  { %2324 = vmatprep.subr.mxu0 %v1743_v0  ;;  %2401 = vmatprep.subr.mxu1 %v1839_v6  ;;  %v2010_v0 = vld [vmem:[#allocation8 + $0xa58] sm:$0xff]  ;;  %v2009_v6 = vld [vmem:[#allocation8 + $0xa50] sm:$0xff] }
 0x1ad   :  { %2325 = vmatpush2.msra.mxu0 %v1742_v40  ;;  %2402 = vmatpush2.msra.mxu1 %v1838_v27  ;;  %v1667_v40 = vmax.f32 %v3725_v34, 0.0  ;;  %v1911_v27 = vld [vmem:[#allocation8 + $0x740] sm:$0xff]  ;;  %v3824_v43 = vadd.f32 %v1184_v41, %v1108_v38  ;;  %v1890_v56 = vld [vmem:[#allocation8 + $0x698] sm:$0xff]  ;;  %v1985_v38 = vld [vmem:[#allocation8 + $0x990] sm:$0xff] }
 0x1ae   :  { %2326 = vmatprep.subr.mxu0 %v1740_v42  ;;  %2403 = vmatprep.subr.mxu1 %v1836_v44  ;;  %v1669_v42 = vmax.f32 %v3812_v35, 0.0  ;;  %v2007_v44 = vld [vmem:[#allocation8 + $0xa40] sm:$0xff]  ;;  %v1884_v41 = vld [vmem:[#allocation8 + $0x668] sm:$0xff]  ;;  %v2062_v34 = vld [vmem:[#allocation8 + $0xbf8] sm:$0xff] }
 0x1af   :  { %2327 = vmatpush2.msra.mxu0 %v1739_v45  ;;  %2404 = vmatpush2.msra.mxu1 %v1835_v46  ;;  %v1910_v45 = vld [vmem:[#allocation8 + $0x738] sm:$0xff]  ;;  %v1660_v54 = vmax.f32 %v3824_v43, 0.0  ;;  %v1948_v43 = vld [vmem:[#allocation8 + $0x868] sm:$0xff]  ;;  %v1891_v35 = vld [vmem:[#allocation8 + $0x6a0] sm:$0xff] }
 0x1b0   :  { %2328 = vmatprep.subr.mxu0 %v1737_v47  ;;  %2405 = vmatprep.subr.mxu1 %v1833_v51  ;;  %v2006_v46 = vld [vmem:[#allocation8 + $0xa38] sm:$0xff]  ;;  %v1908_v47 = vld [vmem:[#allocation8 + $0x728] sm:$0xff]  ;;  %v2003_v51 = vld [vmem:[#allocation8 + $0xa20] sm:$0xff] }
 0x1b1   :  { %2329 = vmatpush2.msra.mxu0 %v1736_v53  ;;  %2406 = vmatpush2.msra.mxu1 %v1832_v57  ;;  %v1905_v53 = vld [vmem:[#allocation8 + $0x710] sm:$0xff] }
 0x1b2   :  { %2330 = vmatprep.subr.mxu0 %v1734_v60  ;;  %2407 = vmatprep.subr.mxu1 %v1830_v2  ;;  %v2001_v57 = vld [vmem:[#allocation8 + $0xa10] sm:$0xff]  ;;  %v1904_v60 = vld [vmem:[#allocation8 + $0x708] sm:$0xff]  ;;  %v1998_v2 = vld [vmem:[#allocation8 + $0x9f8] sm:$0xff] }
 0x1b3   :  { %2331 = vmatpush2.msra.mxu0 %v1733_v7  ;;  %2408 = vmatpush2.msra.mxu1 %v1829_v15  ;;  %v1901_v7 = vld [vmem:[#allocation8 + $0x6f0] sm:$0xff]  ;;  %v1899_v15 = vld [vmem:[#allocation8 + $0x6e0] sm:$0xff] }
 0x1b4   :  { %2332 = vmatprep.subr.mxu0 %v1731_v11  ;;  %2409 = vmatprep.subr.mxu1 %v1827_v16  ;;  %v1995_v11 = vld [vmem:[#allocation8 + $0x9e0] sm:$0xff]  ;;  %v1994_v16 = vld [vmem:[#allocation8 + $0x9d8] sm:$0xff] }
 0x1b5   :  { %2333 = vmatpush2.msra.mxu0 %v1730_v10  ;;  %2410 = vmatpush2.msra.mxu1 %v1826_v19  ;;  %v1896_v10 = vld [vmem:[#allocation8 + $0x6c8] sm:$0xff] }
 0x1b6   :  { %2334 = vmatprep.subr.mxu0 %v1728_v20  ;;  %2411 = vmatprep.subr.mxu1 %v1824_v9  ;;  %v1992_v19 = vld [vmem:[#allocation8 + $0x9c8] sm:$0xff]  ;;  %v1895_v20 = vld [vmem:[#allocation8 + $0x6c0] sm:$0xff] }
 0x1b7   :  { %2335 = vmatpush2.msra.mxu0 %v1727_v25  ;;  %2412 = vmatpush2.msra.mxu1 %v1823_v58  ;;  %v1991_v9 = vld [vmem:[#allocation8 + $0x9c0] sm:$0xff]  ;;  %v1893_v25 = vld [vmem:[#allocation8 + $0x6b0] sm:$0xff]  ;;  %v1892_v58 = vld [vmem:[#allocation8 + $0x6a8] sm:$0xff] }
 0x1b8   :  { %2337 = vmatmul.mubr.f32.vlgmr.msra.gmra.mxu0 %v1655_v28  ;;  %2414 = vmatmul.mubr.f32.vlgmr.msra.gmra.mxu1 %v1657_v12 }
 0x1b9   :  { %2426 = vmatprep.subr.mxu0 %v1917_v29  ;;  %2503 = vmatprep.subr.mxu1 %v2013_v31  ;;  %v1988_v29 = vld [vmem:[#allocation8 + $0x9a8] sm:$0xff]  ;;  %v1986_v31 = vld [vmem:[#allocation8 + $0x998] sm:$0xff] }
 0x1ba   :  { %2342 = vmatprep.mubr.f32.mxu0 %v1668_v63  ;;  %2419 = vmatprep.mubr.f32.mxu1 %v1670_v21 }
 0x1bb   :  { %2427 = vmatpush1.msra.mxu0 %v1916_v5  ;;  %2504 = vmatpush1.msra.mxu1 %v2012_v4  ;;  %v1889_v4 = vld [vmem:[#allocation8 + $0x690] sm:$0xff] }
 0x1bc   :  { %2428 = vmatprep.subr.mxu0 %v1914_v24  ;;  %2505 = vmatprep.subr.mxu1 %v2010_v0  ;;  %v1887_v24 = vld [vmem:[#allocation8 + $0x680] sm:$0xff] }
 0x1bd   :  { %2429 = vmatpush1.msra.mxu0 %v1913_v39  ;;  %2506 = vmatpush1.msra.mxu1 %v2009_v6  ;;  %v1983_v0 = vld [vmem:[#allocation8 + $0x980] sm:$0xff]  ;;  %v1886_v39 = vld [vmem:[#allocation8 + $0x678] sm:$0xff] }
 0x1be   :  { %2343 = vmatmul.mubr.f32.gmra.mxu0 %v1667_v40  ;;  %2420 = vmatmul.mubr.f32.gmra.mxu1 %v1669_v42  ;;  %v1982_v6 = vld [vmem:[#allocation8 + $0x978] sm:$0xff] }
 0x1bf   :  { %2430 = vmatprep.subr.mxu0 %v1911_v27  ;;  %2507 = vmatprep.subr.mxu1 %v2007_v44  ;;  %v1980_v27 = vld [vmem:[#allocation8 + $0x968] sm:$0xff] }
 0x1c0   :  { %2431 = vmatpush1.msra.mxu0 %v1910_v45  ;;  %2508 = vmatpush1.msra.mxu1 %v2006_v46  ;;  %v1883_v45 = vld [vmem:[#allocation8 + $0x660] sm:$0xff] }
 0x1c1   :  { %2432 = vmatprep.subr.mxu0 %v1908_v47  ;;  %2509 = vmatprep.subr.mxu1 %v2004_v48  ;;  %v1979_v46 = vld [vmem:[#allocation8 + $0x960] sm:$0xff]  ;;  %v1881_v47 = vld [vmem:[#allocation8 + $0x650] sm:$0xff] }
 0x1c2   :  { %2433 = vmatpush1.msra.mxu0 %v1907_v49  ;;  %2510 = vmatpush1.msra.mxu1 %v2003_v51  ;;  %v1977_v48 = vld [vmem:[#allocation8 + $0x950] sm:$0xff]  ;;  %v3837_v49 = vpop.f32.mrf.mxu0  ;;  %v1880_v51 = vld [vmem:[#allocation8 + $0x648] sm:$0xff] }
 0x1c3   :  { %2434 = vmatprep.subr.mxu0 %v1905_v53  ;;  %2511 = vmatprep.subr.mxu1 %v2001_v57  ;;  %v1976_v53 = vld [vmem:[#allocation8 + $0x948] sm:$0xff]  ;;  %v701_v57 = vsub.s32 7, %v3705_v50 }
 0x1c4   :  { %2435 = vmatpush1.msra.mxu0 %v1904_v60  ;;  %2490 = vmatprep.mubr.f32.mxu0 %v1660_v54  ;;  %v1878_v60 = vld [vmem:[#allocation8 + $0x638] sm:$0xff] }
 0x1c5   :  { %2512 = vmatpush1.msra.mxu1 %v2000_v61  ;;  %2436 = vmatprep.subr.mxu0 %v1902_v1  ;;  %v3833_v5 = vpop.f32.mrf.mxu1  ;;  %v1974_v61 = vld [vmem:[#allocation8 + $0x938] sm:$0xff] }
 0x1c6   :  { %2513 = vmatprep.subr.mxu1 %v1998_v2  ;;  %2437 = vmatpush1.msra.mxu0 %v1901_v7  ;;  %v1877_v2 = vld [vmem:[#allocation8 + $0x630] sm:$0xff] }
 0x1c7   :  { %2514 = vmatpush1.msra.mxu1 %v1997_v59  ;;  %2438 = vmatprep.subr.mxu0 %v1899_v15  ;;  %v3835_v44 = vpop.f32.mrf.mxu1  ;;  %v1973_v7 = vld [vmem:[#allocation8 + $0x930] sm:$0xff]  ;;  %v3842_v59 = vpop.f32.mrf.mxu0  ;;  %v1875_v15 = vld [vmem:[#allocation8 + $0x620] sm:$0xff] }
 0x1c8   :  { %2515 = vmatprep.subr.mxu1 %v1995_v11  ;;  %2439 = vmatpush1.msra.mxu0 %v1898_v14  ;;  %v1971_v11 = vld [vmem:[#allocation8 + $0x920] sm:$0xff]  ;;  %v1874_v14 = vld [vmem:[#allocation8 + $0x618] sm:$0xff] }
 0x1c9   :  { %2516 = vmatpush1.msra.mxu1 %v1994_v16  ;;  %2440 = vmatprep.subr.mxu0 %v1896_v10  ;;  %v1970_v16 = vld [vmem:[#allocation8 + $0x918] sm:$0xff] }
 0x1ca   :  { %2517 = vmatprep.subr.mxu1 %v1992_v19  ;;  %2441 = vmatpush1.msra.mxu0 %v1895_v20  ;;  %v3844_v10 = vld [vmem:[#allocation7] sm:$0xff]  ;;  %v1872_v20 = vld [vmem:[#allocation8 + $0x608] sm:$0xff] }
 0x1cb   :  { %2518 = vmatpush1.msra.mxu1 %v1991_v9  ;;  %2442 = vmatprep.subr.mxu0 %v1893_v25  ;;  %v3840_v1 = vpop.f32.mrf.mxu1  ;;  %v3847_v19 = vrot.slane %v3844_v10, %v701_v57  ;;  %v1968_v9 = vld [vmem:[#allocation8 + $0x908] sm:$0xff] }
 0x1cc   :  { %2519 = vmatprep.subr.mxu1 %v1989_v55  ;;  %2443 = vmatpush1.msra.mxu0 %v1892_v58  ;;  %v1871_v58 = vld [vmem:[#allocation8 + $0x600] sm:$0xff]  ;;  %v2052_v57 = vld [vmem:[#allocation8 + $0xba8] sm:$0xff] }
 0x1cd   :  { %2520 = vmatpush1.msra.mxu1 %v1988_v29  ;;  %2444 = vmatprep.subr.mxu0 %v1890_v56  ;;  %v3849_v25 = vpop.f32.mrf.mxu0  ;;  %v1261_v55 = vpop.f32.mrf.mxu1  ;;  %v1967_v29 = vld [vmem:[#allocation8 + $0x900] sm:$0xff]  ;;  %v1965_v56 = vld [vmem:[#allocation8 + $0x8f0] sm:$0xff] }
 0x1ce   :  { %2521 = vmatprep.subr.mxu1 %v1986_v31  ;;  %2445 = vmatpush1.msra.mxu0 %v1889_v4  ;;  %v2061_v31 = vld [vmem:[#allocation8 + $0xbf0] sm:$0xff]  ;;  %v1964_v4 = vld [vmem:[#allocation8 + $0x8e8] sm:$0xff] }
 0x1cf   :  { %2522 = vmatpush1.msra.mxu1 %v1985_v38  ;;  %2446 = vmatprep.subr.mxu0 %v1887_v24  ;;  %v2060_v38 = vld [vmem:[#allocation8 + $0xbe8] sm:$0xff]  ;;  %v1262_v24 = vadd.f32 %v1261_v55, %v3847_v19  ;;  %v2045_v55 = vld [vmem:[#allocation8 + $0xb70] sm:$0xff] }
 0x1d0   :  { %2523 = vmatprep.subr.mxu1 %v1983_v0  ;;  %2447 = vmatpush1.msra.mxu0 %v1886_v39  ;;  %v1962_v0 = vld [vmem:[#allocation8 + $0x8d8] sm:$0xff] }
 0x1d1   :  { %2524 = vmatpush1.msra.mxu1 %v1982_v6  ;;  %2448 = vmatprep.subr.mxu0 %v1884_v41  ;;  %v2058_v39 = vld [vmem:[#allocation8 + $0xbd8] sm:$0xff]  ;;  %v1338_v6 = vpop.f32.mrf.mxu0  ;;  %v1961_v41 = vld [vmem:[#allocation8 + $0x8d0] sm:$0xff] }
 0x1d2   :  { %2525 = vmatprep.subr.mxu1 %v1980_v27  ;;  %2449 = vmatpush1.msra.mxu0 %v1883_v45  ;;  %v2057_v27 = vld [vmem:[#allocation8 + $0xbd0] sm:$0xff]  ;;  %v1959_v45 = vld [vmem:[#allocation8 + $0x8c0] sm:$0xff] }
 0x1d3   :  { %2526 = vmatpush1.msra.mxu1 %v1979_v46  ;;  %2450 = vmatprep.subr.mxu0 %v1881_v47  ;;  %v2055_v46 = vld [vmem:[#allocation8 + $0xbc0] sm:$0xff]  ;;  %v3852_v47 = vadd.f32 %v1338_v6, %v1262_v24  ;;  %v689_v6 = vsub.s32 4, %v3705_v50 }
 0x1d4   :  { %2527 = vmatprep.subr.mxu1 %v1977_v48  ;;  %2451 = vmatpush1.msra.mxu0 %v1880_v51  ;;  %v1958_v48 = vld [vmem:[#allocation8 + $0x8b8] sm:$0xff]  ;;  %v1943_v24 = vld [vmem:[#allocation8 + $0x840] sm:$0xff] }
 0x1d5   :  { %2528 = vmatpush1.msra.mxu1 %v1976_v53  ;;  %2452 = vmatprep.subr.mxu0 %v1878_v60  ;;  %v2054_v51 = vld [vmem:[#allocation8 + $0xbb8] sm:$0xff]  ;;  %v1956_v53 = vld [vmem:[#allocation8 + $0x8a8] sm:$0xff]  ;;  %v1955_v60 = vld [vmem:[#allocation8 + $0x8a0] sm:$0xff] }
 0x1d6   :  { %2529 = vmatprep.subr.mxu1 %v1974_v61  ;;  %2453 = vmatpush1.msra.mxu0 %v1877_v2  ;;  %v2051_v61 = vld [vmem:[#allocation8 + $0xba0] sm:$0xff]  ;;  %v1953_v2 = vld [vmem:[#allocation8 + $0x890] sm:$0xff] }
 0x1d7   :  { %2530 = vmatpush1.msra.mxu1 %v1973_v7  ;;  %2454 = vmatprep.subr.mxu0 %v1875_v15  ;;  %v2049_v7 = vld [vmem:[#allocation8 + $0xb90] sm:$0xff]  ;;  %v1662_v15 = vmax.f32 %v3852_v47, 0.0 }
 0x1d8   :  { %2531 = vmatprep.subr.mxu1 %v1971_v11  ;;  %2455 = vmatpush1.msra.mxu0 %v1874_v14  ;;  %v1952_v11 = vld [vmem:[#allocation8 + $0x888] sm:$0xff]  ;;  %v1933_v47 = vld [vmem:[#allocation8 + $0x7f0] sm:$0xff] }
 0x1d9   :  { %2532 = vmatpush1.msra.mxu1 %v1970_v16  ;;  %2456 = vmatprep.subr.mxu0 %v1872_v20  ;;  %v2048_v14 = vld [vmem:[#allocation8 + $0xb88] sm:$0xff]  ;;  %v1950_v16 = vld [vmem:[#allocation8 + $0x878] sm:$0xff] }
 0x1da   :  { %2533 = vmatprep.subr.mxu1 %v1968_v9  ;;  %2457 = vmatpush1.msra.mxu0 %v1871_v58  ;;  %v2046_v20 = vld [vmem:[#allocation8 + $0xb78] sm:$0xff]  ;;  %v1949_v9 = vld [vmem:[#allocation8 + $0x870] sm:$0xff]  ;;  %v1947_v58 = vld [vmem:[#allocation8 + $0x860] sm:$0xff] }
 0x1db   :  { %2534 = vmatpush1.msra.mxu1 %v1967_v29  ;;  %2458 = vmatprep.subr.mxu0 %v1965_v56  ;;  %v2043_v29 = vld [vmem:[#allocation8 + $0xb60] sm:$0xff]  ;;  %v1946_v56 = vld [vmem:[#allocation8 + $0x858] sm:$0xff] }
 0x1dc   :  { %2535 = vmatprep.subr.mxu1 %v2061_v31  ;;  %2459 = vmatpush2.msra.mxu0 %v1964_v4  ;;  %v2042_v31 = vld [vmem:[#allocation8 + $0xb58] sm:$0xff]  ;;  %v1944_v4 = vld [vmem:[#allocation8 + $0x848] sm:$0xff] }
 0x1dd   :  { %2536 = vmatpush2.msra.mxu1 %v2060_v38  ;;  %2460 = vmatprep.subr.mxu0 %v1962_v0  ;;  %v2040_v38 = vld [vmem:[#allocation8 + $0xb48] sm:$0xff]  ;;  %v2039_v0 = vld [vmem:[#allocation8 + $0xb40] sm:$0xff] }
 0x1de   :  { %2537 = vmatprep.subr.mxu1 %v2058_v39  ;;  %2461 = vmatpush2.msra.mxu0 %v1961_v41  ;;  %v1941_v39 = vld [vmem:[#allocation8 + $0x830] sm:$0xff] }
 0x1df   :  { %2538 = vmatpush2.msra.mxu1 %v2057_v27  ;;  %2462 = vmatprep.subr.mxu0 %v1959_v45  ;;  %v2037_v41 = vld [vmem:[#allocation8 + $0xb30] sm:$0xff]  ;;  %v1940_v27 = vld [vmem:[#allocation8 + $0x828] sm:$0xff]  ;;  %v697_v45 = vsub.s32 6, %v3705_v50  ;;  %v2214_v50 = vld [vmem:[#allocation8 + $0x10b8] sm:$0xff] }
 0x1e0   :  { %2539 = vmatprep.subr.mxu1 %v2055_v46  ;;  %2463 = vmatpush2.msra.mxu0 %v1958_v48  ;;  %v2036_v46 = vld [vmem:[#allocation8 + $0xb28] sm:$0xff]  ;;  %v1938_v48 = vld [vmem:[#allocation8 + $0x818] sm:$0xff] }
 0x1e1   :  { %2540 = vmatpush2.msra.mxu1 %v2054_v51  ;;  %2464 = vmatprep.subr.mxu0 %v1956_v53  ;;  %v2034_v51 = vld [vmem:[#allocation8 + $0xb18] sm:$0xff]  ;;  %v1937_v53 = vld [vmem:[#allocation8 + $0x810] sm:$0xff] }
 0x1e2   :  { %2541 = vmatprep.subr.mxu1 %v2052_v57  ;;  %2465 = vmatpush2.msra.mxu0 %v1955_v60  ;;  %v2033_v60 = vld [vmem:[#allocation8 + $0xb10] sm:$0xff] }
 0x1e3   :  { %2542 = vmatpush2.msra.mxu1 %v2051_v61  ;;  %2466 = vmatprep.subr.mxu0 %v1953_v2  ;;  %v1935_v61 = vld [vmem:[#allocation8 + $0x800] sm:$0xff]  ;;  %v690_v2 = vrot.slane %v3844_v10, %v689_v6 }
 0x1e4   :  { %2543 = vmatprep.subr.mxu1 %v2049_v7  ;;  %2467 = vmatpush2.msra.mxu0 %v1952_v11  ;;  %v2031_v7 = vld [vmem:[#allocation8 + $0xb00] sm:$0xff]  ;;  %v1934_v11 = vld [vmem:[#allocation8 + $0x7f8] sm:$0xff] }
 0x1e5   :  { %2544 = vmatpush2.msra.mxu1 %v2048_v14  ;;  %2567 = vmatprep.mubr.f32.mxu1 %v1662_v15  ;;  %v698_v14 = vrot.slane %v3844_v10, %v697_v45  ;;  %v1928_v10 = vld [vmem:[#allocation8 + $0x7c8] sm:$0xff]  ;;  %v1925_v45 = vld [vmem:[#allocation8 + $0x7b0] sm:$0xff] }
 0x1e6   :  { %2468 = vmatprep.subr.mxu0 %v1950_v16  ;;  %2545 = vmatprep.subr.mxu1 %v2046_v20  ;;  %v2030_v16 = vld [vmem:[#allocation8 + $0xaf8] sm:$0xff]  ;;  %v1932_v20 = vld [vmem:[#allocation8 + $0x7e8] sm:$0xff] }
 0x1e7   :  { %2469 = vmatpush2.msra.mxu0 %v1949_v9  ;;  %2546 = vmatpush2.msra.mxu1 %v2045_v55  ;;  %v2028_v9 = vld [vmem:[#allocation8 + $0xae8] sm:$0xff]  ;;  %v1931_v55 = vld [vmem:[#allocation8 + $0x7e0] sm:$0xff] }
 0x1e8   :  { %2470 = vmatprep.subr.mxu0 %v1947_v58  ;;  %2547 = vmatprep.subr.mxu1 %v2043_v29  ;;  %v1265_v57 = vpop.f32.mrf.mxu1 }
 0x1e9   :  { %2471 = vmatpush2.msra.mxu0 %v1946_v56  ;;  %2548 = vmatpush2.msra.mxu1 %v2042_v31  ;;  %v2027_v56 = vld [vmem:[#allocation8 + $0xae0] sm:$0xff]  ;;  %v1929_v31 = vld [vmem:[#allocation8 + $0x7d0] sm:$0xff] }
 0x1ea   :  { %2472 = vmatprep.subr.mxu0 %v1944_v4  ;;  %2549 = vmatprep.subr.mxu1 %v2040_v38  ;;  %v1267_v58 = vpop.f32.mrf.mxu1  ;;  %v1342_v29 = vpop.f32.mrf.mxu0  ;;  %v1106_v4 = vadd.f32 %v3791_v17, %v690_v2  ;;  %v2025_v38 = vld [vmem:[#allocation8 + $0xad0] sm:$0xff] }
 0x1eb   :  { %2473 = vmatpush2.msra.mxu0 %v1943_v24  ;;  %2550 = vmatpush2.msra.mxu1 %v2039_v0  ;;  %v1260_v24 = vadd.f32 %v3840_v1, %v698_v14  ;;  %v2024_v0 = vld [vmem:[#allocation8 + $0xac8] sm:$0xff]  ;;  %v1268_v6 = vadd.f32 %v1267_v58, %v3847_v19  ;;  %v1922_v19 = vld [vmem:[#allocation8 + $0x798] sm:$0xff] }
 0x1ec   :  { %2474 = vmatprep.subr.mxu0 %v1941_v39  ;;  %2551 = vmatprep.subr.mxu1 %v2037_v41  ;;  %v1926_v39 = vld [vmem:[#allocation8 + $0x7b8] sm:$0xff]  ;;  %v1114_v41 = vadd.f32 %v3842_v59, %v3802_v23  ;;  %v1344_v17 = vpop.f32.mrf.mxu0  ;;  %v3867_v1 = vadd.f32 %v3807_v32, %v1106_v4  ;;  %v2016_v32 = vld [vmem:[#allocation8 + $0xa88] sm:$0xff]  ;;  %v2103_v4 = vld [vmem:[#allocation8 + $0xd40] sm:$0xff] }
 0x1ed   :  { %2475 = vmatpush2.msra.mxu0 %v1940_v27  ;;  %2552 = vmatpush2.msra.mxu1 %v2036_v46  ;;  %v2022_v27 = vld [vmem:[#allocation8 + $0xab8] sm:$0xff]  ;;  %v1266_v46 = vadd.f32 %v1265_v57, %v698_v14  ;;  %v3871_v23 = vadd.f32 %v3849_v25, %v1260_v24  ;;  %v1920_v57 = vld [vmem:[#allocation8 + $0x788] sm:$0xff] }
 0x1ee   :  { %2476 = vmatprep.subr.mxu0 %v1938_v48  ;;  %2553 = vmatprep.subr.mxu1 %v2034_v51  ;;  %v2021_v48 = vld [vmem:[#allocation8 + $0xab0] sm:$0xff]  ;;  %v1923_v51 = vld [vmem:[#allocation8 + $0x7a0] sm:$0xff]  ;;  %v2018_v59 = vld [vmem:[#allocation8 + $0xa98] sm:$0xff]  ;;  %v1659_v25 = vmax.f32 %v3867_v1, 0.0 }
 0x1ef   :  { %2477 = vmatpush2.msra.mxu0 %v1937_v53  ;;  %2554 = vmatpush2.msra.mxu1 %v2033_v60  ;;  %v2019_v53 = vld [vmem:[#allocation8 + $0xaa0] sm:$0xff]  ;;  %v1112_v60 = vadd.f32 %v3837_v49, %v690_v2  ;;  %v3878_v14 = vadd.f32 %v1342_v29, %v1266_v46  ;;  %v2109_v2 = vld [vmem:[#allocation8 + $0xd70] sm:$0xff]  ;;  %v2106_v58 = vld [vmem:[#allocation8 + $0xd58] sm:$0xff] }
 0x1f0   :  { %2478 = vmatprep.subr.mxu0 %v1935_v61  ;;  %2555 = vmatprep.subr.mxu1 %v2031_v7  ;;  %v3873_v61 = vadd.f32 %v1344_v17, %v1268_v6  ;;  %v3876_v7 = vadd.f32 %v3835_v44, %v1114_v41  ;;  %v2015_v49 = vld [vmem:[#allocation8 + $0xa80] sm:$0xff]  ;;  %v1661_v44 = vmax.f32 %v3871_v23, 0.0  ;;  %v2202_v24 = vld [vmem:[#allocation8 + $0x1058] sm:$0xff]  ;;  %v2096_v17 = vld [vmem:[#allocation8 + $0xd08] sm:$0xff] }
 0x1f1   :  { %2479 = vmatpush2.msra.mxu0 %v1934_v11  ;;  %2556 = vmatpush2.msra.mxu1 %v2030_v16  ;;  %v1919_v11 = vld [vmem:[#allocation8 + $0x780] sm:$0xff]  ;;  %v3882_v16 = vadd.f32 %v3833_v5, %v1112_v60  ;;  %v4028_v29 = vmax.f32 %v3878_v14, 0.0  ;;  %v2105_v5 = vld [vmem:[#allocation8 + $0xd50] sm:$0xff]  ;;  %v2196_v46 = vld [vmem:[#allocation8 + $0x1028] sm:$0xff] }
 0x1f2   :  { %2480 = vmatprep.subr.mxu0 %v1932_v20  ;;  %2557 = vmatprep.subr.mxu1 %v2028_v9  ;;  %v1674_v20 = vmax.f32 %v3873_v61, 0.0  ;;  %v2108_v9 = vld [vmem:[#allocation8 + $0xd68] sm:$0xff]  ;;  %v2099_v6 = vld [vmem:[#allocation8 + $0xd20] sm:$0xff]  ;;  %v2134_v61 = vld [vmem:[#allocation8 + $0xe38] sm:$0xff] }
 0x1f3   :  { %2481 = vmatpush2.msra.mxu0 %v1931_v55  ;;  %2558 = vmatpush2.msra.mxu1 %v2027_v56  ;;  %v1672_v55 = vmax.f32 %v3876_v7, 0.0  ;;  %v2205_v56 = vld [vmem:[#allocation8 + $0x1070] sm:$0xff]  ;;  %v2199_v41 = vld [vmem:[#allocation8 + $0x1040] sm:$0xff]  ;;  %v2104_v1 = vld [vmem:[#allocation8 + $0xd48] sm:$0xff] }
 0x1f4   :  { %2482 = vmatprep.subr.mxu0 %v1929_v31  ;;  %2559 = vmatprep.subr.mxu1 %v2025_v38  ;;  %v1671_v31 = vmax.f32 %v3882_v16, 0.0  ;;  %v2204_v38 = vld [vmem:[#allocation8 + $0x1068] sm:$0xff]  ;;  %v2091_v60 = vld [vmem:[#allocation8 + $0xce0] sm:$0xff]  ;;  %v2017_v7 = vld [vmem:[#allocation8 + $0xa90] sm:$0xff] }
 0x1f5   :  { %2483 = vmatpush2.msra.mxu0 %v1928_v10  ;;  %2560 = vmatpush2.msra.mxu1 %v2024_v0  ;;  %v2102_v10 = vld [vmem:[#allocation8 + $0xd38] sm:$0xff]  ;;  %v2100_v0 = vld [vmem:[#allocation8 + $0xd28] sm:$0xff] }
 0x1f6   :  { %2484 = vmatprep.subr.mxu0 %v1926_v39  ;;  %2561 = vmatprep.subr.mxu1 %v2022_v27  ;;  %v2201_v39 = vld [vmem:[#allocation8 + $0x1050] sm:$0xff]  ;;  %v2254_v16 = vld [vmem:[#allocation8 + $0x11f8] sm:$0xff]  ;;  %v2200_v23 = vld [vmem:[#allocation8 + $0x1048] sm:$0xff] }
 0x1f7   :  { %2485 = vmatpush2.msra.mxu0 %v1925_v45  ;;  %2562 = vmatpush2.msra.mxu1 %v2021_v48  ;;  %v2097_v27 = vld [vmem:[#allocation8 + $0xd10] sm:$0xff]  ;;  %v2198_v45 = vld [vmem:[#allocation8 + $0x1038] sm:$0xff] }
 0x1f8   :  { %2486 = vmatprep.subr.mxu0 %v1923_v51  ;;  %2563 = vmatprep.subr.mxu1 %v2019_v53  ;;  %v2094_v48 = vld [vmem:[#allocation8 + $0xcf8] sm:$0xff]  ;;  %v2195_v51 = vld [vmem:[#allocation8 + $0x1020] sm:$0xff]  ;;  %v2093_v53 = vld [vmem:[#allocation8 + $0xcf0] sm:$0xff] }
 0x1f9   :  { %2487 = vmatpush2.msra.mxu0 %v1922_v19  ;;  %2564 = vmatpush2.msra.mxu1 %v2018_v59  ;;  %v2193_v19 = vld [vmem:[#allocation8 + $0x1010] sm:$0xff]  ;;  %v2192_v59 = vld [vmem:[#allocation8 + $0x1008] sm:$0xff] }
 0x1fa   :  { %2488 = vmatprep.subr.mxu0 %v1920_v57  ;;  %2565 = vmatprep.subr.mxu1 %v2016_v32  ;;  %v2090_v57 = vld [vmem:[#allocation8 + $0xcd8] sm:$0xff] }
 0x1fb   :  { %2489 = vmatpush2.msra.mxu0 %v1919_v11  ;;  %2566 = vmatpush2.msra.mxu1 %v2015_v49  ;;  %v2190_v32 = vld [vmem:[#allocation8 + $0xff8] sm:$0xff]  ;;  %v2088_v11 = vld [vmem:[#allocation8 + $0xcc8] sm:$0xff]  ;;  %v2189_v49 = vld [vmem:[#allocation8 + $0xff0] sm:$0xff] }
 0x1fc   :  { %2491 = vmatmul.mubr.f32.vlgmr.msra.gmra.mxu0 %v1659_v25  ;;  %2568 = vmatmul.mubr.f32.vlgmr.msra.gmra.mxu1 %v1661_v44 }
 0x1fd   :  { %2580 = vmatprep.subr.mxu0 %v2109_v2  ;;  %2496 = vmatprep.mubr.f32.mxu0 %v1672_v55  ;;  %v2087_v2 = vld [vmem:[#allocation8 + $0xcc0] sm:$0xff] }
 0x1fe   :  { %2581 = vmatpush1.msra.mxu0 %v2108_v9  ;;  %2573 = vmatprep.mubr.f32.mxu1 %v1674_v20  ;;  %v2187_v9 = vld [vmem:[#allocation8 + $0xfe0] sm:$0xff] }
 0x1ff   :  { %2582 = vmatprep.subr.mxu0 %v2106_v58  ;;  %2657 = vmatprep.subr.mxu1 %v2205_v56  ;;  %v2085_v58 = vld [vmem:[#allocation8 + $0xcb0] sm:$0xff]  ;;  %v2084_v56 = vld [vmem:[#allocation8 + $0xca8] sm:$0xff] }
 0x200   :  { %2583 = vmatpush1.msra.mxu0 %v2105_v5  ;;  %2574 = vmatmul.mubr.f32.gmra.mxu1 %v4028_v29  ;;  %v2186_v5 = vld [vmem:[#allocation8 + $0xfd8] sm:$0xff]  ;;  %v2219_v29 = vld [vmem:[#allocation8 + $0x10e0] sm:$0xff] }
 0x201   :  { %2497 = vmatmul.mubr.f32.gmra.mxu0 %v1671_v31  ;;  %2584 = vmatprep.subr.mxu0 %v2103_v4  ;;  %v2184_v4 = vld [vmem:[#allocation8 + $0xfc8] sm:$0xff] }
 0x202   :  { %2658 = vmatpush1.msra.mxu1 %v2204_v38  ;;  %2585 = vmatpush1.msra.mxu0 %v2102_v10  ;;  %v2082_v38 = vld [vmem:[#allocation8 + $0xc98] sm:$0xff]  ;;  %v2183_v10 = vld [vmem:[#allocation8 + $0xfc0] sm:$0xff] }
 0x203   :  { %2659 = vmatprep.subr.mxu1 %v2202_v24  ;;  %2586 = vmatprep.subr.mxu0 %v2100_v0  ;;  %v2081_v24 = vld [vmem:[#allocation8 + $0xc90] sm:$0xff] }
 0x204   :  { %2660 = vmatpush1.msra.mxu1 %v2201_v39  ;;  %2587 = vmatpush1.msra.mxu0 %v2099_v6  ;;  %v2181_v0 = vld [vmem:[#allocation8 + $0xfb0] sm:$0xff]  ;;  %v2079_v39 = vld [vmem:[#allocation8 + $0xc80] sm:$0xff]  ;;  %v2180_v6 = vld [vmem:[#allocation8 + $0xfa8] sm:$0xff] }
 0x205   :  { %2661 = vmatprep.subr.mxu1 %v2199_v41  ;;  %2588 = vmatprep.subr.mxu0 %v2097_v27  ;;  %v2078_v41 = vld [vmem:[#allocation8 + $0xc78] sm:$0xff] }
 0x206   :  { %2662 = vmatpush1.msra.mxu1 %v2198_v45  ;;  %2589 = vmatpush1.msra.mxu0 %v2096_v17  ;;  %v2178_v27 = vld [vmem:[#allocation8 + $0xf98] sm:$0xff]  ;;  %v2076_v17 = vld [vmem:[#allocation8 + $0xc68] sm:$0xff] }
 0x207   :  { %2663 = vmatprep.subr.mxu1 %v2196_v46  ;;  %2590 = vmatprep.subr.mxu0 %v2094_v48  ;;  %v3901_v45 = vld [vmem:[#allocation7 + $0x8] sm:$0xf]  ;;  %v2177_v46 = vld [vmem:[#allocation8 + $0xf90] sm:$0xff] }
 0x208   :  { %2664 = vmatpush1.msra.mxu1 %v2195_v51  ;;  %2591 = vmatpush1.msra.mxu0 %v2093_v53  ;;  %v3907_v51 = vrot.slane %v3901_v45, %v3730_v52  ;;  %v2075_v53 = vld [vmem:[#allocation8 + $0xc60] sm:$0xff] }
 0x209   :  { %2665 = vmatprep.subr.mxu1 %v2193_v19  ;;  %2592 = vmatprep.subr.mxu0 %v2091_v60  ;;  %v2175_v19 = vld [vmem:[#allocation8 + $0xf80] sm:$0xff]  ;;  %v2073_v60 = vld [vmem:[#allocation8 + $0xc50] sm:$0xff] }
 0x20a   :  { %2666 = vmatpush1.msra.mxu1 %v2192_v59  ;;  %2593 = vmatpush1.msra.mxu0 %v2090_v57  ;;  %v2174_v59 = vld [vmem:[#allocation8 + $0xf78] sm:$0xff] }
 0x20b   :  { %2667 = vmatprep.subr.mxu1 %v2190_v32  ;;  %2594 = vmatprep.subr.mxu0 %v2088_v11  ;;  %v3909_v32 = vpop.f32.mrf.mxu1  ;;  %v2072_v11 = vld [vmem:[#allocation8 + $0xc48] sm:$0xff] }
 0x20c   :  { %2668 = vmatpush1.msra.mxu1 %v2189_v49  ;;  %2595 = vmatpush1.msra.mxu0 %v2087_v2  ;;  %v2172_v49 = vld [vmem:[#allocation8 + $0xf68] sm:$0xff]  ;;  %v2070_v2 = vld [vmem:[#allocation8 + $0xc38] sm:$0xff] }
 0x20d   :  { %2669 = vmatprep.subr.mxu1 %v2187_v9  ;;  %2596 = vmatprep.subr.mxu0 %v2085_v58  ;;  %v2171_v9 = vld [vmem:[#allocation8 + $0xf60] sm:$0xff] }
 0x20e   :  { %2670 = vmatpush1.msra.mxu1 %v2186_v5  ;;  %2597 = vmatpush1.msra.mxu0 %v2084_v56  ;;  %v2069_v5 = vld [vmem:[#allocation8 + $0xc30] sm:$0xff] }
 0x20f   :  { %2671 = vmatprep.subr.mxu1 %v2184_v4  ;;  %2598 = vmatprep.subr.mxu0 %v2082_v38  ;;  %v2169_v56 = vld [vmem:[#allocation8 + $0xf50] sm:$0xff]  ;;  %v2067_v4 = vld [vmem:[#allocation8 + $0xc20] sm:$0xff]  ;;  %v2168_v38 = vld [vmem:[#allocation8 + $0xf48] sm:$0xff] }
 0x210   :  { %2672 = vmatpush1.msra.mxu1 %v2183_v10  ;;  %2599 = vmatpush1.msra.mxu0 %v2081_v24  ;;  %v3903_v48 = vpop.f32.mrf.mxu0  ;;  %v1492_v10 = vpop.f32.mrf.mxu1  ;;  %v2066_v24 = vld [vmem:[#allocation8 + $0xc18] sm:$0xff] }
 0x211   :  { %2673 = vmatprep.subr.mxu1 %v2181_v0  ;;  %2600 = vmatprep.subr.mxu0 %v2079_v39  ;;  %v2166_v0 = vld [vmem:[#allocation8 + $0xf38] sm:$0xff]  ;;  %v2064_v39 = vld [vmem:[#allocation8 + $0xc08] sm:$0xff] }
 0x212   :  { %2674 = vmatpush1.msra.mxu1 %v2180_v6  ;;  %2601 = vmatpush1.msra.mxu0 %v2078_v41  ;;  %v1415_v57 = vpop.f32.mrf.mxu0  ;;  %v2165_v41 = vld [vmem:[#allocation8 + $0xf30] sm:$0xff] }
 0x213   :  { %2675 = vmatprep.subr.mxu1 %v2178_v27  ;;  %2602 = vmatprep.subr.mxu0 %v2076_v17  ;;  %v1416_v58 = vadd.f32 %v1415_v57, %v3907_v51  ;;  %v2063_v27 = vld [vmem:[#allocation8 + $0xc00] sm:$0xff]  ;;  %v2154_v57 = vld [vmem:[#allocation8 + $0xed8] sm:$0xff] }
 0x214   :  { %2676 = vmatpush1.msra.mxu1 %v2177_v46  ;;  %2603 = vmatpush1.msra.mxu0 %v2075_v53  ;;  %v2163_v17 = vld [vmem:[#allocation8 + $0xf20] sm:$0xff]  ;;  %v2157_v46 = vld [vmem:[#allocation8 + $0xef0] sm:$0xff]  ;;  %v2162_v53 = vld [vmem:[#allocation8 + $0xf18] sm:$0xff] }
 0x215   :  { %2677 = vmatprep.subr.mxu1 %v2175_v19  ;;  %2604 = vmatprep.subr.mxu0 %v2073_v60  ;;  %v3912_v6 = vadd.f32 %v1492_v10, %v1416_v58  ;;  %v2156_v19 = vld [vmem:[#allocation8 + $0xee8] sm:$0xff]  ;;  %v2150_v58 = vld [vmem:[#allocation8 + $0xeb8] sm:$0xff]  ;;  %v2249_v10 = vld [vmem:[#allocation8 + $0x11d0] sm:$0xff] }
 0x216   :  { %2678 = vmatpush1.msra.mxu1 %v2174_v59  ;;  %2605 = vmatpush1.msra.mxu0 %v2072_v11  ;;  %v2160_v60 = vld [vmem:[#allocation8 + $0xf08] sm:$0xff]  ;;  %v2159_v11 = vld [vmem:[#allocation8 + $0xf00] sm:$0xff] }
 0x217   :  { %2679 = vmatprep.subr.mxu1 %v2172_v49  ;;  %2606 = vmatprep.subr.mxu0 %v2070_v2  ;;  %v1664_v59 = vmax.f32 %v3912_v6, 0.0  ;;  %v2153_v49 = vld [vmem:[#allocation8 + $0xed0] sm:$0xff]  ;;  %v2151_v2 = vld [vmem:[#allocation8 + $0xec0] sm:$0xff]  ;;  %v2140_v6 = vld [vmem:[#allocation8 + $0xe68] sm:$0xff] }
 0x218   :  { %2680 = vmatpush1.msra.mxu1 %v2171_v9  ;;  %2607 = vmatpush1.msra.mxu0 %v2069_v5  ;;  %v2253_v9 = vld [vmem:[#allocation8 + $0x11f0] sm:$0xff]  ;;  %v2252_v5 = vld [vmem:[#allocation8 + $0x11e8] sm:$0xff] }
 0x219   :  { %2681 = vmatprep.subr.mxu1 %v2169_v56  ;;  %2608 = vmatprep.subr.mxu0 %v2067_v4  ;;  %v2148_v56 = vld [vmem:[#allocation8 + $0xea8] sm:$0xff]  ;;  %v2250_v4 = vld [vmem:[#allocation8 + $0x11d8] sm:$0xff] }
 0x21a   :  { %2682 = vmatpush1.msra.mxu1 %v2168_v38  ;;  %2609 = vmatpush1.msra.mxu0 %v2066_v24  ;;  %v2147_v38 = vld [vmem:[#allocation8 + $0xea0] sm:$0xff]  ;;  %v2145_v24 = vld [vmem:[#allocation8 + $0xe90] sm:$0xff] }
 0x21b   :  { %2683 = vmatprep.subr.mxu1 %v2166_v0  ;;  %2610 = vmatprep.subr.mxu0 %v2064_v39  ;;  %v2247_v0 = vld [vmem:[#allocation8 + $0x11c0] sm:$0xff]  ;;  %v2144_v39 = vld [vmem:[#allocation8 + $0xe88] sm:$0xff] }
 0x21c   :  { %2684 = vmatpush1.msra.mxu1 %v2165_v41  ;;  %2611 = vmatpush1.msra.mxu0 %v2063_v27  ;;  %v2246_v41 = vld [vmem:[#allocation8 + $0x11b8] sm:$0xff] }
 0x21d   :  { %2685 = vmatprep.subr.mxu1 %v2163_v17  ;;  %2612 = vmatprep.subr.mxu0 %v2157_v46  ;;  %v2142_v27 = vld [vmem:[#allocation8 + $0xe78] sm:$0xff]  ;;  %v2244_v17 = vld [vmem:[#allocation8 + $0x11a8] sm:$0xff]  ;;  %v2141_v46 = vld [vmem:[#allocation8 + $0xe70] sm:$0xff] }
 0x21e   :  { %2686 = vmatpush1.msra.mxu1 %v2162_v53  ;;  %2613 = vmatpush2.msra.mxu0 %v2156_v19  ;;  %v2243_v53 = vld [vmem:[#allocation8 + $0x11a0] sm:$0xff] }
 0x21f   :  { %2687 = vmatprep.subr.mxu1 %v2160_v60  ;;  %2614 = vmatprep.subr.mxu0 %v2154_v57  ;;  %v2139_v19 = vld [vmem:[#allocation8 + $0xe60] sm:$0xff]  ;;  %v2241_v60 = vld [vmem:[#allocation8 + $0x1190] sm:$0xff]  ;;  %v2138_v57 = vld [vmem:[#allocation8 + $0xe58] sm:$0xff] }
 0x220   :  { %2688 = vmatpush1.msra.mxu1 %v2159_v11  ;;  %2615 = vmatpush2.msra.mxu0 %v2153_v49  ;;  %v2240_v11 = vld [vmem:[#allocation8 + $0x1188] sm:$0xff] }
 0x221   :  { %2644 = vmatprep.mubr.f32.mxu0 %v1664_v59  ;;  %2616 = vmatprep.subr.mxu0 %v2151_v2  ;;  %v2136_v49 = vld [vmem:[#allocation8 + $0xe48] sm:$0xff]  ;;  %v2238_v2 = vld [vmem:[#allocation8 + $0x1178] sm:$0xff] }
 0x222   :  { %2689 = vmatprep.subr.mxu1 %v2253_v9  ;;  %2617 = vmatpush2.msra.mxu0 %v2150_v58  ;;  %v2135_v9 = vld [vmem:[#allocation8 + $0xe40] sm:$0xff]  ;;  %v2237_v58 = vld [vmem:[#allocation8 + $0x1170] sm:$0xff] }
 0x223   :  { %2690 = vmatpush2.msra.mxu1 %v2252_v5  ;;  %2618 = vmatprep.subr.mxu0 %v2148_v56  ;;  %v2133_v5 = vld [vmem:[#allocation8 + $0xe30] sm:$0xff]  ;;  %v2235_v56 = vld [vmem:[#allocation8 + $0x1160] sm:$0xff] }
 0x224   :  { %2691 = vmatprep.subr.mxu1 %v2250_v4  ;;  %2619 = vmatpush2.msra.mxu0 %v2147_v38  ;;  %v2132_v4 = vld [vmem:[#allocation8 + $0xe28] sm:$0xff]  ;;  %v2234_v38 = vld [vmem:[#allocation8 + $0x1158] sm:$0xff] }
 0x225   :  { %2692 = vmatpush2.msra.mxu1 %v2249_v10  ;;  %2620 = vmatprep.subr.mxu0 %v2145_v24  ;;  %v2130_v24 = vld [vmem:[#allocation8 + $0xe18] sm:$0xff] }
 0x226   :  { %2693 = vmatprep.subr.mxu1 %v2247_v0  ;;  %2621 = vmatpush2.msra.mxu0 %v2144_v39  ;;  %v2232_v0 = vld [vmem:[#allocation8 + $0x1148] sm:$0xff]  ;;  %v2129_v39 = vld [vmem:[#allocation8 + $0xe10] sm:$0xff] }
 0x227   :  { %2694 = vmatpush2.msra.mxu1 %v2246_v41  ;;  %2622 = vmatprep.subr.mxu0 %v2142_v27  ;;  %v2231_v41 = vld [vmem:[#allocation8 + $0x1140] sm:$0xff] }
 0x228   :  { %2695 = vmatprep.subr.mxu1 %v2244_v17  ;;  %2623 = vmatpush2.msra.mxu0 %v2141_v46  ;;  %v2127_v17 = vld [vmem:[#allocation8 + $0xe00] sm:$0xff]  ;;  %v2229_v46 = vld [vmem:[#allocation8 + $0x1130] sm:$0xff] }
 0x229   :  { %2696 = vmatpush2.msra.mxu1 %v2243_v53  ;;  %2624 = vmatprep.subr.mxu0 %v2139_v19  ;;  %v706_v53 = vrot.slane %v3901_v45, %v3710_v62  ;;  %v2126_v19 = vld [vmem:[#allocation8 + $0xdf8] sm:$0xff] }
 0x22a   :  { %2697 = vmatprep.subr.mxu1 %v2241_v60  ;;  %2625 = vmatpush2.msra.mxu0 %v2138_v57  ;;  %v1419_v10 = vpop.f32.mrf.mxu0  ;;  %v2228_v57 = vld [vmem:[#allocation8 + $0x1128] sm:$0xff] }
 0x22b   :  { %2698 = vmatpush2.msra.mxu1 %v2240_v11  ;;  %2626 = vmatprep.subr.mxu0 %v2136_v49  ;;  %v2124_v11 = vld [vmem:[#allocation8 + $0xde8] sm:$0xff]  ;;  %v2226_v49 = vld [vmem:[#allocation8 + $0x1118] sm:$0xff] }
 0x22c   :  { %2699 = vmatprep.subr.mxu1 %v2238_v2  ;;  %2627 = vmatpush2.msra.mxu0 %v2135_v9  ;;  %v3917_v27 = vpop.f32.mrf.mxu1  ;;  %v1421_v60 = vpop.f32.mrf.mxu0  ;;  %v2123_v2 = vld [vmem:[#allocation8 + $0xde0] sm:$0xff] }
 0x22d   :  { %2700 = vmatpush2.msra.mxu1 %v2237_v58  ;;  %2628 = vmatprep.subr.mxu0 %v2133_v5  ;;  %v2225_v58 = vld [vmem:[#allocation8 + $0x1110] sm:$0xff] }
 0x22e   :  { %2701 = vmatprep.subr.mxu1 %v2235_v56  ;;  %2629 = vmatpush2.msra.mxu0 %v2132_v4  ;;  %v1498_v9 = vpop.f32.mrf.mxu1  ;;  %v2121_v5 = vld [vmem:[#allocation8 + $0xdd0] sm:$0xff]  ;;  %v1422_v56 = vadd.f32 %v1421_v60, %v3907_v51  ;;  %v2223_v4 = vld [vmem:[#allocation8 + $0x1100] sm:$0xff]  ;;  %v718_v51 = vrot.slane %v3901_v45, %v685_v8 }
 0x22f   :  { %2702 = vmatpush2.msra.mxu1 %v2234_v38  ;;  %2630 = vmatprep.subr.mxu0 %v2130_v24  ;;  %v1414_v38 = vadd.f32 %v3903_v48, %v706_v53  ;;  %v2120_v24 = vld [vmem:[#allocation8 + $0xdc8] sm:$0xff]  ;;  %v2115_v60 = vld [vmem:[#allocation8 + $0xda0] sm:$0xff] }
 0x230   :  { %2703 = vmatprep.subr.mxu1 %v2232_v0  ;;  %2631 = vmatpush2.msra.mxu0 %v2129_v39  ;;  %v2222_v0 = vld [vmem:[#allocation8 + $0x10f8] sm:$0xff]  ;;  %v3926_v48 = vadd.f32 %v1498_v9, %v1422_v56  ;;  %v2111_v8 = vld [vmem:[#allocation8 + $0xd80] sm:$0xff]  ;;  %v714_v9 = vrot.slane %v3901_v45, %v3775_v36 }
 0x231   :  { %2704 = vmatpush2.msra.mxu1 %v2231_v41  ;;  %2632 = vmatprep.subr.mxu0 %v2127_v17  ;;  %v2118_v41 = vld [vmem:[#allocation8 + $0xdb8] sm:$0xff]  ;;  %v2220_v17 = vld [vmem:[#allocation8 + $0x10e8] sm:$0xff]  ;;  %v1771_v45 = vld [vmem:[#allocation8 + $0x2e0] sm:$0xff] }
 0x232   :  { %2705 = vmatprep.subr.mxu1 %v2229_v46  ;;  %2633 = vmatpush2.msra.mxu0 %v2126_v19  ;;  %v2117_v46 = vld [vmem:[#allocation8 + $0xdb0] sm:$0xff] }
 0x233   :  { %2706 = vmatpush2.msra.mxu1 %v2228_v57  ;;  %2634 = vmatprep.subr.mxu0 %v2124_v11  ;;  %v2217_v57 = vld [vmem:[#allocation8 + $0x10d0] sm:$0xff] }
 0x234   :  { %2707 = vmatprep.subr.mxu1 %v2226_v49  ;;  %v1567_v39 = vpop.f32.mrf.mxu1  ;;  %2635 = vmatpush2.msra.mxu0 %v2123_v2  ;;  %v1644_v19 = vpop.f32.mrf.mxu0  ;;  %v3929_v49 = vadd.f32 %v3909_v32, %v1414_v38  ;;  %v1420_v2 = vadd.f32 %v1419_v10, %v706_v53  ;;  %v1676_v32 = vmax.f32 %v3926_v48, 0.0  ;;  %v1774_v10 = vld [vmem:[#allocation8 + $0x2f8] sm:$0xff] }
 0x235   :  { %2708 = vmatpush2.msra.mxu1 %v2225_v58  ;;  %2636 = vmatprep.subr.mxu0 %v2121_v5  ;;  %v2114_v58 = vld [vmem:[#allocation8 + $0xd98] sm:$0xff]  ;;  %v2216_v5 = vld [vmem:[#allocation8 + $0x10c8] sm:$0xff] }
 0x236   :  { %2709 = vmatprep.subr.mxu1 %v2223_v4  ;;  %2637 = vmatpush2.msra.mxu0 %v2120_v24  ;;  %v1569_v11 = vpop.f32.mrf.mxu1  ;;  %v2112_v4 = vld [vmem:[#allocation8 + $0xd88] sm:$0xff]  ;;  %v1646_v24 = vpop.f32.mrf.mxu0  ;;  %v1663_v38 = vmax.f32 %v3929_v49, 0.0 }
 0x237   :  { %2710 = vmatpush2.msra.mxu1 %v2222_v0  ;;  %2638 = vmatprep.subr.mxu0 %v2118_v41  ;;  %v1570_v56 = vadd.f32 %v1569_v11, %v718_v51  ;;  %v2213_v0 = vld [vmem:[#allocation8 + $0x10b0] sm:$0xff]  ;;  %v1726_v41 = vld [vmem:[#allocation8 + $0x178] sm:$0xff] }
 0x238   :  { %2711 = vmatprep.subr.mxu1 %v2220_v17  ;;  %2639 = vmatpush2.msra.mxu0 %v2117_v46  ;;  %v2211_v46 = vld [vmem:[#allocation8 + $0x10a0] sm:$0xff] }
 0x239   :  { %2712 = vmatpush2.msra.mxu1 %v2219_v29  ;;  %2640 = vmatprep.subr.mxu0 %v2115_v60  ;;  %v3936_v29 = vadd.f32 %v3917_v27, %v1420_v2  ;;  %v3940_v11 = vadd.f32 %v1646_v24, %v1570_v56  ;;  %v1768_v27 = vld [vmem:[#allocation8 + $0x2c8] sm:$0xff] }
 0x23a   :  { %2713 = vmatprep.subr.mxu1 %v2217_v57  ;;  %2641 = vmatpush2.msra.mxu0 %v2114_v58  ;;  %v1573_v53 = vpop.f32.mrf.mxu1  ;;  %v1650_v17 = vpop.f32.mrf.mxu0  ;;  %v1568_v57 = vadd.f32 %v1567_v39, %v714_v9  ;;  %v1723_v58 = vld [vmem:[#allocation8 + $0x160] sm:$0xff]  ;;  %v2208_v56 = vld [vmem:[#allocation8 + $0x1088] sm:$0xff] }
 0x23b   :  { %2714 = vmatpush2.msra.mxu1 %v2216_v5  ;;  %2642 = vmatprep.subr.mxu0 %v2112_v4  ;;  %v2210_v5 = vld [vmem:[#allocation8 + $0x1098] sm:$0xff]  ;;  %v1675_v4 = vmax.f32 %v3936_v29, 0.0 }
 0x23c   :  { %2715 = vmatprep.subr.mxu1 %v2214_v50  ;;  %2643 = vmatpush2.msra.mxu0 %v2111_v8  ;;  %v1575_v60 = vpop.f32.mrf.mxu1  ;;  %v1720_v50 = vld [vmem:[#allocation8 + $0x148] sm:$0xff]  ;;  %v1652_v39 = vpop.f32.mrf.mxu0  ;;  %v1574_v8 = vadd.f32 %v1573_v53, %v714_v9  ;;  %v3945_v24 = vadd.f32 %v1644_v19, %v1568_v57  ;;  %v1762_v9 = vld [vmem:[#allocation8 + $0x298] sm:$0xff] }
 0x23d   :  { %2716 = vmatpush2.msra.mxu1 %v2213_v0  ;;  %2645 = vmatmul.mubr.f32.vlgmr.msra.gmra.mxu0 %v1663_v38  ;;  %v1576_v2 = vadd.f32 %v1575_v60, %v718_v51  ;;  %v1765_v0 = vld [vmem:[#allocation8 + $0x2b0] sm:$0xff]  ;;  %v1714_v53 = vld [vmem:[#allocation8 + $0x118] sm:$0xff]  ;;  %v1759_v60 = vld [vmem:[#allocation8 + $0x280] sm:$0xff] }
 0x23e   :  { %3209 = vmatprep.subr.mxu0 %v1774_v10  ;;  %2650 = vmatprep.mubr.f32.mxu0 %v1676_v32  ;;  %v1666_v10 = vmax.f32 %v3940_v11, 0.0  ;;  %v1717_v51 = vld [vmem:[#allocation8 + $0x130] sm:$0xff]  ;;  %v1870_v19 = vld [vmem:[#allocation8 + $0x5f8] sm:$0xff]  ;;  %v1665_v57 = vmax.f32 %v3945_v24, 0.0 }
 0x23f   :  { %3210 = vmatpush3.msra.mxu0 %v1726_v41  ;;  %2717 = vmatprep.subr.mxu1 %v2211_v46  ;;  %v2207_v41 = vld [vmem:[#allocation8 + $0x1080] sm:$0xff]  ;;  %v3954_v46 = vadd.f32 %v1650_v17, %v1574_v8  ;;  %v1753_v8 = vld [vmem:[#allocation8 + $0x250] sm:$0xff] }
 0x240   :  { %3211 = vmatprep.subr.mxu0 %v1771_v45  ;;  %2718 = vmatpush2.msra.mxu1 %v2210_v5  ;;  %v3952_v45 = vadd.f32 %v1652_v39, %v1576_v2  ;;  %v1867_v5 = vld [vmem:[#allocation8 + $0x5e0] sm:$0xff]  ;;  %v1864_v39 = vld [vmem:[#allocation8 + $0x5c8] sm:$0xff]  ;;  %v2125_v11 = vld [vmem:[#allocation8 + $0xdf0] sm:$0xff] }
 0x241   :  { %3212 = vmatpush3.msra.mxu0 %v1723_v58  ;;  %2719 = vmatprep.subr.mxu1 %v2208_v56  ;;  %v1819_v17 = vld [vmem:[#allocation8 + $0x460] sm:$0xff]  ;;  %v1677_v2 = vmax.f32 %v3954_v46, 0.0  ;;  %v1705_v56 = vld [vmem:[#allocation8 + $0xd0] sm:$0xff] }
 0x242   :  { %2651 = vmatmul.mubr.f32.gmra.mxu0 %v1675_v4  ;;  %3213 = vmatprep.subr.mxu0 %v1768_v27  ;;  %v1678_v58 = vmax.f32 %v3952_v45, 0.0  ;;  %v1756_v27 = vld [vmem:[#allocation8 + $0x268] sm:$0xff] }
 0x243   :  { %3214 = vmatpush3.msra.mxu0 %v1720_v50  ;;  %2798 = vmatprep.mubr.f32.mxu0 %v1656_v37  ;;  %v1711_v37 = vld [vmem:[#allocation8 + $0x100] sm:$0xff]  ;;  %v1708_v50 = vld [vmem:[#allocation8 + $0xe8] sm:$0xff] }
 0x244   :  { %3215 = vmatprep.subr.mxu0 %v1765_v0  ;;  %2720 = vmatpush2.msra.mxu1 %v2207_v41  ;;  %v1816_v0 = vld [vmem:[#allocation8 + $0x448] sm:$0xff]  ;;  %v1750_v41 = vld [vmem:[#allocation8 + $0x238] sm:$0xff] }
 0x245   :  { %3216 = vmatpush3.msra.mxu0 %v1717_v51  ;;  %2721 = vmatprep.mubr.f32.mxu1 %v1666_v10  ;;  %v1861_v51 = vld [vmem:[#allocation8 + $0x5b0] sm:$0xff] }
 0x246   :  { %3217 = vmatprep.subr.mxu0 %v1762_v9  ;;  %3247 = vmatprep.subr.mxu1 %v1870_v19  ;;  %v1813_v9 = vld [vmem:[#allocation8 + $0x430] sm:$0xff]  ;;  %v1858_v19 = vld [vmem:[#allocation8 + $0x598] sm:$0xff] }
 0x247   :  { %3218 = vmatpush3.msra.mxu0 %v1714_v53  ;;  %2722 = vmatmul.mubr.f32.vlgmr.msra.gmra.mxu1 %v1665_v57  ;;  %v1702_v53 = vld [vmem:[#allocation8 + $0xb8] sm:$0xff] }
 0x248   :  { %3219 = vmatprep.subr.mxu0 %v1759_v60  ;;  %3248 = vmatpush3.msra.mxu1 %v1822_v30  ;;  %v1747_v60 = vld [vmem:[#allocation8 + $0x220] sm:$0xff]  ;;  %v1810_v30 = vld [vmem:[#allocation8 + $0x418] sm:$0xff] }
 0x249   :  { %3220 = vmatpush3.msra.mxu0 %v1711_v37  ;;  %3249 = vmatprep.subr.mxu1 %v1867_v5  ;;  %v1699_v37 = vld [vmem:[#allocation8 + $0xa0] sm:$0xff] }
 0x24a   :  { %3221 = vmatprep.subr.mxu0 %v1756_v27  ;;  %3250 = vmatpush3.msra.mxu1 %v1819_v17  ;;  %v1855_v5 = vld [vmem:[#allocation8 + $0x580] sm:$0xff]  ;;  %v1744_v27 = vld [vmem:[#allocation8 + $0x208] sm:$0xff] }
 0x24b   :  { %2727 = vmatprep.mubr.f32.mxu1 %v1678_v58  ;;  %3222 = vmatpush3.msra.mxu0 %v1708_v50  ;;  %v1807_v17 = vld [vmem:[#allocation8 + $0x400] sm:$0xff]  ;;  %v1696_v50 = vld [vmem:[#allocation8 + $0x88] sm:$0xff] }
 0x24c   :  { %3251 = vmatprep.subr.mxu1 %v1864_v39  ;;  %2728 = vmatmul.mubr.f32.gmra.mxu1 %v1677_v2  ;;  %v1852_v39 = vld [vmem:[#allocation8 + $0x568] sm:$0xff] }
 0x24d   :  { %3223 = vmatprep.subr.mxu0 %v1753_v8  ;;  %3252 = vmatpush3.msra.mxu1 %v1816_v0  ;;  %v1741_v8 = vld [vmem:[#allocation8 + $0x1f0] sm:$0xff]  ;;  %v1804_v0 = vld [vmem:[#allocation8 + $0x3e8] sm:$0xff] }
 0x24e   :  { %3224 = vmatpush3.msra.mxu0 %v1705_v56  ;;  %3253 = vmatprep.subr.mxu1 %v1861_v51  ;;  %v1738_v56 = vld [vmem:[#allocation8 + $0x1d8] sm:$0xff]  ;;  %v1801_v51 = vld [vmem:[#allocation8 + $0x3d0] sm:$0xff] }
 0x24f   :  { %2873 = vmatprep.mubr.f32.mxu1 %v1658_v33  ;;  %3225 = vmatprep.subr.mxu0 %v1750_v41  ;;  %v1849_v33 = vld [vmem:[#allocation8 + $0x550] sm:$0xff]  ;;  %v1690_v41 = vld [vmem:[#allocation8 + $0x58] sm:$0xff] }
 0x250   :  { %3254 = vmatpush3.msra.mxu1 %v1813_v9  ;;  %3226 = vmatpush3.msra.mxu0 %v1702_v53  ;;  %v1846_v9 = vld [vmem:[#allocation8 + $0x538] sm:$0xff]  ;;  %v1735_v53 = vld [vmem:[#allocation8 + $0x1c0] sm:$0xff] }
 0x251   :  { %3255 = vmatprep.subr.mxu1 %v1858_v19  ;;  %3227 = vmatprep.subr.mxu0 %v1747_v60  ;;  %v1798_v19 = vld [vmem:[#allocation8 + $0x3b8] sm:$0xff]  ;;  %v1687_v60 = vld [vmem:[#allocation8 + $0x40] sm:$0xff] }
 0x252   :  { %3256 = vmatpush3.msra.mxu1 %v1810_v30  ;;  %3228 = vmatpush3.msra.mxu0 %v1699_v37  ;;  %v1843_v30 = vld [vmem:[#allocation8 + $0x520] sm:$0xff]  ;;  %v1732_v37 = vld [vmem:[#allocation8 + $0x1a8] sm:$0xff] }
 0x253   :  { %3257 = vmatprep.subr.mxu1 %v1855_v5  ;;  %3229 = vmatprep.subr.mxu0 %v1744_v27  ;;  %v1795_v5 = vld [vmem:[#allocation8 + $0x3a0] sm:$0xff]  ;;  %v1684_v27 = vld [vmem:[#allocation8 + $0x28] sm:$0xff] }
 0x254   :  { %3258 = vmatpush3.msra.mxu1 %v1807_v17  ;;  %3230 = vmatpush3.msra.mxu0 %v1696_v50  ;;  %v1840_v17 = vld [vmem:[#allocation8 + $0x508] sm:$0xff]  ;;  %v1729_v50 = vld [vmem:[#allocation8 + $0x190] sm:$0xff] }
 0x255   :  { %3259 = vmatprep.subr.mxu1 %v1852_v39  ;;  %3231 = vmatprep.subr.mxu0 %v1741_v8  ;;  %v1792_v39 = vld [vmem:[#allocation8 + $0x388] sm:$0xff]  ;;  %v1681_v8 = vld [vmem:[#allocation8 + $0x10] sm:$0xff] }
 0x256   :  { %3260 = vmatpush3.msra.mxu1 %v1804_v0  ;;  %3232 = vmatpush3.msra.mxu0 %v1693_v3  ;;  %v1837_v0 = vld [vmem:[#allocation8 + $0x4f0] sm:$0xff] }
 0x257   :  { %3261 = vmatprep.subr.mxu1 %v1849_v33  ;;  %3233 = vmatprep.subr.mxu0 %v1738_v56  ;;  %v1789_v3 = vld [vmem:[#allocation8 + $0x370] sm:$0xff]  ;;  %v1966_v33 = vld [vmem:[#allocation8 + $0x8f8] sm:$0xff] }
 0x258   :  { %3262 = vmatpush3.msra.mxu1 %v1801_v51  ;;  %3234 = vmatpush3.msra.mxu0 %v1690_v41  ;;  %v1834_v56 = vld [vmem:[#allocation8 + $0x4d8] sm:$0xff] }
 0x259   :  { %3263 = vmatprep.subr.mxu1 %v1846_v9  ;;  %3235 = vmatprep.subr.mxu0 %v1735_v53  ;;  %v1918_v51 = vld [vmem:[#allocation8 + $0x778] sm:$0xff]  ;;  %v1963_v9 = vld [vmem:[#allocation8 + $0x8e0] sm:$0xff] }
 0x25a   :  { %3264 = vmatpush3.msra.mxu1 %v1798_v19  ;;  %3236 = vmatpush3.msra.mxu0 %v1687_v60  ;;  %v1786_v41 = vld [vmem:[#allocation8 + $0x358] sm:$0xff]  ;;  %v1831_v53 = vld [vmem:[#allocation8 + $0x4c0] sm:$0xff] }
 0x25b   :  { %3265 = vmatprep.subr.mxu1 %v1843_v30  ;;  %3237 = vmatprep.subr.mxu0 %v1732_v37  ;;  %v1915_v19 = vld [vmem:[#allocation8 + $0x760] sm:$0xff]  ;;  %v1960_v30 = vld [vmem:[#allocation8 + $0x8c8] sm:$0xff] }
 0x25c   :  { %3266 = vmatpush3.msra.mxu1 %v1795_v5  ;;  %3238 = vmatpush3.msra.mxu0 %v1684_v27  ;;  %v1783_v60 = vld [vmem:[#allocation8 + $0x340] sm:$0xff]  ;;  %v1828_v37 = vld [vmem:[#allocation8 + $0x4a8] sm:$0xff]  ;;  %v1957_v5 = vld [vmem:[#allocation8 + $0x8b0] sm:$0xff] }
 0x25d   :  { %3267 = vmatprep.subr.mxu1 %v1840_v17  ;;  %3239 = vmatprep.subr.mxu0 %v1729_v50  ;;  %v1777_v27 = vld [vmem:[#allocation8 + $0x310] sm:$0xff]  ;;  %v1954_v17 = vld [vmem:[#allocation8 + $0x898] sm:$0xff] }
 0x25e   :  { %3268 = vmatpush3.msra.mxu1 %v1792_v39  ;;  %3240 = vmatpush3.msra.mxu0 %v1681_v8  ;;  %v1906_v50 = vld [vmem:[#allocation8 + $0x718] sm:$0xff]  ;;  %v1903_v8 = vld [vmem:[#allocation8 + $0x700] sm:$0xff] }
 0x25f   :  { %3269 = vmatprep.subr.mxu1 %v1837_v0  ;;  %2799 = vmatmul.mubr.f32.vlgmr.msra.gmra.mxu0 %v1655_v28  ;;  %v1780_v28 = vld [vmem:[#allocation8 + $0x328] sm:$0xff]  ;;  %v2014_v39 = vld [vmem:[#allocation8 + $0xa78] sm:$0xff]  ;;  %v2059_v0 = vld [vmem:[#allocation8 + $0xbe0] sm:$0xff] }
 0x260   :  { %3270 = vmatpush3.msra.mxu1 %v1789_v3  ;;  %3285 = vmatprep.subr.mxu0 %v1966_v33  ;;  %v1900_v3 = vld [vmem:[#allocation8 + $0x6e8] sm:$0xff] }
 0x261   :  { %2803 = vmatprep.mubr.f32.mxu0 %v1668_v63  ;;  %3271 = vmatprep.subr.mxu1 %v1834_v56  ;;  %v1909_v63 = vld [vmem:[#allocation8 + $0x730] sm:$0xff]  ;;  %v2056_v33 = vld [vmem:[#allocation8 + $0xbc8] sm:$0xff] }
 0x262   :  { %3286 = vmatpush3.msra.mxu0 %v1918_v51  ;;  %3272 = vmatpush3.msra.mxu1 %v1786_v41  ;;  %v1945_v56 = vld [vmem:[#allocation8 + $0x850] sm:$0xff]  ;;  %v1894_v41 = vld [vmem:[#allocation8 + $0x6b8] sm:$0xff] }
 0x263   :  { %3287 = vmatprep.subr.mxu0 %v1963_v9  ;;  %3273 = vmatprep.subr.mxu1 %v1831_v53  ;;  %v2053_v51 = vld [vmem:[#allocation8 + $0xbb0] sm:$0xff]  ;;  %v2050_v9 = vld [vmem:[#allocation8 + $0xb98] sm:$0xff]  ;;  %v1939_v53 = vld [vmem:[#allocation8 + $0x820] sm:$0xff] }
 0x264   :  { %3288 = vmatpush3.msra.mxu0 %v1915_v19  ;;  %3274 = vmatpush3.msra.mxu1 %v1783_v60  ;;  %v2002_v19 = vld [vmem:[#allocation8 + $0xa18] sm:$0xff]  ;;  %v1936_v60 = vld [vmem:[#allocation8 + $0x808] sm:$0xff] }
 0x265   :  { %2804 = vmatmul.mubr.f32.gmra.mxu0 %v1667_v40  ;;  %3289 = vmatprep.subr.mxu0 %v1960_v30  ;;  %v1951_v40 = vld [vmem:[#allocation8 + $0x880] sm:$0xff] }
 0x266   :  { %3275 = vmatprep.subr.mxu1 %v1828_v37  ;;  %3290 = vmatpush3.msra.mxu0 %v1912_v13  ;;  %v1999_v30 = vld [vmem:[#allocation8 + $0xa00] sm:$0xff]  ;;  %v1888_v37 = vld [vmem:[#allocation8 + $0x688] sm:$0xff] }
 0x267   :  { %2948 = vmatprep.mubr.f32.mxu0 %v1660_v54  ;;  %3276 = vmatpush3.msra.mxu1 %v1780_v28  ;;  %v2011_v54 = vld [vmem:[#allocation8 + $0xa60] sm:$0xff]  ;;  %v2044_v13 = vld [vmem:[#allocation8 + $0xb68] sm:$0xff]  ;;  %v1885_v28 = vld [vmem:[#allocation8 + $0x670] sm:$0xff] }
 0x268   :  { %3291 = vmatprep.subr.mxu0 %v1957_v5  ;;  %3277 = vmatprep.subr.mxu1 %v1825_v22  ;;  %v2041_v5 = vld [vmem:[#allocation8 + $0xb50] sm:$0xff]  ;;  %v1930_v22 = vld [vmem:[#allocation8 + $0x7d8] sm:$0xff] }
 0x269   :  { %3292 = vmatpush3.msra.mxu0 %v1909_v63  ;;  %3278 = vmatpush3.msra.mxu1 %v1777_v27  ;;  %v1993_v63 = vld [vmem:[#allocation8 + $0x9d0] sm:$0xff]  ;;  %v1882_v27 = vld [vmem:[#allocation8 + $0x658] sm:$0xff] }
 0x26a   :  { %3293 = vmatprep.subr.mxu0 %v1954_v17  ;;  %2874 = vmatmul.mubr.f32.vlgmr.msra.gmra.mxu1 %v1657_v12  ;;  %v1897_v12 = vld [vmem:[#allocation8 + $0x6d0] sm:$0xff]  ;;  %v2038_v17 = vld [vmem:[#allocation8 + $0xb38] sm:$0xff] }
 0x26b   :  { %3294 = vmatpush3.msra.mxu0 %v1906_v50  ;;  %3323 = vmatprep.subr.mxu1 %v2062_v34  ;;  %v1927_v50 = vld [vmem:[#allocation8 + $0x7c0] sm:$0xff]  ;;  %v1990_v34 = vld [vmem:[#allocation8 + $0x9b8] sm:$0xff] }
 0x26c   :  { %2878 = vmatprep.mubr.f32.mxu1 %v1670_v21  ;;  %3295 = vmatprep.subr.mxu0 %v1951_v40  ;;  %v2005_v21 = vld [vmem:[#allocation8 + $0xa30] sm:$0xff]  ;;  %v1879_v40 = vld [vmem:[#allocation8 + $0x640] sm:$0xff] }
 0x26d   :  { %3324 = vmatpush3.msra.mxu1 %v2014_v39  ;;  %3296 = vmatpush3.msra.mxu0 %v1903_v8  ;;  %v2035_v39 = vld [vmem:[#allocation8 + $0xb20] sm:$0xff]  ;;  %v1924_v8 = vld [vmem:[#allocation8 + $0x7a8] sm:$0xff] }
 0x26e   :  { %3325 = vmatprep.subr.mxu1 %v2059_v0  ;;  %3297 = vmatprep.subr.mxu0 %v1948_v43  ;;  %v1987_v0 = vld [vmem:[#allocation8 + $0x9a0] sm:$0xff]  ;;  %v1876_v43 = vld [vmem:[#allocation8 + $0x628] sm:$0xff] }
 0x26f   :  { %3326 = vmatpush3.msra.mxu1 %v2011_v54  ;;  %3298 = vmatpush3.msra.mxu0 %v1900_v3  ;;  %v2032_v54 = vld [vmem:[#allocation8 + $0xb08] sm:$0xff]  ;;  %v1921_v3 = vld [vmem:[#allocation8 + $0x790] sm:$0xff] }
 0x270   :  { %2879 = vmatmul.mubr.f32.gmra.mxu1 %v1669_v42  ;;  %3327 = vmatprep.subr.mxu1 %v2056_v33  ;;  %v2047_v42 = vld [vmem:[#allocation8 + $0xb80] sm:$0xff]  ;;  %v1984_v33 = vld [vmem:[#allocation8 + $0x988] sm:$0xff] }
 0x271   :  { %3299 = vmatprep.subr.mxu0 %v1945_v56  ;;  %3328 = vmatpush3.msra.mxu1 %v2008_v18  ;;  %v1873_v56 = vld [vmem:[#allocation8 + $0x610] sm:$0xff] }
 0x272   :  { %3023 = vmatprep.mubr.f32.mxu1 %v1662_v15  ;;  %3300 = vmatpush3.msra.mxu0 %v1897_v12  ;;  %v1996_v15 = vld [vmem:[#allocation8 + $0x9e8] sm:$0xff]  ;;  %v2029_v18 = vld [vmem:[#allocation8 + $0xaf0] sm:$0xff] }
 0x273   :  { %3329 = vmatprep.subr.mxu1 %v2053_v51  ;;  %3301 = vmatprep.subr.mxu0 %v1942_v26  ;;  %v1981_v12 = vld [vmem:[#allocation8 + $0x970] sm:$0xff]  ;;  %v2158_v51 = vld [vmem:[#allocation8 + $0xef8] sm:$0xff] }
 0x274   :  { %3330 = vmatpush3.msra.mxu1 %v2005_v21  ;;  %3302 = vmatpush3.msra.mxu0 %v1894_v41  ;;  %v2026_v26 = vld [vmem:[#allocation8 + $0xad8] sm:$0xff] }
 0x275   :  { %3331 = vmatprep.subr.mxu1 %v2050_v9  ;;  %3303 = vmatprep.subr.mxu0 %v1939_v53  ;;  %v2110_v21 = vld [vmem:[#allocation8 + $0xd78] sm:$0xff]  ;;  %v2155_v9 = vld [vmem:[#allocation8 + $0xee0] sm:$0xff] }
 0x276   :  { %3332 = vmatpush3.msra.mxu1 %v2002_v19  ;;  %3304 = vmatpush3.msra.mxu0 %v1891_v35  ;;  %v1978_v41 = vld [vmem:[#allocation8 + $0x958] sm:$0xff]  ;;  %v2023_v53 = vld [vmem:[#allocation8 + $0xac0] sm:$0xff] }
 0x277   :  { %3333 = vmatprep.subr.mxu1 %v2047_v42  ;;  %3305 = vmatprep.subr.mxu0 %v1936_v60  ;;  %v2107_v19 = vld [vmem:[#allocation8 + $0xd60] sm:$0xff]  ;;  %v2152_v42 = vld [vmem:[#allocation8 + $0xec8] sm:$0xff] }
 0x278   :  { %3334 = vmatpush3.msra.mxu1 %v1999_v30  ;;  %3306 = vmatpush3.msra.mxu0 %v1888_v37  ;;  %v1975_v35 = vld [vmem:[#allocation8 + $0x940] sm:$0xff]  ;;  %v2020_v60 = vld [vmem:[#allocation8 + $0xaa8] sm:$0xff]  ;;  %v2149_v30 = vld [vmem:[#allocation8 + $0xeb0] sm:$0xff]  ;;  %v2338_v48 = vpop.f32.mrf.mxu0 }
 0x279   :  { %3335 = vmatprep.subr.mxu1 %v2044_v13  ;;  %3307 = vmatprep.subr.mxu0 %v1933_v47  ;;  %v1969_v37 = vld [vmem:[#allocation8 + $0x910] sm:$0xff]  ;;  %v2146_v13 = vld [vmem:[#allocation8 + $0xe98] sm:$0xff] }
 0x27a   :  { %3336 = vmatpush3.msra.mxu1 %v1996_v15  ;;  %3308 = vmatpush3.msra.mxu0 %v1885_v28  ;;  %v2098_v47 = vld [vmem:[#allocation8 + $0xd18] sm:$0xff]  ;;  %v2095_v28 = vld [vmem:[#allocation8 + $0xd00] sm:$0xff]  ;;  %v2340_v49 = vpop.f32.mrf.mxu0 }
 0x27b   :  { %3337 = vmatprep.subr.mxu1 %v2041_v5  ;;  %3309 = vmatprep.subr.mxu0 %v1930_v22  ;;  %v2206_v15 = vld [vmem:[#allocation8 + $0x1078] sm:$0xff]  ;;  %v2251_v5 = vld [vmem:[#allocation8 + $0x11e0] sm:$0xff]  ;;  %v2092_v22 = vld [vmem:[#allocation8 + $0xce8] sm:$0xff] }
 0x27c   :  { %3338 = vmatpush3.msra.mxu1 %v1993_v63  ;;  %3310 = vmatpush3.msra.mxu0 %v1882_v27  ;;  %v2248_v63 = vld [vmem:[#allocation8 + $0x11c8] sm:$0xff]  ;;  %v2137_v27 = vld [vmem:[#allocation8 + $0xe50] sm:$0xff] }
 0x27d   :  { %3339 = vmatprep.subr.mxu1 %v2038_v17  ;;  %3311 = vmatprep.subr.mxu0 %v1927_v50  ;;  %v2089_v17 = vld [vmem:[#allocation8 + $0xcd0] sm:$0xff] }
 0x27e   :  { %3340 = vmatpush3.msra.mxu1 %v1990_v34  ;;  %3312 = vmatpush3.msra.mxu0 %v1879_v40  ;;  %v2245_v50 = vld [vmem:[#allocation8 + $0x11b0] sm:$0xff]  ;;  %v2086_v34 = vld [vmem:[#allocation8 + $0xcb8] sm:$0xff] }
 0x27f   :  { %3341 = vmatprep.subr.mxu1 %v2035_v39  ;;  %3313 = vmatprep.subr.mxu0 %v1924_v8  ;;  %v2242_v40 = vld [vmem:[#allocation8 + $0x1198] sm:$0xff]  ;;  %v2131_v39 = vld [vmem:[#allocation8 + $0xe20] sm:$0xff] }
 0x280   :  { %3342 = vmatpush3.msra.mxu1 %v1987_v0  ;;  %3314 = vmatpush3.msra.mxu0 %v1876_v43  ;;  %v2194_v8 = vld [vmem:[#allocation8 + $0x1018] sm:$0xff]  ;;  %v2239_v0 = vld [vmem:[#allocation8 + $0x1180] sm:$0xff]  ;;  %v2128_v43 = vld [vmem:[#allocation8 + $0xe08] sm:$0xff] }
 0x281   :  { %3343 = vmatprep.subr.mxu1 %v2032_v54  ;;  %3315 = vmatprep.subr.mxu0 %v1921_v3  ;;  %v2191_v54 = vld [vmem:[#allocation8 + $0x1000] sm:$0xff]  ;;  %v2080_v3 = vld [vmem:[#allocation8 + $0xc88] sm:$0xff] }
 0x282   :  { %3344 = vmatpush3.msra.mxu1 %v1984_v33  ;;  %3316 = vmatpush3.msra.mxu0 %v1873_v56  ;;  %v2236_v33 = vld [vmem:[#allocation8 + $0x1168] sm:$0xff]  ;;  %v2077_v56 = vld [vmem:[#allocation8 + $0xc70] sm:$0xff] }
 0x283   :  { %3345 = vmatprep.subr.mxu1 %v2029_v18  ;;  %2949 = vmatmul.mubr.f32.vlgmr.msra.gmra.mxu0 %v1659_v25  ;;  %v1972_v25 = vld [vmem:[#allocation8 + $0x928] sm:$0xff]  ;;  %v2233_v18 = vld [vmem:[#allocation8 + $0x1150] sm:$0xff] }
 0x284   :  { %3346 = vmatpush3.msra.mxu1 %v1981_v12  ;;  %3361 = vmatprep.subr.mxu0 %v2158_v51  ;;  %v2122_v12 = vld [vmem:[#allocation8 + $0xdd8] sm:$0xff]  ;;  %v2185_v51 = vld [vmem:[#allocation8 + $0xfd0] sm:$0xff] }
 0x285   :  { %2953 = vmatprep.mubr.f32.mxu0 %v1672_v55  ;;  %3347 = vmatprep.subr.mxu1 %v2026_v26  ;;  %v2101_v55 = vld [vmem:[#allocation8 + $0xd30] sm:$0xff]  ;;  %v2074_v26 = vld [vmem:[#allocation8 + $0xc58] sm:$0xff] }
 0x286   :  { %3362 = vmatpush3.msra.mxu0 %v2110_v21  ;;  %3348 = vmatpush3.msra.mxu1 %v1978_v41  ;;  %v2230_v21 = vld [vmem:[#allocation8 + $0x1138] sm:$0xff]  ;;  %v2119_v41 = vld [vmem:[#allocation8 + $0xdc0] sm:$0xff] }
 0x287   :  { %3363 = vmatprep.subr.mxu0 %v2155_v9  ;;  %3349 = vmatprep.subr.mxu1 %v2023_v53  ;;  %v2182_v9 = vld [vmem:[#allocation8 + $0xfb8] sm:$0xff]  ;;  %v2071_v53 = vld [vmem:[#allocation8 + $0xc40] sm:$0xff] }
 0x288   :  { %3364 = vmatpush3.msra.mxu0 %v2107_v19  ;;  %3350 = vmatpush3.msra.mxu1 %v1975_v35  ;;  %v2227_v19 = vld [vmem:[#allocation8 + $0x1120] sm:$0xff]  ;;  %v2116_v35 = vld [vmem:[#allocation8 + $0xda8] sm:$0xff] }
 0x289   :  { %2954 = vmatmul.mubr.f32.gmra.mxu0 %v1671_v31  ;;  %3365 = vmatprep.subr.mxu0 %v2152_v42  ;;  %v2143_v31 = vld [vmem:[#allocation8 + $0xe80] sm:$0xff] }
 0x28a   :  { %3351 = vmatprep.subr.mxu1 %v2020_v60  ;;  %3366 = vmatpush3.msra.mxu0 %v2104_v1  ;;  %v2179_v42 = vld [vmem:[#allocation8 + $0xfa0] sm:$0xff]  ;;  %v2068_v60 = vld [vmem:[#allocation8 + $0xc28] sm:$0xff] }
 0x28b   :  { %3098 = vmatprep.mubr.f32.mxu0 %v1664_v59  ;;  %3352 = vmatpush3.msra.mxu1 %v1972_v25  ;;  %v2203_v59 = vld [vmem:[#allocation8 + $0x1060] sm:$0xff]  ;;  %v2224_v1 = vld [vmem:[#allocation8 + $0x1108] sm:$0xff]  ;;  %v2113_v25 = vld [vmem:[#allocation8 + $0xd90] sm:$0xff] }
 0x28c   :  { %3367 = vmatprep.subr.mxu0 %v2149_v30  ;;  %3353 = vmatprep.subr.mxu1 %v2017_v7  ;;  %v2176_v30 = vld [vmem:[#allocation8 + $0xf88] sm:$0xff]  ;;  %v2065_v7 = vld [vmem:[#allocation8 + $0xc10] sm:$0xff] }
 0x28d   :  { %3368 = vmatpush3.msra.mxu0 %v2101_v55  ;;  %3354 = vmatpush3.msra.mxu1 %v1969_v37  ;;  %v2221_v55 = vld [vmem:[#allocation8 + $0x10f0] sm:$0xff] }
 0x28e   :  { %3369 = vmatprep.subr.mxu0 %v2146_v13  ;;  %3024 = vmatmul.mubr.f32.vlgmr.msra.gmra.mxu1 %v1661_v44  ;;  %v4029_v44 = vmax.f32 %v3878_v14, 0.0  ;;  %v2083_v14 = vld [vmem:[#allocation8 + $0xca0] sm:$0xff]  ;;  %v2173_v37 = vld [vmem:[#allocation8 + $0xf70] sm:$0xff]  ;;  %v2218_v13 = vld [vmem:[#allocation8 + $0x10d8] sm:$0xff] }
 0x28f   :  { %3370 = vmatpush3.msra.mxu0 %v2098_v47  ;;  %3399 = vmatprep.subr.mxu1 %v2254_v16  ;;  %v2170_v47 = vld [vmem:[#allocation8 + $0xf58] sm:$0xff]  ;;  %v2215_v16 = vld [vmem:[#allocation8 + $0x10c0] sm:$0xff] }
 0x290   :  { %3028 = vmatprep.mubr.f32.mxu1 %v1674_v20  ;;  %3371 = vmatprep.subr.mxu0 %v2143_v31  ;;  %v2197_v20 = vld [vmem:[#allocation8 + $0x1030] sm:$0xff]  ;;  %v2167_v31 = vld [vmem:[#allocation8 + $0xf40] sm:$0xff] }
 0x291   :  { %3400 = vmatpush3.msra.mxu1 %v2206_v15  ;;  %3372 = vmatpush3.msra.mxu0 %v2095_v28  ;;  %v2212_v15 = vld [vmem:[#allocation8 + $0x10a8] sm:$0xff] }
 0x292   :  { %3401 = vmatprep.subr.mxu1 %v2251_v5  ;;  %3373 = vmatprep.subr.mxu0 %v2140_v6  ;;  %v2164_v28 = vld [vmem:[#allocation8 + $0xf28] sm:$0xff]  ;;  %v2209_v5 = vld [vmem:[#allocation8 + $0x1090] sm:$0xff] }
 0x293   :  { %3402 = vmatpush3.msra.mxu1 %v2203_v59  ;;  %3374 = vmatpush3.msra.mxu0 %v2092_v22  ;;  %v2161_v6 = vld [vmem:[#allocation8 + $0xf10] sm:$0xff]  ;;  %v2255_v22 = vld [vmem:[#allocation10] sm:$0x7] }
 0x294   :  { %3029 = vmatmul.mubr.f32.gmra.mxu1 %v4029_v44  ;;  %3403 = vmatprep.subr.mxu1 %v2248_v63 }
 0x295   :  { %3375 = vmatprep.subr.mxu0 %v2137_v27  ;;  %3404 = vmatpush3.msra.mxu1 %v2200_v23  ;;  %v2260_v23 = vrot.slane %v2255_v22, %v3710_v62 }
 0x296   :  { %3173 = vmatprep.mubr.f32.mxu1 %v1666_v10  ;;  %3376 = vmatpush3.msra.mxu0 %v2089_v17  ;;  %v2188_v10 = vld [vmem:[#allocation8 + $0xfe8] sm:$0xff] }
 0x297   :  { %3405 = vmatprep.subr.mxu1 %v2245_v50  ;;  %3377 = vmatprep.subr.mxu0 %v2134_v61  ;;  %v2339_v44 = vadd.f32 %v2338_v48, %v2260_v23 }
 0x298   :  { %3406 = vmatpush3.msra.mxu1 %v2197_v20  ;;  %3378 = vmatpush3.msra.mxu0 %v2086_v34 }
 0x299   :  { %3407 = vmatprep.subr.mxu1 %v2242_v40  ;;  %3379 = vmatprep.subr.mxu0 %v2131_v39 }
 0x29a   :  { %3408 = vmatpush3.msra.mxu1 %v2194_v8  ;;  %3380 = vmatpush3.msra.mxu0 %v2083_v14 }
 0x29b   :  { %3409 = vmatprep.subr.mxu1 %v2239_v0  ;;  %3381 = vmatprep.subr.mxu0 %v2128_v43 }
 0x29c   :  { %3410 = vmatpush3.msra.mxu1 %v2191_v54  ;;  %3382 = vmatpush3.msra.mxu0 %v2080_v3 }
 0x29d   :  { %3411 = vmatprep.subr.mxu1 %v2236_v33  ;;  %3383 = vmatprep.subr.mxu0 %v2125_v11 }
 0x29e   :  { %3412 = vmatpush3.msra.mxu1 %v2188_v10  ;;  %3384 = vmatpush3.msra.mxu0 %v2077_v56 }
 0x29f   :  { %3413 = vmatprep.subr.mxu1 %v2233_v18  ;;  %3385 = vmatprep.subr.mxu0 %v2122_v12 }
 0x2a0   :  { %3414 = vmatpush3.msra.mxu1 %v2185_v51  ;;  %3386 = vmatpush3.msra.mxu0 %v2074_v26 }
 0x2a1   :  { %3415 = vmatprep.subr.mxu1 %v2230_v21  ;;  %3387 = vmatprep.subr.mxu0 %v2119_v41 }
 0x2a2   :  { %3416 = vmatpush3.msra.mxu1 %v2182_v9  ;;  %3388 = vmatpush3.msra.mxu0 %v2071_v53 }
 0x2a3   :  { %3417 = vmatprep.subr.mxu1 %v2227_v19  ;;  %3389 = vmatprep.subr.mxu0 %v2116_v35 }
 0x2a4   :  { %3418 = vmatpush3.msra.mxu1 %v2179_v42  ;;  %3390 = vmatpush3.msra.mxu0 %v2068_v60 }
 0x2a5   :  { %3419 = vmatprep.subr.mxu1 %v2224_v1  ;;  %3391 = vmatprep.subr.mxu0 %v2113_v25 }
 0x2a6   :  { %3420 = vmatpush3.msra.mxu1 %v2176_v30  ;;  %3392 = vmatpush3.msra.mxu0 %v2065_v7 }
 0x2a7   :  { %3421 = vmatprep.subr.mxu1 %v2221_v55  ;;  %3099 = vmatmul.mubr.f32.vlgmr.msra.gmra.mxu0 %v1663_v38  ;;  %v2415_v38 = vpop.f32.mrf.mxu1 }
 0x2a8   :  { %3422 = vmatpush3.msra.mxu1 %v2173_v37  ;;  %3103 = vmatprep.mubr.f32.mxu0 %v1676_v32  ;;  %v2344_v32 = vpop.f32.mrf.mxu0  ;;  %v2416_v50 = vadd.f32 %v2415_v38, %v2339_v44 }
 0x2a9   :  { %3423 = vmatprep.subr.mxu1 %v2218_v13  ;;  %v2345_v20 = vadd.f32 %v2344_v32, %v2260_v23  ;;  %v2268_v32 = vrot.slane %v2255_v22, %v3775_v36 }
 0x2aa   :  { %3424 = vmatpush3.msra.mxu1 %v2170_v47  ;;  %v2346_v29 = vpop.f32.mrf.mxu0 }
 0x2ab   :  { %3425 = vmatprep.subr.mxu1 %v2215_v16  ;;  %3104 = vmatmul.mubr.f32.gmra.mxu0 %v1675_v4  ;;  %v2417_v4 = vpop.f32.mrf.mxu1 }
 0x2ac   :  { %3426 = vmatpush3.msra.mxu1 %v2167_v31 }
 0x2ad   :  { %3427 = vmatprep.subr.mxu1 %v2212_v15  ;;  %v2421_v63 = vpop.f32.mrf.mxu1 }
 0x2ae   :  { %3428 = vmatpush3.msra.mxu1 %v2164_v28  ;;  %v2422_v43 = vadd.f32 %v2421_v63, %v2345_v20 }
 0x2af   :  { %3429 = vmatprep.subr.mxu1 %v2209_v5  ;;  %v2423_v24 = vpop.f32.mrf.mxu1 }
 0x2b0   :  { %3430 = vmatpush3.msra.mxu1 %v2161_v6 }
 0x2b1   :  { %3174 = vmatmul.mubr.f32.vlgmr.msra.gmra.mxu1 %v1665_v57  ;;  %v2264_v57 = vrot.slane %v2255_v22, %v3730_v52 }
 0x2b2   :  { %3178 = vmatprep.mubr.f32.mxu1 %v1678_v58 }
 0x2b3   :  { %v2341_v46 = vadd.f32 %v2340_v49, %v2264_v57  ;;  %v2347_v39 = vadd.f32 %v2346_v29, %v2264_v57 }
 0x2b5   :  { %3179 = vmatmul.mubr.f32.gmra.mxu1 %v1677_v2  ;;  %v2418_v34 = vadd.f32 %v2417_v4, %v2341_v46  ;;  %v2424_v54 = vadd.f32 %v2423_v24, %v2347_v39 }
 0x2bc   :  { %v2492_v59 = vpop.f32.mrf.mxu0  ;;  %v2569_v58 = vpop.f32.mrf.mxu1 }
 0x2bd   :  { %v2493_v40 = vadd.f32 %v2492_v59, %v2416_v50 }
 0x2be   :  { %v2494_v27 = vpop.f32.mrf.mxu0  ;;  %v2571_v17 = vpop.f32.mrf.mxu1 }
 0x2bf   :  { %v2495_v14 = vadd.f32 %v2494_v27, %v2418_v34  ;;  %v2570_v62 = vadd.f32 %v2569_v58, %v2493_v40 }
 0x2c0   :  { %v2575_v8 = vpop.f32.mrf.mxu1 }
 0x2c1   :  { %v2498_v45 = vpop.f32.mrf.mxu0  ;;  %v2572_v33 = vadd.f32 %v2571_v17, %v2495_v14 }
 0x2c2   :  { %v2499_v3 = vadd.f32 %v2498_v45, %v2422_v43  ;;  %v2577_v52 = vpop.f32.mrf.mxu1 }
 0x2c3   :  { %v2500_v2 = vpop.f32.mrf.mxu0 }
 0x2c4   :  { %v2501_v56 = vadd.f32 %v2500_v2, %v2424_v54  ;;  %v2576_v26 = vadd.f32 %v2575_v8, %v2499_v3 }
 0x2c6   :  { %v2578_v53 = vadd.f32 %v2577_v52, %v2501_v56 }
 0x2fd   :  { %v2646_v61 = vpop.f32.mrf.mxu0 }
 0x2fe   :  { %v2647_v11 = vadd.f32 %v2646_v61, %v2570_v62 }
 0x2ff   :  { %v2648_v0 = vpop.f32.mrf.mxu0 }
 0x300   :  { %v2649_v12 = vadd.f32 %v2648_v0, %v2572_v33 }
 0x302   :  { %v2652_v10 = vpop.f32.mrf.mxu0 }
 0x303   :  { %v2653_v19 = vadd.f32 %v2652_v10, %v2576_v26 }
 0x304   :  { %v2654_v41 = vpop.f32.mrf.mxu0 }
 0x305   :  { %v2655_v42 = vadd.f32 %v2654_v41, %v2578_v53 }
 0x307   :  { %v2723_v18 = vpop.f32.mrf.mxu1 }
 0x308   :  { %v2724_v51 = vadd.f32 %v2723_v18, %v2647_v11 }
 0x309   :  { %v2725_v21 = vpop.f32.mrf.mxu1 }
 0x30a   :  { %3184 = vst [vmem:[#allocation11] sm:$0xff] %v2724_v51  ;;  %v2726_v9 = vadd.f32 %v2725_v21, %v2649_v12 }
 0x30c   :  { %3185 = vst [vmem:[#allocation11 + $0x8] sm:$0xff] %v2726_v9  ;;  %v2729_v35 = vpop.f32.mrf.mxu1 }
 0x30d   :  { %v2730_v60 = vadd.f32 %v2729_v35, %v2653_v19 }
 0x30e   :  { %v2731_v1 = vpop.f32.mrf.mxu1 }
 0x30f   :  { %3187 = vst [vmem:[#allocation11 + $0x18] sm:$0xff] %v2730_v60  ;;  %v2732_v25 = vadd.f32 %v2731_v1, %v2655_v42 }
 0x311   :  { %3188 = vst [vmem:[#allocation11 + $0x20] sm:$0xff] %v2732_v25 }
 0x31f   :  { %v3241_v30 = vpop.f32.mrf.mxu0 }
 0x321   :  { %v3242_v7 = vpop.f32.mrf.mxu0 }
 0x322   :  { %v3243_v38 = vadd.f32 %v3242_v7, %v3241_v30 }
 0x324   :  { %v2801_v27 = vadd.f32 %v3243_v38, %v2268_v32 }
 0x325   :  { %v3244_v55 = vpop.f32.mrf.mxu0 }
 0x327   :  { %v3245_v13 = vpop.f32.mrf.mxu0 }
 0x328   :  { %v3246_v23 = vadd.f32 %v3245_v13, %v3244_v55 }
 0x32a   :  { %v3279_v37 = vpop.f32.mrf.mxu1  ;;  %v2806_v2 = vadd.f32 %v3246_v23, %v2268_v32 }
 0x32c   :  { %v3280_v47 = vpop.f32.mrf.mxu1 }
 0x32d   :  { %v3281_v4 = vadd.f32 %v3280_v47, %v3279_v37 }
 0x32f   :  { %v2876_v45 = vadd.f32 %v3281_v4, %v2801_v27 }
 0x330   :  { %v3282_v31 = vpop.f32.mrf.mxu1 }
 0x332   :  { %v3283_v28 = vpop.f32.mrf.mxu1 }
 0x333   :  { %v3284_v58 = vadd.f32 %v3283_v28, %v3282_v31 }
 0x335   :  { %v2881_v36 = vadd.f32 %v3284_v58, %v2806_v2 }
 0x343   :  { %v3317_v16 = vpop.f32.mrf.mxu0 }
 0x345   :  { %v3318_v15 = vpop.f32.mrf.mxu0 }
 0x346   :  { %v3319_v24 = vadd.f32 %v3318_v15, %v3317_v16 }
 0x348   :  { %v2951_v17 = vadd.f32 %v3319_v24, %v2876_v45 }
 0x349   :  { %v3320_v5 = vpop.f32.mrf.mxu0 }
 0x34b   :  { %v3321_v48 = vpop.f32.mrf.mxu0 }
 0x34c   :  { %v3322_v50 = vadd.f32 %v3321_v48, %v3320_v5 }
 0x34e   :  { %v3355_v6 = vpop.f32.mrf.mxu1  ;;  %v2956_v8 = vadd.f32 %v3322_v50, %v2881_v36 }
 0x350   :  { %v3356_v49 = vpop.f32.mrf.mxu1 }
 0x351   :  { %v3357_v44 = vadd.f32 %v3356_v49, %v3355_v6 }
 0x353   :  { %v3026_v22 = vadd.f32 %v3357_v44, %v2951_v17 }
 0x354   :  { %v3358_v63 = vpop.f32.mrf.mxu1 }
 0x356   :  { %v3359_v46 = vpop.f32.mrf.mxu1 }
 0x357   :  { %v3360_v40 = vadd.f32 %v3359_v46, %v3358_v63 }
 0x359   :  { %v3031_v54 = vadd.f32 %v3360_v40, %v2956_v8 }
 0x367   :  { %v3393_v29 = vpop.f32.mrf.mxu0 }
 0x369   :  { %v3394_v59 = vpop.f32.mrf.mxu0 }
 0x36a   :  { %v3395_v61 = vadd.f32 %v3394_v59, %v3393_v29 }
 0x36b   :  { %v3396_v57 = vpop.f32.mrf.mxu0 }
 0x36c   :  { %v3101_v14 = vadd.f32 %v3395_v61, %v3026_v22 }
 0x36d   :  { %v3397_v20 = vpop.f32.mrf.mxu0 }
 0x36e   :  { %v3398_v0 = vadd.f32 %v3397_v20, %v3396_v57 }
 0x370   :  { %v3106_v33 = vadd.f32 %v3398_v0, %v3031_v54 }
 0x371   :  { %v3431_v34 = vpop.f32.mrf.mxu1 }
 0x373   :  { %v3432_v39 = vpop.f32.mrf.mxu1 }
 0x374   :  { %v3433_v43 = vadd.f32 %v3432_v39, %v3431_v34 }
 0x375   :  { %v3434_v62 = vpop.f32.mrf.mxu1 }
 0x376   :  { %v3176_v3 = vadd.f32 %v3433_v43, %v3101_v14 }
 0x377   :  { %v3435_v52 = vpop.f32.mrf.mxu1 }
 0x378   :  { %3186 = vst [vmem:[#allocation11 + $0x10] sm:$0xff] %v3176_v3  ;;  %v3436_v11 = vadd.f32 %v3435_v52, %v3434_v62 }
 0x37a   :  { %v3181_v10 = vadd.f32 %v3436_v11, %v3106_v33 }
 0x37c   :  { %3189 = vst [vmem:[#allocation11 + $0x28] sm:$0xff] %v3181_v10 }
 0x37d   :  { %3566 = shalt.err (!%p3563_p1)
}
 0x37e   :  { %3201 = dma.vmem_to_hbm [thread:$0]  %s3196_s4, 768, %s4027_s5, [#allocation4], %s3588_s30, %s3588_s30, %s3589_s6  }
 0x37f   :  { %3581 = dma.done.wait [#allocation4], 768  }
 0x380   :  { %3582 = vsyncadd [#allocation4], 4294966528 }
 0x381   :  { %3205 = vsyncpa [#allocation3], 1 }
 0x382   :  { %3206 = vsyncpa [#allocation6], 1 }
 0x383   :  { %3207 = vsyncpa [#allocation9], 1 }
 0x384   :  { %3208 = vsyncpa [#allocation4], 1 }

</bundles_post_ra>
